<compile_context>
chip_gen: v5e
topology: v5e:2x2
jax: 0.10.0
libtpu: 0.0.40
codegen_flags: <defaults>
</compile_context>

<pallas_src>
import jax
import jax.numpy as jnp
from jax.experimental import pallas as pl
from jax.experimental.pallas import tpu as pltpu  # noqa: F401  (TPU backend)

# ----------------------------- configuration --------------------------------
B = 2                     # batch
C = 3                     # image channels
IMG = 16                  # image height/width
PATCH = 4                 # patch size
NUM_PATCHES = (IMG // PATCH) ** 2          # 16
PATCH_DIM = C * PATCH * PATCH              # 48  (pixel_values_per_patch)

ENC_DIM = 32
ENC_HEADS = 4
ENC_DIM_HEAD = 8
ENC_MLP = ENC_DIM * 2
ENC_DEPTH = 1
MASK_RATIO = 0.75

DEC_DIM = 16              # != ENC_DIM so enc_to_dec is a real Linear
DEC_HEADS = 2
DEC_DIM_HEAD = 8
DEC_DEPTH = 1
DEC_MLP = DEC_DIM * 4

# per-transformer-block parameter order (flattened into the kernel arg list)
_BLOCK_PARAM_NAMES = ('ln1g', 'ln1b', 'wqkv', 'wo', 'bo',
                      'ln2g', 'ln2b', 'w1', 'b1', 'w2', 'b2')
_NP = len(_BLOCK_PARAM_NAMES)   # 11


# ----------------------------- in-kernel math --------------------------------
def _mm_t(a, b):
    """a @ b.T with b in PyTorch (out, in) layout; contraction on last dims."""
    return jax.lax.dot_general(
        a, b, (((1,), (1,)), ((), ())), preferred_element_type=jnp.float32)


def _erf(x):
    # Abramowitz & Stegun 7.1.26 (float32-level match with exact-erf GELU).
    # The 1/(1+p|x|) term goes to the EUP via pl.reciprocal.
    a1, a2, a3, a4, a5 = (0.254829592, -0.284496736, 1.421413741,
                          -1.453152027, 1.061405429)
    p = 0.3275911
    s = jnp.where(x >= 0.0, 1.0, -1.0)
    ax = jnp.abs(x)
    t = pl.reciprocal(1.0 + p * ax, approx=True)
    poly = ((((a5 * t + a4) * t + a3) * t + a2) * t + a1) * t
    return s * (1.0 - poly * jnp.exp(-ax * ax))


def _gelu(x):
    # nn.GELU() (exact erf form), erf replaced by the polynomial above.
    return 0.5 * x * (1.0 + _erf(x * 0.7071067811865475))


def _layer_norm(x, g, b, eps=1e-5):
    mu = jnp.mean(x, axis=-1, keepdims=True)
    xc = x - mu
    var = jnp.mean(xc * xc, axis=-1, keepdims=True)
    return xc * jax.lax.rsqrt(var + eps) * g + b


def _block(x2d, p, Bv, Nv, H, Dh):
    """One pre-norm transformer block on flattened (B*N, D) rows.

    Attention: single QKV matmul, per-head attention on static lane slices
    (batched over B with einsum), head concat, single out-projection."""
    ln1g, ln1b, wqkv, wo, bo, ln2g, ln2b, w1, b1, w2, b2 = p
    inner = H * Dh
    scale = Dh ** -0.5

    # --- multi-head self-attention ---
    h = _layer_norm(x2d, ln1g, ln1b)
    qkv = _mm_t(h, wqkv)                                   # (B*N, 3*inner)
    q = qkv[:, :inner].reshape(Bv, Nv, inner)
    k = qkv[:, inner:2 * inner].reshape(Bv, Nv, inner)
    v = qkv[:, 2 * inner:].reshape(Bv, Nv, inner)
    head_outs = []
    for hd in range(H):                                    # static, small H
        sl = slice(hd * Dh, (hd + 1) * Dh)
        qh, kh, vh = q[:, :, sl], k[:, :, sl], v[:, :, sl]
        dots = jnp.einsum('bqd,bkd->bqk', qh, kh,
                          preferred_element_type=jnp.float32) * scale
        dots = dots - jnp.max(dots, axis=-1, keepdims=True)
        e = jnp.exp(dots)
        attn = e * pl.reciprocal(jnp.sum(e, axis=-1, keepdims=True), approx=True)
        head_outs.append(jnp.einsum('bqk,bkd->bqd', attn, vh,
                                    preferred_element_type=jnp.float32))
    o = jnp.concatenate(head_outs, axis=-1).reshape(Bv * Nv, inner)
    x2d = x2d + _mm_t(o, wo) + bo                          # residual

    # --- MLP ---
    h2 = _layer_norm(x2d, ln2g, ln2b)
    hid = _gelu(_mm_t(h2, w1) + b1)
    return x2d + _mm_t(hid, w2) + b2                       # residual


# ----------------------------- fused Pallas kernels --------------------------
def make_encoder_kernel(depth, Bv, Nv, H, Dh):
    """patch_to_emb + pos add + encoder transformer + final LN + enc_to_dec."""
    def kernel(*refs):
        patches_ref, pos_ref, pe_w, pe_b = refs[:4]
        layer_refs = refs[4:4 + depth * _NP]
        lng, lnb, e2d_w, e2d_b = refs[4 + depth * _NP: 8 + depth * _NP]
        out_ref = refs[8 + depth * _NP]

        BN = Bv * Nv
        patches = patches_ref[...].astype(jnp.float32).reshape(BN, PATCH_DIM)
        pos = pos_ref[...].astype(jnp.float32).reshape(BN, ENC_DIM)

        # patch_to_emb fused with the positional-embedding add
        x = _mm_t(patches, pe_w[...]) + pe_b[...] + pos
        for l in range(depth):
            p = tuple(r[...] for r in layer_refs[l * _NP:(l + 1) * _NP])
            x = _block(x, p, Bv, Nv, H, Dh)
        x = _layer_norm(x, lng[...], lnb[...])
        # enc_to_dec fused in
        y = _mm_t(x, e2d_w[...]) + e2d_b[...]
        out_ref[...] = y.reshape(Bv, Nv, DEC_DIM).astype(out_ref.dtype)
    return kernel


def make_decoder_kernel(depth, Bv, Nv, H, Dh, num_masked):
    """decoder transformer + final LN + to_pixels + MSE; only (1,1) loss out."""
    inv_total = 1.0 / float(Bv * num_masked * PATCH_DIM)

    def kernel(*refs):
        tok_ref, tgt_ref = refs[:2]
        layer_refs = refs[2:2 + depth * _NP]
        lng, lnb, px_w, px_b = refs[2 + depth * _NP: 6 + depth * _NP]
        loss_ref = refs[6 + depth * _NP]

        x = tok_ref[...].astype(jnp.float32).reshape(Bv * Nv, DEC_DIM)
        for l in range(depth):
            p = tuple(r[...] for r in layer_refs[l * _NP:(l + 1) * _NP])
            x = _block(x, p, Bv, Nv, H, Dh)
        x = _layer_norm(x, lng[...], lnb[...])

        # first num_masked tokens of each batch element -> to_pixels -> MSE
        mask_out = (x.reshape(Bv, Nv, DEC_DIM)[:, :num_masked]
                    .reshape(Bv * num_masked, DEC_DIM))
        pred = _mm_t(mask_out, px_w[...]) + px_b[...]            # (B*nm, 48)
        tgt = tgt_ref[...].astype(jnp.float32).reshape(Bv * num_masked, PATCH_DIM)
        d = pred - tgt
        s = jnp.sum(d * d, axis=1, keepdims=True)                # (B*nm, 1)
        loss_ref[...] = jnp.sum(s, axis=0, keepdims=True) * inv_total
    return kernel


# ----------------------------- cost estimates --------------------------------
def _enc_cost(batch, n_unmasked):
    bn = batch * n_unmasked
    fl = 2 * bn * (PATCH_DIM * ENC_DIM                       # patch_to_emb
                   + ENC_DIM * 3 * ENC_HEADS * ENC_DIM_HEAD  # qkv
                   + ENC_HEADS * ENC_DIM_HEAD * ENC_DIM      # out proj
                   + ENC_DIM * ENC_MLP * 2                   # mlp
                   + ENC_DIM * DEC_DIM)                      # enc_to_dec
    fl += 2 * batch * ENC_HEADS * n_unmasked * n_unmasked * ENC_DIM_HEAD * 2
    return pl.CostEstimate(flops=int(fl * ENC_DEPTH + fl),
                           transcendentals=int(bn * (ENC_MLP + ENC_HEADS * n_unmasked)),
                           bytes_accessed=60_000)


def _dec_cost(batch, n_tokens, n_masked):
    bn = batch * n_tokens
    fl = 2 * bn * (DEC_DIM * 3 * DEC_HEADS * DEC_DIM_HEAD
                   + DEC_HEADS * DEC_DIM_HEAD * DEC_DIM
                   + DEC_DIM * DEC_MLP * 2)
    fl += 2 * batch * DEC_HEADS * n_tokens * n_tokens * DEC_DIM_HEAD * 2
    fl += 2 * batch * n_masked * DEC_DIM * PATCH_DIM
    return pl.CostEstimate(flops=int(fl * DEC_DEPTH + fl),
                           transcendentals=int(bn * (DEC_MLP + DEC_HEADS * n_tokens)),
                           bytes_accessed=40_000)


# ----------------------------- glue (plain JAX) -------------------------------
def patchify(img, p):
    # 'b c (h p1) (w p2) -> b (h w) (p1 p2 c)'
    b, c, hh, ww = img.shape
    x = img.reshape(b, c, hh // p, p, ww // p, p)
    x = x.transpose(0, 2, 4, 3, 5, 1)                 # b h w p1 p2 c
    return x.reshape(b, (hh // p) * (ww // p), p * p * c)


def _flat_layers(layers):
    out = []
    for lp in layers:
        out.extend(lp[n] for n in _BLOCK_PARAM_NAMES)
    return out


def mae_forward(params, img, key):
    patches = patchify(img, PATCH)                    # (B, 16, 48)
    batch, num_patches, _ = patches.shape
    num_masked = int(MASK_RATIO * num_patches)        # 12
    num_unmasked = num_patches - num_masked           # 4

    # random 75% masking: torch.rand(...).argsort(-1) equivalent
    rand = jax.random.uniform(key, (batch, num_patches))
    rand_indices = jnp.argsort(rand, axis=-1)
    masked_indices = rand_indices[:, :num_masked]
    unmasked_indices = rand_indices[:, num_masked:]

    unmasked_patches = jnp.take_along_axis(patches, unmasked_indices[:, :, None], axis=1)
    masked_patches = jnp.take_along_axis(patches, masked_indices[:, :, None], axis=1)
    pos_unmasked = jnp.take(params['pos_embedding'][0], unmasked_indices, axis=0)

    # ---- fused encoder kernel ----
    enc_in = [unmasked_patches, pos_unmasked,
              params['patch_to_emb_w'], params['patch_to_emb_b']]
    enc_in += _flat_layers(params['enc_layers'])
    enc_in += [params['enc_ln_g'], params['enc_ln_b'],
               params['enc_to_dec_w'], params['enc_to_dec_b']]

    decoder_tokens_enc = pl.pallas_call(
        make_encoder_kernel(ENC_DEPTH, batch, num_unmasked, ENC_HEADS, ENC_DIM_HEAD),
        out_shape=jax.ShapeDtypeStruct((batch, num_unmasked, DEC_DIM), jnp.float32),
        cost_estimate=_enc_cost(batch, num_unmasked),
    )(*enc_in)

    # mask tokens + decoder positional embedding of the masked indices (glue)
    pos_masked = jnp.take(params['dec_pos_emb'], masked_indices, axis=0)   # (B, nm, DEC_DIM)
    mask_tokens = params['mask_token'][None, None, :] + pos_masked
    decoder_tokens = jnp.concatenate([mask_tokens, decoder_tokens_enc], axis=1)

    # ---- fused decoder kernel (loss comes straight out) ----
    dec_in = [decoder_tokens, masked_patches]
    dec_in += _flat_layers(params['dec_layers'])
    dec_in += [params['dec_ln_g'], params['dec_ln_b'],
               params['to_pixels_w'], params['to_pixels_b']]

    loss = pl.pallas_call(
        make_decoder_kernel(DEC_DEPTH, batch, num_patches, DEC_HEADS, DEC_DIM_HEAD,
                            num_masked),
        out_shape=jax.ShapeDtypeStruct((1, 1), jnp.float32),
        cost_estimate=_dec_cost(batch, num_patches, num_masked),
    )(*dec_in)
    return loss[0, 0]


# ----------------------------- parameters ------------------------------------
def init_block(key, dim, heads, dim_head, mlp_dim):
    inner = heads * dim_head
    k = jax.random.split(key, 4)
    return dict(
        ln1g=jnp.ones((1, dim), jnp.float32), ln1b=jnp.zeros((1, dim), jnp.float32),
        wqkv=0.02 * jax.random.normal(k[0], (3 * inner, dim), jnp.float32),
        wo=0.02 * jax.random.normal(k[1], (dim, inner), jnp.float32),
        bo=jnp.zeros((1, dim), jnp.float32),
        ln2g=jnp.ones((1, dim), jnp.float32), ln2b=jnp.zeros((1, dim), jnp.float32),
        w1=0.02 * jax.random.normal(k[2], (mlp_dim, dim), jnp.float32),
        b1=jnp.zeros((1, mlp_dim), jnp.float32),
        w2=0.02 * jax.random.normal(k[3], (dim, mlp_dim), jnp.float32),
        b2=jnp.zeros((1, dim), jnp.float32),
    )


def init_params(key):
    ks = jax.random.split(key, 8)
    return dict(
        patch_to_emb_w=0.02 * jax.random.normal(ks[0], (ENC_DIM, PATCH_DIM), jnp.float32),
        patch_to_emb_b=jnp.zeros((1, ENC_DIM), jnp.float32),
        pos_embedding=0.02 * jax.random.normal(ks[1], (1, NUM_PATCHES, ENC_DIM), jnp.float32),
        enc_layers=[init_block(k, ENC_DIM, ENC_HEADS, ENC_DIM_HEAD, ENC_MLP)
                    for k in jax.random.split(ks[2], ENC_DEPTH)],
        enc_ln_g=jnp.ones((1, ENC_DIM), jnp.float32),
        enc_ln_b=jnp.zeros((1, ENC_DIM), jnp.float32),
        enc_to_dec_w=0.02 * jax.random.normal(ks[3], (DEC_DIM, ENC_DIM), jnp.float32),
        enc_to_dec_b=jnp.zeros((1, DEC_DIM), jnp.float32),
        mask_token=jax.random.normal(ks[4], (DEC_DIM,), jnp.float32),
        dec_pos_emb=0.02 * jax.random.normal(ks[5], (NUM_PATCHES, DEC_DIM), jnp.float32),
        dec_layers=[init_block(k, DEC_DIM, DEC_HEADS, DEC_DIM_HEAD, DEC_MLP)
                    for k in jax.random.split(ks[6], DEC_DEPTH)],
        dec_ln_g=jnp.ones((1, DEC_DIM), jnp.float32),
        dec_ln_b=jnp.zeros((1, DEC_DIM), jnp.float32),
        to_pixels_w=0.02 * jax.random.normal(ks[7], (PATCH_DIM, DEC_DIM), jnp.float32),
        to_pixels_b=jnp.zeros((1, PATCH_DIM), jnp.float32),
    )


# TODO(synk): dropout layers are omitted (rate 0 by default / eval semantics).
if __name__ == "__main__":
    key = jax.random.PRNGKey(0)
    pkey, xkey, mkey = jax.random.split(key, 3)
    params = init_params(pkey)
    img = jax.random.normal(xkey, (B, C, IMG, IMG), jnp.float32)
    loss = jax.jit(mae_forward)(params, img, mkey)
    jax.block_until_ready(loss)
    print("KERNEL_OK")
</pallas_src>

<mosaic_0001>
module attributes {stable_mosaic.version = 11 : i64} {
  func.func @kernel(%arg0: memref<2x4x48xf32, #tpu.memory_space<vmem>>, %arg1: memref<2x4x32xf32, #tpu.memory_space<vmem>>, %arg2: memref<32x48xf32, #tpu.memory_space<vmem>>, %arg3: memref<1x32xf32, #tpu.memory_space<vmem>>, %arg4: memref<1x32xf32, #tpu.memory_space<vmem>>, %arg5: memref<1x32xf32, #tpu.memory_space<vmem>>, %arg6: memref<96x32xf32, #tpu.memory_space<vmem>>, %arg7: memref<32x32xf32, #tpu.memory_space<vmem>>, %arg8: memref<1x32xf32, #tpu.memory_space<vmem>>, %arg9: memref<1x32xf32, #tpu.memory_space<vmem>>, %arg10: memref<1x32xf32, #tpu.memory_space<vmem>>, %arg11: memref<64x32xf32, #tpu.memory_space<vmem>>, %arg12: memref<1x64xf32, #tpu.memory_space<vmem>>, %arg13: memref<32x64xf32, #tpu.memory_space<vmem>>, %arg14: memref<1x32xf32, #tpu.memory_space<vmem>>, %arg15: memref<1x32xf32, #tpu.memory_space<vmem>>, %arg16: memref<1x32xf32, #tpu.memory_space<vmem>>, %arg17: memref<16x32xf32, #tpu.memory_space<vmem>>, %arg18: memref<1x16xf32, #tpu.memory_space<vmem>>, %arg19: memref<2x4x16xf32, #tpu.memory_space<vmem>>) attributes {dimension_semantics = [], scalar_prefetch = 0 : i64, scratch_operands = 0 : i64, tpu.core_type = #tpu.core_type<tc>} {
    %c0 = arith.constant 0 : index
    %c0_0 = arith.constant 0 : index
    %c0_1 = arith.constant 0 : index
    %0 = vector.load %arg0[%c0, %c0_0, %c0_1] : memref<2x4x48xf32, #tpu.memory_space<vmem>>, vector<2x4x48xf32>
    %1 = vector.shape_cast %0 : vector<2x4x48xf32> to vector<8x48xf32>
    %c0_2 = arith.constant 0 : index
    %c0_3 = arith.constant 0 : index
    %c0_4 = arith.constant 0 : index
    %2 = vector.load %arg1[%c0_2, %c0_3, %c0_4] : memref<2x4x32xf32, #tpu.memory_space<vmem>>, vector<2x4x32xf32>
    %3 = vector.shape_cast %2 : vector<2x4x32xf32> to vector<8x32xf32>
    %c0_5 = arith.constant 0 : index
    %c0_6 = arith.constant 0 : index
    %4 = vector.load %arg2[%c0_5, %c0_6] : memref<32x48xf32, #tpu.memory_space<vmem>>, vector<32x48xf32>
    %cst = arith.constant dense<0.000000e+00> : vector<8x32xf32>
    %5 = tpu.matmul %1, %4, %cst {dimension_numbers = #tpu.dot_dimension_numbers<[1], [1], [0], [0], [0, 0, 1, 0], [], []>} : vector<8x48xf32>, vector<32x48xf32>, vector<8x32xf32> -> vector<8x32xf32>
    %c0_7 = arith.constant 0 : index
    %c0_8 = arith.constant 0 : index
    %6 = vector.load %arg3[%c0_7, %c0_8] : memref<1x32xf32, #tpu.memory_space<vmem>>, vector<1x32xf32>
    %7 = vector.broadcast %6 : vector<1x32xf32> to vector<8x32xf32>
    %8 = arith.addf %5, %7 : vector<8x32xf32>
    %9 = arith.addf %8, %3 : vector<8x32xf32>
    %c0_9 = arith.constant 0 : index
    %c0_10 = arith.constant 0 : index
    %10 = vector.load %arg4[%c0_9, %c0_10] : memref<1x32xf32, #tpu.memory_space<vmem>>, vector<1x32xf32>
    %c0_11 = arith.constant 0 : index
    %c0_12 = arith.constant 0 : index
    %11 = vector.load %arg5[%c0_11, %c0_12] : memref<1x32xf32, #tpu.memory_space<vmem>>, vector<1x32xf32>
    %c0_13 = arith.constant 0 : index
    %c0_14 = arith.constant 0 : index
    %12 = vector.load %arg6[%c0_13, %c0_14] : memref<96x32xf32, #tpu.memory_space<vmem>>, vector<96x32xf32>
    %c0_15 = arith.constant 0 : index
    %c0_16 = arith.constant 0 : index
    %13 = vector.load %arg7[%c0_15, %c0_16] : memref<32x32xf32, #tpu.memory_space<vmem>>, vector<32x32xf32>
    %c0_17 = arith.constant 0 : index
    %c0_18 = arith.constant 0 : index
    %14 = vector.load %arg8[%c0_17, %c0_18] : memref<1x32xf32, #tpu.memory_space<vmem>>, vector<1x32xf32>
    %c0_19 = arith.constant 0 : index
    %c0_20 = arith.constant 0 : index
    %15 = vector.load %arg9[%c0_19, %c0_20] : memref<1x32xf32, #tpu.memory_space<vmem>>, vector<1x32xf32>
    %c0_21 = arith.constant 0 : index
    %c0_22 = arith.constant 0 : index
    %16 = vector.load %arg10[%c0_21, %c0_22] : memref<1x32xf32, #tpu.memory_space<vmem>>, vector<1x32xf32>
    %c0_23 = arith.constant 0 : index
    %c0_24 = arith.constant 0 : index
    %17 = vector.load %arg11[%c0_23, %c0_24] : memref<64x32xf32, #tpu.memory_space<vmem>>, vector<64x32xf32>
    %c0_25 = arith.constant 0 : index
    %c0_26 = arith.constant 0 : index
    %18 = vector.load %arg12[%c0_25, %c0_26] : memref<1x64xf32, #tpu.memory_space<vmem>>, vector<1x64xf32>
    %c0_27 = arith.constant 0 : index
    %c0_28 = arith.constant 0 : index
    %19 = vector.load %arg13[%c0_27, %c0_28] : memref<32x64xf32, #tpu.memory_space<vmem>>, vector<32x64xf32>
    %c0_29 = arith.constant 0 : index
    %c0_30 = arith.constant 0 : index
    %20 = vector.load %arg14[%c0_29, %c0_30] : memref<1x32xf32, #tpu.memory_space<vmem>>, vector<1x32xf32>
    %cst_31 = arith.constant dense<0.000000e+00> : vector<8xf32>
    %21 = vector.multi_reduction <add>, %9, %cst_31 [1] : vector<8x32xf32> to vector<8xf32>
    %22 = vector.shape_cast %21 : vector<8xf32> to vector<8x1xf32>
    %cst_32 = arith.constant 3.200000e+01 : f32
    %23 = vector.broadcast %cst_32 : f32 to vector<8x1xf32>
    %24 = arith.divf %22, %23 : vector<8x1xf32>
    %25 = vector.broadcast %24 : vector<8x1xf32> to vector<8x32xf32>
    %26 = arith.subf %9, %25 : vector<8x32xf32>
    %27 = arith.mulf %26, %26 : vector<8x32xf32>
    %cst_33 = arith.constant dense<0.000000e+00> : vector<8xf32>
    %28 = vector.multi_reduction <add>, %27, %cst_33 [1] : vector<8x32xf32> to vector<8xf32>
    %29 = vector.shape_cast %28 : vector<8xf32> to vector<8x1xf32>
    %cst_34 = arith.constant 3.200000e+01 : f32
    %30 = vector.broadcast %cst_34 : f32 to vector<8x1xf32>
    %31 = arith.divf %29, %30 : vector<8x1xf32>
    %cst_35 = arith.constant 9.99999974E-6 : f32
    %32 = vector.broadcast %cst_35 : f32 to vector<8x1xf32>
    %33 = arith.addf %31, %32 : vector<8x1xf32>
    %34 = math.rsqrt %33 : vector<8x1xf32>
    %35 = vector.broadcast %34 : vector<8x1xf32> to vector<8x32xf32>
    %36 = arith.mulf %26, %35 : vector<8x32xf32>
    %37 = vector.broadcast %10 : vector<1x32xf32> to vector<8x32xf32>
    %38 = arith.mulf %36, %37 : vector<8x32xf32>
    %39 = vector.broadcast %11 : vector<1x32xf32> to vector<8x32xf32>
    %40 = arith.addf %38, %39 : vector<8x32xf32>
    %cst_36 = arith.constant dense<0.000000e+00> : vector<8x96xf32>
    %41 = tpu.matmul %40, %12, %cst_36 {dimension_numbers = #tpu.dot_dimension_numbers<[1], [1], [0], [0], [0, 0, 1, 0], [], []>} : vector<8x32xf32>, vector<96x32xf32>, vector<8x96xf32> -> vector<8x96xf32>
    %42 = vector.extract_strided_slice %41 {offsets = [0, 0], sizes = [8, 32], strides = [1, 1]} : vector<8x96xf32> to vector<8x32xf32>
    %43 = vector.shape_cast %42 : vector<8x32xf32> to vector<2x4x32xf32>
    %44 = vector.extract_strided_slice %41 {offsets = [0, 32], sizes = [8, 32], strides = [1, 1]} : vector<8x96xf32> to vector<8x32xf32>
    %45 = vector.shape_cast %44 : vector<8x32xf32> to vector<2x4x32xf32>
    %46 = vector.extract_strided_slice %41 {offsets = [0, 64], sizes = [8, 32], strides = [1, 1]} : vector<8x96xf32> to vector<8x32xf32>
    %47 = vector.shape_cast %46 : vector<8x32xf32> to vector<2x4x32xf32>
    %48 = vector.extract_strided_slice %43 {offsets = [0, 0, 0], sizes = [2, 4, 8], strides = [1, 1, 1]} : vector<2x4x32xf32> to vector<2x4x8xf32>
    %49 = vector.extract_strided_slice %45 {offsets = [0, 0, 0], sizes = [2, 4, 8], strides = [1, 1, 1]} : vector<2x4x32xf32> to vector<2x4x8xf32>
    %50 = vector.extract_strided_slice %47 {offsets = [0, 0, 0], sizes = [2, 4, 8], strides = [1, 1, 1]} : vector<2x4x32xf32> to vector<2x4x8xf32>
    "tpu.trace_start"() <{level = 10 : i32, message = "bqd,bkd->bqk"}> : () -> ()
    %cst_37 = arith.constant dense<0.000000e+00> : vector<2x4x4xf32>
    %51 = tpu.matmul %48, %49, %cst_37 {dimension_numbers = #tpu.dot_dimension_numbers<[2], [2], [1], [1], [0, 0, 0, 1, 1, 1], [0], [0]>} : vector<2x4x8xf32>, vector<2x4x8xf32>, vector<2x4x4xf32> -> vector<2x4x4xf32>
    "tpu.trace_stop"() : () -> ()
    %cst_38 = arith.constant 0.353553385 : f32
    %52 = vector.broadcast %cst_38 : f32 to vector<2x4x4xf32>
    %53 = arith.mulf %51, %52 : vector<2x4x4xf32>
    %cst_39 = arith.constant dense<0xFF800000> : vector<2x4xf32>
    %54 = vector.multi_reduction <maximumf>, %53, %cst_39 [2] : vector<2x4x4xf32> to vector<2x4xf32>
    %55 = vector.shape_cast %54 : vector<2x4xf32> to vector<2x4x1xf32>
    %56 = vector.broadcast %55 : vector<2x4x1xf32> to vector<2x4x4xf32>
    %57 = arith.subf %53, %56 : vector<2x4x4xf32>
    %58 = math.exp %57 : vector<2x4x4xf32>
    %cst_40 = arith.constant dense<0.000000e+00> : vector<2x4xf32>
    %59 = vector.multi_reduction <add>, %58, %cst_40 [2] : vector<2x4x4xf32> to vector<2x4xf32>
    %60 = vector.shape_cast %59 : vector<2x4xf32> to vector<2x4x1xf32>
    %61 = tpu.reciprocal %60 {approx = true} : vector<2x4x1xf32> -> vector<2x4x1xf32>
    %62 = vector.broadcast %61 : vector<2x4x1xf32> to vector<2x4x4xf32>
    %63 = arith.mulf %58, %62 : vector<2x4x4xf32>
    "tpu.trace_start"() <{level = 10 : i32, message = "bqk,bkd->bqd"}> : () -> ()
    %cst_41 = arith.constant dense<0.000000e+00> : vector<2x4x8xf32>
    %64 = tpu.matmul %63, %50, %cst_41 {dimension_numbers = #tpu.dot_dimension_numbers<[2], [1], [1], [2], [0, 0, 0, 1, 1, 2], [0], [0]>} : vector<2x4x4xf32>, vector<2x4x8xf32>, vector<2x4x8xf32> -> vector<2x4x8xf32>
    "tpu.trace_stop"() : () -> ()
    %65 = vector.extract_strided_slice %43 {offsets = [0, 0, 8], sizes = [2, 4, 8], strides = [1, 1, 1]} : vector<2x4x32xf32> to vector<2x4x8xf32>
    %66 = vector.extract_strided_slice %45 {offsets = [0, 0, 8], sizes = [2, 4, 8], strides = [1, 1, 1]} : vector<2x4x32xf32> to vector<2x4x8xf32>
    %67 = vector.extract_strided_slice %47 {offsets = [0, 0, 8], sizes = [2, 4, 8], strides = [1, 1, 1]} : vector<2x4x32xf32> to vector<2x4x8xf32>
    "tpu.trace_start"() <{level = 10 : i32, message = "bqd,bkd->bqk"}> : () -> ()
    %cst_42 = arith.constant dense<0.000000e+00> : vector<2x4x4xf32>
    %68 = tpu.matmul %65, %66, %cst_42 {dimension_numbers = #tpu.dot_dimension_numbers<[2], [2], [1], [1], [0, 0, 0, 1, 1, 1], [0], [0]>} : vector<2x4x8xf32>, vector<2x4x8xf32>, vector<2x4x4xf32> -> vector<2x4x4xf32>
    "tpu.trace_stop"() : () -> ()
    %cst_43 = arith.constant 0.353553385 : f32
    %69 = vector.broadcast %cst_43 : f32 to vector<2x4x4xf32>
    %70 = arith.mulf %68, %69 : vector<2x4x4xf32>
    %cst_44 = arith.constant dense<0xFF800000> : vector<2x4xf32>
    %71 = vector.multi_reduction <maximumf>, %70, %cst_44 [2] : vector<2x4x4xf32> to vector<2x4xf32>
    %72 = vector.shape_cast %71 : vector<2x4xf32> to vector<2x4x1xf32>
    %73 = vector.broadcast %72 : vector<2x4x1xf32> to vector<2x4x4xf32>
    %74 = arith.subf %70, %73 : vector<2x4x4xf32>
    %75 = math.exp %74 : vector<2x4x4xf32>
    %cst_45 = arith.constant dense<0.000000e+00> : vector<2x4xf32>
    %76 = vector.multi_reduction <add>, %75, %cst_45 [2] : vector<2x4x4xf32> to vector<2x4xf32>
    %77 = vector.shape_cast %76 : vector<2x4xf32> to vector<2x4x1xf32>
    %78 = tpu.reciprocal %77 {approx = true} : vector<2x4x1xf32> -> vector<2x4x1xf32>
    %79 = vector.broadcast %78 : vector<2x4x1xf32> to vector<2x4x4xf32>
    %80 = arith.mulf %75, %79 : vector<2x4x4xf32>
    "tpu.trace_start"() <{level = 10 : i32, message = "bqk,bkd->bqd"}> : () -> ()
    %cst_46 = arith.constant dense<0.000000e+00> : vector<2x4x8xf32>
    %81 = tpu.matmul %80, %67, %cst_46 {dimension_numbers = #tpu.dot_dimension_numbers<[2], [1], [1], [2], [0, 0, 0, 1, 1, 2], [0], [0]>} : vector<2x4x4xf32>, vector<2x4x8xf32>, vector<2x4x8xf32> -> vector<2x4x8xf32>
    "tpu.trace_stop"() : () -> ()
    %82 = vector.extract_strided_slice %43 {offsets = [0, 0, 16], sizes = [2, 4, 8], strides = [1, 1, 1]} : vector<2x4x32xf32> to vector<2x4x8xf32>
    %83 = vector.extract_strided_slice %45 {offsets = [0, 0, 16], sizes = [2, 4, 8], strides = [1, 1, 1]} : vector<2x4x32xf32> to vector<2x4x8xf32>
    %84 = vector.extract_strided_slice %47 {offsets = [0, 0, 16], sizes = [2, 4, 8], strides = [1, 1, 1]} : vector<2x4x32xf32> to vector<2x4x8xf32>
    "tpu.trace_start"() <{level = 10 : i32, message = "bqd,bkd->bqk"}> : () -> ()
    %cst_47 = arith.constant dense<0.000000e+00> : vector<2x4x4xf32>
    %85 = tpu.matmul %82, %83, %cst_47 {dimension_numbers = #tpu.dot_dimension_numbers<[2], [2], [1], [1], [0, 0, 0, 1, 1, 1], [0], [0]>} : vector<2x4x8xf32>, vector<2x4x8xf32>, vector<2x4x4xf32> -> vector<2x4x4xf32>
    "tpu.trace_stop"() : () -> ()
    %cst_48 = arith.constant 0.353553385 : f32
    %86 = vector.broadcast %cst_48 : f32 to vector<2x4x4xf32>
    %87 = arith.mulf %85, %86 : vector<2x4x4xf32>
    %cst_49 = arith.constant dense<0xFF800000> : vector<2x4xf32>
    %88 = vector.multi_reduction <maximumf>, %87, %cst_49 [2] : vector<2x4x4xf32> to vector<2x4xf32>
    %89 = vector.shape_cast %88 : vector<2x4xf32> to vector<2x4x1xf32>
    %90 = vector.broadcast %89 : vector<2x4x1xf32> to vector<2x4x4xf32>
    %91 = arith.subf %87, %90 : vector<2x4x4xf32>
    %92 = math.exp %91 : vector<2x4x4xf32>
    %cst_50 = arith.constant dense<0.000000e+00> : vector<2x4xf32>
    %93 = vector.multi_reduction <add>, %92, %cst_50 [2] : vector<2x4x4xf32> to vector<2x4xf32>
    %94 = vector.shape_cast %93 : vector<2x4xf32> to vector<2x4x1xf32>
    %95 = tpu.reciprocal %94 {approx = true} : vector<2x4x1xf32> -> vector<2x4x1xf32>
    %96 = vector.broadcast %95 : vector<2x4x1xf32> to vector<2x4x4xf32>
    %97 = arith.mulf %92, %96 : vector<2x4x4xf32>
    "tpu.trace_start"() <{level = 10 : i32, message = "bqk,bkd->bqd"}> : () -> ()
    %cst_51 = arith.constant dense<0.000000e+00> : vector<2x4x8xf32>
    %98 = tpu.matmul %97, %84, %cst_51 {dimension_numbers = #tpu.dot_dimension_numbers<[2], [1], [1], [2], [0, 0, 0, 1, 1, 2], [0], [0]>} : vector<2x4x4xf32>, vector<2x4x8xf32>, vector<2x4x8xf32> -> vector<2x4x8xf32>
    "tpu.trace_stop"() : () -> ()
    %99 = vector.extract_strided_slice %43 {offsets = [0, 0, 24], sizes = [2, 4, 8], strides = [1, 1, 1]} : vector<2x4x32xf32> to vector<2x4x8xf32>
    %100 = vector.extract_strided_slice %45 {offsets = [0, 0, 24], sizes = [2, 4, 8], strides = [1, 1, 1]} : vector<2x4x32xf32> to vector<2x4x8xf32>
    %101 = vector.extract_strided_slice %47 {offsets = [0, 0, 24], sizes = [2, 4, 8], strides = [1, 1, 1]} : vector<2x4x32xf32> to vector<2x4x8xf32>
    "tpu.trace_start"() <{level = 10 : i32, message = "bqd,bkd->bqk"}> : () -> ()
    %cst_52 = arith.constant dense<0.000000e+00> : vector<2x4x4xf32>
    %102 = tpu.matmul %99, %100, %cst_52 {dimension_numbers = #tpu.dot_dimension_numbers<[2], [2], [1], [1], [0, 0, 0, 1, 1, 1], [0], [0]>} : vector<2x4x8xf32>, vector<2x4x8xf32>, vector<2x4x4xf32> -> vector<2x4x4xf32>
    "tpu.trace_stop"() : () -> ()
    %cst_53 = arith.constant 0.353553385 : f32
    %103 = vector.broadcast %cst_53 : f32 to vector<2x4x4xf32>
    %104 = arith.mulf %102, %103 : vector<2x4x4xf32>
    %cst_54 = arith.constant dense<0xFF800000> : vector<2x4xf32>
    %105 = vector.multi_reduction <maximumf>, %104, %cst_54 [2] : vector<2x4x4xf32> to vector<2x4xf32>
    %106 = vector.shape_cast %105 : vector<2x4xf32> to vector<2x4x1xf32>
    %107 = vector.broadcast %106 : vector<2x4x1xf32> to vector<2x4x4xf32>
    %108 = arith.subf %104, %107 : vector<2x4x4xf32>
    %109 = math.exp %108 : vector<2x4x4xf32>
    %cst_55 = arith.constant dense<0.000000e+00> : vector<2x4xf32>
    %110 = vector.multi_reduction <add>, %109, %cst_55 [2] : vector<2x4x4xf32> to vector<2x4xf32>
    %111 = vector.shape_cast %110 : vector<2x4xf32> to vector<2x4x1xf32>
    %112 = tpu.reciprocal %111 {approx = true} : vector<2x4x1xf32> -> vector<2x4x1xf32>
    %113 = vector.broadcast %112 : vector<2x4x1xf32> to vector<2x4x4xf32>
    %114 = arith.mulf %109, %113 : vector<2x4x4xf32>
    "tpu.trace_start"() <{level = 10 : i32, message = "bqk,bkd->bqd"}> : () -> ()
    %cst_56 = arith.constant dense<0.000000e+00> : vector<2x4x8xf32>
    %115 = tpu.matmul %114, %101, %cst_56 {dimension_numbers = #tpu.dot_dimension_numbers<[2], [1], [1], [2], [0, 0, 0, 1, 1, 2], [0], [0]>} : vector<2x4x4xf32>, vector<2x4x8xf32>, vector<2x4x8xf32> -> vector<2x4x8xf32>
    "tpu.trace_stop"() : () -> ()
    %116 = tpu.concatenate %64, %81, %98, %115 in 2 : vector<2x4x8xf32>, vector<2x4x8xf32>, vector<2x4x8xf32>, vector<2x4x8xf32> -> vector<2x4x32xf32>
    %117 = vector.shape_cast %116 : vector<2x4x32xf32> to vector<8x32xf32>
    %cst_57 = arith.constant dense<0.000000e+00> : vector<8x32xf32>
    %118 = tpu.matmul %117, %13, %cst_57 {dimension_numbers = #tpu.dot_dimension_numbers<[1], [1], [0], [0], [0, 0, 1, 0], [], []>} : vector<8x32xf32>, vector<32x32xf32>, vector<8x32xf32> -> vector<8x32xf32>
    %119 = arith.addf %9, %118 : vector<8x32xf32>
    %120 = vector.broadcast %14 : vector<1x32xf32> to vector<8x32xf32>
    %121 = arith.addf %119, %120 : vector<8x32xf32>
    %cst_58 = arith.constant dense<0.000000e+00> : vector<8xf32>
    %122 = vector.multi_reduction <add>, %121, %cst_58 [1] : vector<8x32xf32> to vector<8xf32>
    %123 = vector.shape_cast %122 : vector<8xf32> to vector<8x1xf32>
    %cst_59 = arith.constant 3.200000e+01 : f32
    %124 = vector.broadcast %cst_59 : f32 to vector<8x1xf32>
    %125 = arith.divf %123, %124 : vector<8x1xf32>
    %126 = vector.broadcast %125 : vector<8x1xf32> to vector<8x32xf32>
    %127 = arith.subf %121, %126 : vector<8x32xf32>
    %128 = arith.mulf %127, %127 : vector<8x32xf32>
    %cst_60 = arith.constant dense<0.000000e+00> : vector<8xf32>
    %129 = vector.multi_reduction <add>, %128, %cst_60 [1] : vector<8x32xf32> to vector<8xf32>
    %130 = vector.shape_cast %129 : vector<8xf32> to vector<8x1xf32>
    %cst_61 = arith.constant 3.200000e+01 : f32
    %131 = vector.broadcast %cst_61 : f32 to vector<8x1xf32>
    %132 = arith.divf %130, %131 : vector<8x1xf32>
    %cst_62 = arith.constant 9.99999974E-6 : f32
    %133 = vector.broadcast %cst_62 : f32 to vector<8x1xf32>
    %134 = arith.addf %132, %133 : vector<8x1xf32>
    %135 = math.rsqrt %134 : vector<8x1xf32>
    %136 = vector.broadcast %135 : vector<8x1xf32> to vector<8x32xf32>
    %137 = arith.mulf %127, %136 : vector<8x32xf32>
    %138 = vector.broadcast %15 : vector<1x32xf32> to vector<8x32xf32>
    %139 = arith.mulf %137, %138 : vector<8x32xf32>
    %140 = vector.broadcast %16 : vector<1x32xf32> to vector<8x32xf32>
    %141 = arith.addf %139, %140 : vector<8x32xf32>
    %cst_63 = arith.constant dense<0.000000e+00> : vector<8x64xf32>
    %142 = tpu.matmul %141, %17, %cst_63 {dimension_numbers = #tpu.dot_dimension_numbers<[1], [1], [0], [0], [0, 0, 1, 0], [], []>} : vector<8x32xf32>, vector<64x32xf32>, vector<8x64xf32> -> vector<8x64xf32>
    %143 = vector.broadcast %18 : vector<1x64xf32> to vector<8x64xf32>
    %144 = arith.addf %142, %143 : vector<8x64xf32>
    %cst_64 = arith.constant 5.000000e-01 : f32
    %145 = vector.broadcast %cst_64 : f32 to vector<8x64xf32>
    %146 = arith.mulf %145, %144 : vector<8x64xf32>
    %cst_65 = arith.constant 0.707106769 : f32
    %147 = vector.broadcast %cst_65 : f32 to vector<8x64xf32>
    %148 = arith.mulf %144, %147 : vector<8x64xf32>
    %cst_66 = arith.constant 0.000000e+00 : f32
    %149 = vector.broadcast %cst_66 : f32 to vector<8x64xf32>
    %150 = arith.cmpf oge, %148, %149 : vector<8x64xf32>
    %cst_67 = arith.constant 1.000000e+00 : f32
    %cst_68 = arith.constant -1.000000e+00 : f32
    %151 = vector.broadcast %cst_67 : f32 to vector<8x64xf32>
    %152 = vector.broadcast %cst_68 : f32 to vector<8x64xf32>
    %153 = arith.select %150, %151, %152 : vector<8x64xi1>, vector<8x64xf32>
    %154 = math.absf %148 : vector<8x64xf32>
    %cst_69 = arith.constant 0.327591091 : f32
    %155 = vector.broadcast %cst_69 : f32 to vector<8x64xf32>
    %156 = arith.mulf %155, %154 : vector<8x64xf32>
    %cst_70 = arith.constant 1.000000e+00 : f32
    %157 = vector.broadcast %cst_70 : f32 to vector<8x64xf32>
    %158 = arith.addf %157, %156 : vector<8x64xf32>
    %159 = tpu.reciprocal %158 {approx = true} : vector<8x64xf32> -> vector<8x64xf32>
    %cst_71 = arith.constant 1.06140542 : f32
    %160 = vector.broadcast %cst_71 : f32 to vector<8x64xf32>
    %161 = arith.mulf %160, %159 : vector<8x64xf32>
    %cst_72 = arith.constant -1.45315206 : f32
    %162 = vector.broadcast %cst_72 : f32 to vector<8x64xf32>
    %163 = arith.addf %161, %162 : vector<8x64xf32>
    %164 = arith.mulf %163, %159 : vector<8x64xf32>
    %cst_73 = arith.constant 1.42141378 : f32
    %165 = vector.broadcast %cst_73 : f32 to vector<8x64xf32>
    %166 = arith.addf %164, %165 : vector<8x64xf32>
    %167 = arith.mulf %166, %159 : vector<8x64xf32>
    %cst_74 = arith.constant -0.284496725 : f32
    %168 = vector.broadcast %cst_74 : f32 to vector<8x64xf32>
    %169 = arith.addf %167, %168 : vector<8x64xf32>
    %170 = arith.mulf %169, %159 : vector<8x64xf32>
    %cst_75 = arith.constant 0.254829586 : f32
    %171 = vector.broadcast %cst_75 : f32 to vector<8x64xf32>
    %172 = arith.addf %170, %171 : vector<8x64xf32>
    %173 = arith.mulf %172, %159 : vector<8x64xf32>
    %cst_76 = arith.constant 0.000000e+00 : f32
    %174 = vector.broadcast %cst_76 : f32 to vector<8x64xf32>
    %175 = arith.subf %174, %154 : vector<8x64xf32>
    %176 = arith.mulf %175, %154 : vector<8x64xf32>
    %177 = math.exp %176 : vector<8x64xf32>
    %178 = arith.mulf %173, %177 : vector<8x64xf32>
    %cst_77 = arith.constant 1.000000e+00 : f32
    %179 = vector.broadcast %cst_77 : f32 to vector<8x64xf32>
    %180 = arith.subf %179, %178 : vector<8x64xf32>
    %181 = arith.mulf %153, %180 : vector<8x64xf32>
    %cst_78 = arith.constant 1.000000e+00 : f32
    %182 = vector.broadcast %cst_78 : f32 to vector<8x64xf32>
    %183 = arith.addf %182, %181 : vector<8x64xf32>
    %184 = arith.mulf %146, %183 : vector<8x64xf32>
    %cst_79 = arith.constant dense<0.000000e+00> : vector<8x32xf32>
    %185 = tpu.matmul %184, %19, %cst_79 {dimension_numbers = #tpu.dot_dimension_numbers<[1], [1], [0], [0], [0, 0, 1, 0], [], []>} : vector<8x64xf32>, vector<32x64xf32>, vector<8x32xf32> -> vector<8x32xf32>
    %186 = arith.addf %121, %185 : vector<8x32xf32>
    %187 = vector.broadcast %20 : vector<1x32xf32> to vector<8x32xf32>
    %188 = arith.addf %186, %187 : vector<8x32xf32>
    %c0_80 = arith.constant 0 : index
    %c0_81 = arith.constant 0 : index
    %189 = vector.load %arg15[%c0_80, %c0_81] : memref<1x32xf32, #tpu.memory_space<vmem>>, vector<1x32xf32>
    %c0_82 = arith.constant 0 : index
    %c0_83 = arith.constant 0 : index
    %190 = vector.load %arg16[%c0_82, %c0_83] : memref<1x32xf32, #tpu.memory_space<vmem>>, vector<1x32xf32>
    %cst_84 = arith.constant dense<0.000000e+00> : vector<8xf32>
    %191 = vector.multi_reduction <add>, %188, %cst_84 [1] : vector<8x32xf32> to vector<8xf32>
    %192 = vector.shape_cast %191 : vector<8xf32> to vector<8x1xf32>
    %cst_85 = arith.constant 3.200000e+01 : f32
    %193 = vector.broadcast %cst_85 : f32 to vector<8x1xf32>
    %194 = arith.divf %192, %193 : vector<8x1xf32>
    %195 = vector.broadcast %194 : vector<8x1xf32> to vector<8x32xf32>
    %196 = arith.subf %188, %195 : vector<8x32xf32>
    %197 = arith.mulf %196, %196 : vector<8x32xf32>
    %cst_86 = arith.constant dense<0.000000e+00> : vector<8xf32>
    %198 = vector.multi_reduction <add>, %197, %cst_86 [1] : vector<8x32xf32> to vector<8xf32>
    %199 = vector.shape_cast %198 : vector<8xf32> to vector<8x1xf32>
    %cst_87 = arith.constant 3.200000e+01 : f32
    %200 = vector.broadcast %cst_87 : f32 to vector<8x1xf32>
    %201 = arith.divf %199, %200 : vector<8x1xf32>
    %cst_88 = arith.constant 9.99999974E-6 : f32
    %202 = vector.broadcast %cst_88 : f32 to vector<8x1xf32>
    %203 = arith.addf %201, %202 : vector<8x1xf32>
    %204 = math.rsqrt %203 : vector<8x1xf32>
    %205 = vector.broadcast %204 : vector<8x1xf32> to vector<8x32xf32>
    %206 = arith.mulf %196, %205 : vector<8x32xf32>
    %207 = vector.broadcast %189 : vector<1x32xf32> to vector<8x32xf32>
    %208 = arith.mulf %206, %207 : vector<8x32xf32>
    %209 = vector.broadcast %190 : vector<1x32xf32> to vector<8x32xf32>
    %210 = arith.addf %208, %209 : vector<8x32xf32>
    %c0_89 = arith.constant 0 : index
    %c0_90 = arith.constant 0 : index
    %211 = vector.load %arg17[%c0_89, %c0_90] : memref<16x32xf32, #tpu.memory_space<vmem>>, vector<16x32xf32>
    %cst_91 = arith.constant dense<0.000000e+00> : vector<8x16xf32>
    %212 = tpu.matmul %210, %211, %cst_91 {dimension_numbers = #tpu.dot_dimension_numbers<[1], [1], [0], [0], [0, 0, 1, 0], [], []>} : vector<8x32xf32>, vector<16x32xf32>, vector<8x16xf32> -> vector<8x16xf32>
    %c0_92 = arith.constant 0 : index
    %c0_93 = arith.constant 0 : index
    %213 = vector.load %arg18[%c0_92, %c0_93] : memref<1x16xf32, #tpu.memory_space<vmem>>, vector<1x16xf32>
    %214 = vector.broadcast %213 : vector<1x16xf32> to vector<8x16xf32>
    %215 = arith.addf %212, %214 : vector<8x16xf32>
    %216 = vector.shape_cast %215 : vector<8x16xf32> to vector<2x4x16xf32>
    %c0_94 = arith.constant 0 : index
    %c0_95 = arith.constant 0 : index
    %c0_96 = arith.constant 0 : index
    %217 = vector.load %arg19[%c0_94, %c0_95, %c0_96] : memref<2x4x16xf32, #tpu.memory_space<vmem>>, vector<2x4x16xf32>
    tpu.vector_store %arg19[%c0_94, %c0_95, %c0_96], %216 {strides = array<i32>} : memref<2x4x16xf32, #tpu.memory_space<vmem>>, vector<2x4x16xf32>,
    return
  }
}

module attributes {stable_mosaic.version = 11 : i64} {
  func.func @kernel(%arg0: memref<2x16x16xf32, #tpu.memory_space<vmem>>, %arg1: memref<2x12x48xf32, #tpu.memory_space<vmem>>, %arg2: memref<1x16xf32, #tpu.memory_space<vmem>>, %arg3: memref<1x16xf32, #tpu.memory_space<vmem>>, %arg4: memref<48x16xf32, #tpu.memory_space<vmem>>, %arg5: memref<16x16xf32, #tpu.memory_space<vmem>>, %arg6: memref<1x16xf32, #tpu.memory_space<vmem>>, %arg7: memref<1x16xf32, #tpu.memory_space<vmem>>, %arg8: memref<1x16xf32, #tpu.memory_space<vmem>>, %arg9: memref<64x16xf32, #tpu.memory_space<vmem>>, %arg10: memref<1x64xf32, #tpu.memory_space<vmem>>, %arg11: memref<16x64xf32, #tpu.memory_space<vmem>>, %arg12: memref<1x16xf32, #tpu.memory_space<vmem>>, %arg13: memref<1x16xf32, #tpu.memory_space<vmem>>, %arg14: memref<1x16xf32, #tpu.memory_space<vmem>>, %arg15: memref<48x16xf32, #tpu.memory_space<vmem>>, %arg16: memref<1x48xf32, #tpu.memory_space<vmem>>, %arg17: memref<1x1xf32, #tpu.memory_space<vmem>>) attributes {dimension_semantics = [], scalar_prefetch = 0 : i64, scratch_operands = 0 : i64, tpu.core_type = #tpu.core_type<tc>} {
    %c0 = arith.constant 0 : index
    %c0_0 = arith.constant 0 : index
    %c0_1 = arith.constant 0 : index
    %0 = vector.load %arg0[%c0, %c0_0, %c0_1] : memref<2x16x16xf32, #tpu.memory_space<vmem>>, vector<2x16x16xf32>
    %1 = vector.shape_cast %0 : vector<2x16x16xf32> to vector<32x16xf32>
    %c0_2 = arith.constant 0 : index
    %c0_3 = arith.constant 0 : index
    %2 = vector.load %arg2[%c0_2, %c0_3] : memref<1x16xf32, #tpu.memory_space<vmem>>, vector<1x16xf32>
    %c0_4 = arith.constant 0 : index
    %c0_5 = arith.constant 0 : index
    %3 = vector.load %arg3[%c0_4, %c0_5] : memref<1x16xf32, #tpu.memory_space<vmem>>, vector<1x16xf32>
    %c0_6 = arith.constant 0 : index
    %c0_7 = arith.constant 0 : index
    %4 = vector.load %arg4[%c0_6, %c0_7] : memref<48x16xf32, #tpu.memory_space<vmem>>, vector<48x16xf32>
    %c0_8 = arith.constant 0 : index
    %c0_9 = arith.constant 0 : index
    %5 = vector.load %arg5[%c0_8, %c0_9] : memref<16x16xf32, #tpu.memory_space<vmem>>, vector<16x16xf32>
    %c0_10 = arith.constant 0 : index
    %c0_11 = arith.constant 0 : index
    %6 = vector.load %arg6[%c0_10, %c0_11] : memref<1x16xf32, #tpu.memory_space<vmem>>, vector<1x16xf32>
    %c0_12 = arith.constant 0 : index
    %c0_13 = arith.constant 0 : index
    %7 = vector.load %arg7[%c0_12, %c0_13] : memref<1x16xf32, #tpu.memory_space<vmem>>, vector<1x16xf32>
    %c0_14 = arith.constant 0 : index
    %c0_15 = arith.constant 0 : index
    %8 = vector.load %arg8[%c0_14, %c0_15] : memref<1x16xf32, #tpu.memory_space<vmem>>, vector<1x16xf32>
    %c0_16 = arith.constant 0 : index
    %c0_17 = arith.constant 0 : index
    %9 = vector.load %arg9[%c0_16, %c0_17] : memref<64x16xf32, #tpu.memory_space<vmem>>, vector<64x16xf32>
    %c0_18 = arith.constant 0 : index
    %c0_19 = arith.constant 0 : index
    %10 = vector.load %arg10[%c0_18, %c0_19] : memref<1x64xf32, #tpu.memory_space<vmem>>, vector<1x64xf32>
    %c0_20 = arith.constant 0 : index
    %c0_21 = arith.constant 0 : index
    %11 = vector.load %arg11[%c0_20, %c0_21] : memref<16x64xf32, #tpu.memory_space<vmem>>, vector<16x64xf32>
    %c0_22 = arith.constant 0 : index
    %c0_23 = arith.constant 0 : index
    %12 = vector.load %arg12[%c0_22, %c0_23] : memref<1x16xf32, #tpu.memory_space<vmem>>, vector<1x16xf32>
    %cst = arith.constant dense<0.000000e+00> : vector<32xf32>
    %13 = vector.multi_reduction <add>, %1, %cst [1] : vector<32x16xf32> to vector<32xf32>
    %14 = vector.shape_cast %13 : vector<32xf32> to vector<32x1xf32>
    %cst_24 = arith.constant 1.600000e+01 : f32
    %15 = vector.broadcast %cst_24 : f32 to vector<32x1xf32>
    %16 = arith.divf %14, %15 : vector<32x1xf32>
    %17 = vector.broadcast %16 : vector<32x1xf32> to vector<32x16xf32>
    %18 = arith.subf %1, %17 : vector<32x16xf32>
    %19 = arith.mulf %18, %18 : vector<32x16xf32>
    %cst_25 = arith.constant dense<0.000000e+00> : vector<32xf32>
    %20 = vector.multi_reduction <add>, %19, %cst_25 [1] : vector<32x16xf32> to vector<32xf32>
    %21 = vector.shape_cast %20 : vector<32xf32> to vector<32x1xf32>
    %cst_26 = arith.constant 1.600000e+01 : f32
    %22 = vector.broadcast %cst_26 : f32 to vector<32x1xf32>
    %23 = arith.divf %21, %22 : vector<32x1xf32>
    %cst_27 = arith.constant 9.99999974E-6 : f32
    %24 = vector.broadcast %cst_27 : f32 to vector<32x1xf32>
    %25 = arith.addf %23, %24 : vector<32x1xf32>
    %26 = math.rsqrt %25 : vector<32x1xf32>
    %27 = vector.broadcast %26 : vector<32x1xf32> to vector<32x16xf32>
    %28 = arith.mulf %18, %27 : vector<32x16xf32>
    %29 = vector.broadcast %2 : vector<1x16xf32> to vector<32x16xf32>
    %30 = arith.mulf %28, %29 : vector<32x16xf32>
    %31 = vector.broadcast %3 : vector<1x16xf32> to vector<32x16xf32>
    %32 = arith.addf %30, %31 : vector<32x16xf32>
    %cst_28 = arith.constant dense<0.000000e+00> : vector<32x48xf32>
    %33 = tpu.matmul %32, %4, %cst_28 {dimension_numbers = #tpu.dot_dimension_numbers<[1], [1], [0], [0], [0, 0, 1, 0], [], []>} : vector<32x16xf32>, vector<48x16xf32>, vector<32x48xf32> -> vector<32x48xf32>
    %34 = vector.extract_strided_slice %33 {offsets = [0, 0], sizes = [32, 16], strides = [1, 1]} : vector<32x48xf32> to vector<32x16xf32>
    %35 = vector.shape_cast %34 : vector<32x16xf32> to vector<2x16x16xf32>
    %36 = vector.extract_strided_slice %33 {offsets = [0, 16], sizes = [32, 16], strides = [1, 1]} : vector<32x48xf32> to vector<32x16xf32>
    %37 = vector.shape_cast %36 : vector<32x16xf32> to vector<2x16x16xf32>
    %38 = vector.extract_strided_slice %33 {offsets = [0, 32], sizes = [32, 16], strides = [1, 1]} : vector<32x48xf32> to vector<32x16xf32>
    %39 = vector.shape_cast %38 : vector<32x16xf32> to vector<2x16x16xf32>
    %40 = vector.extract_strided_slice %35 {offsets = [0, 0, 0], sizes = [2, 16, 8], strides = [1, 1, 1]} : vector<2x16x16xf32> to vector<2x16x8xf32>
    %41 = vector.extract_strided_slice %37 {offsets = [0, 0, 0], sizes = [2, 16, 8], strides = [1, 1, 1]} : vector<2x16x16xf32> to vector<2x16x8xf32>
    %42 = vector.extract_strided_slice %39 {offsets = [0, 0, 0], sizes = [2, 16, 8], strides = [1, 1, 1]} : vector<2x16x16xf32> to vector<2x16x8xf32>
    "tpu.trace_start"() <{level = 10 : i32, message = "bqd,bkd->bqk"}> : () -> ()
    %cst_29 = arith.constant dense<0.000000e+00> : vector<2x16x16xf32>
    %43 = tpu.matmul %40, %41, %cst_29 {dimension_numbers = #tpu.dot_dimension_numbers<[2], [2], [1], [1], [0, 0, 0, 1, 1, 1], [0], [0]>} : vector<2x16x8xf32>, vector<2x16x8xf32>, vector<2x16x16xf32> -> vector<2x16x16xf32>
    "tpu.trace_stop"() : () -> ()
    %cst_30 = arith.constant 0.353553385 : f32
    %44 = vector.broadcast %cst_30 : f32 to vector<2x16x16xf32>
    %45 = arith.mulf %43, %44 : vector<2x16x16xf32>
    %cst_31 = arith.constant dense<0xFF800000> : vector<2x16xf32>
    %46 = vector.multi_reduction <maximumf>, %45, %cst_31 [2] : vector<2x16x16xf32> to vector<2x16xf32>
    %47 = vector.shape_cast %46 : vector<2x16xf32> to vector<2x16x1xf32>
    %48 = vector.broadcast %47 : vector<2x16x1xf32> to vector<2x16x16xf32>
    %49 = arith.subf %45, %48 : vector<2x16x16xf32>
    %50 = math.exp %49 : vector<2x16x16xf32>
    %cst_32 = arith.constant dense<0.000000e+00> : vector<2x16xf32>
    %51 = vector.multi_reduction <add>, %50, %cst_32 [2] : vector<2x16x16xf32> to vector<2x16xf32>
    %52 = vector.shape_cast %51 : vector<2x16xf32> to vector<2x16x1xf32>
    %53 = tpu.reciprocal %52 {approx = true} : vector<2x16x1xf32> -> vector<2x16x1xf32>
    %54 = vector.broadcast %53 : vector<2x16x1xf32> to vector<2x16x16xf32>
    %55 = arith.mulf %50, %54 : vector<2x16x16xf32>
    "tpu.trace_start"() <{level = 10 : i32, message = "bqk,bkd->bqd"}> : () -> ()
    %cst_33 = arith.constant dense<0.000000e+00> : vector<2x16x8xf32>
    %56 = tpu.matmul %55, %42, %cst_33 {dimension_numbers = #tpu.dot_dimension_numbers<[2], [1], [1], [2], [0, 0, 0, 1, 1, 2], [0], [0]>} : vector<2x16x16xf32>, vector<2x16x8xf32>, vector<2x16x8xf32> -> vector<2x16x8xf32>
    "tpu.trace_stop"() : () -> ()
    %57 = vector.extract_strided_slice %35 {offsets = [0, 0, 8], sizes = [2, 16, 8], strides = [1, 1, 1]} : vector<2x16x16xf32> to vector<2x16x8xf32>
    %58 = vector.extract_strided_slice %37 {offsets = [0, 0, 8], sizes = [2, 16, 8], strides = [1, 1, 1]} : vector<2x16x16xf32> to vector<2x16x8xf32>
    %59 = vector.extract_strided_slice %39 {offsets = [0, 0, 8], sizes = [2, 16, 8], strides = [1, 1, 1]} : vector<2x16x16xf32> to vector<2x16x8xf32>
    "tpu.trace_start"() <{level = 10 : i32, message = "bqd,bkd->bqk"}> : () -> ()
    %cst_34 = arith.constant dense<0.000000e+00> : vector<2x16x16xf32>
    %60 = tpu.matmul %57, %58, %cst_34 {dimension_numbers = #tpu.dot_dimension_numbers<[2], [2], [1], [1], [0, 0, 0, 1, 1, 1], [0], [0]>} : vector<2x16x8xf32>, vector<2x16x8xf32>, vector<2x16x16xf32> -> vector<2x16x16xf32>
    "tpu.trace_stop"() : () -> ()
    %cst_35 = arith.constant 0.353553385 : f32
    %61 = vector.broadcast %cst_35 : f32 to vector<2x16x16xf32>
    %62 = arith.mulf %60, %61 : vector<2x16x16xf32>
    %cst_36 = arith.constant dense<0xFF800000> : vector<2x16xf32>
    %63 = vector.multi_reduction <maximumf>, %62, %cst_36 [2] : vector<2x16x16xf32> to vector<2x16xf32>
    %64 = vector.shape_cast %63 : vector<2x16xf32> to vector<2x16x1xf32>
    %65 = vector.broadcast %64 : vector<2x16x1xf32> to vector<2x16x16xf32>
    %66 = arith.subf %62, %65 : vector<2x16x16xf32>
    %67 = math.exp %66 : vector<2x16x16xf32>
    %cst_37 = arith.constant dense<0.000000e+00> : vector<2x16xf32>
    %68 = vector.multi_reduction <add>, %67, %cst_37 [2] : vector<2x16x16xf32> to vector<2x16xf32>
    %69 = vector.shape_cast %68 : vector<2x16xf32> to vector<2x16x1xf32>
    %70 = tpu.reciprocal %69 {approx = true} : vector<2x16x1xf32> -> vector<2x16x1xf32>
    %71 = vector.broadcast %70 : vector<2x16x1xf32> to vector<2x16x16xf32>
    %72 = arith.mulf %67, %71 : vector<2x16x16xf32>
    "tpu.trace_start"() <{level = 10 : i32, message = "bqk,bkd->bqd"}> : () -> ()
    %cst_38 = arith.constant dense<0.000000e+00> : vector<2x16x8xf32>
    %73 = tpu.matmul %72, %59, %cst_38 {dimension_numbers = #tpu.dot_dimension_numbers<[2], [1], [1], [2], [0, 0, 0, 1, 1, 2], [0], [0]>} : vector<2x16x16xf32>, vector<2x16x8xf32>, vector<2x16x8xf32> -> vector<2x16x8xf32>
    "tpu.trace_stop"() : () -> ()
    %74 = tpu.concatenate %56, %73 in 2 : vector<2x16x8xf32>, vector<2x16x8xf32> -> vector<2x16x16xf32>
    %75 = vector.shape_cast %74 : vector<2x16x16xf32> to vector<32x16xf32>
    %cst_39 = arith.constant dense<0.000000e+00> : vector<32x16xf32>
    %76 = tpu.matmul %75, %5, %cst_39 {dimension_numbers = #tpu.dot_dimension_numbers<[1], [1], [0], [0], [0, 0, 1, 0], [], []>} : vector<32x16xf32>, vector<16x16xf32>, vector<32x16xf32> -> vector<32x16xf32>
    %77 = arith.addf %1, %76 : vector<32x16xf32>
    %78 = vector.broadcast %6 : vector<1x16xf32> to vector<32x16xf32>
    %79 = arith.addf %77, %78 : vector<32x16xf32>
    %cst_40 = arith.constant dense<0.000000e+00> : vector<32xf32>
    %80 = vector.multi_reduction <add>, %79, %cst_40 [1] : vector<32x16xf32> to vector<32xf32>
    %81 = vector.shape_cast %80 : vector<32xf32> to vector<32x1xf32>
    %cst_41 = arith.constant 1.600000e+01 : f32
    %82 = vector.broadcast %cst_41 : f32 to vector<32x1xf32>
    %83 = arith.divf %81, %82 : vector<32x1xf32>
    %84 = vector.broadcast %83 : vector<32x1xf32> to vector<32x16xf32>
    %85 = arith.subf %79, %84 : vector<32x16xf32>
    %86 = arith.mulf %85, %85 : vector<32x16xf32>
    %cst_42 = arith.constant dense<0.000000e+00> : vector<32xf32>
    %87 = vector.multi_reduction <add>, %86, %cst_42 [1] : vector<32x16xf32> to vector<32xf32>
    %88 = vector.shape_cast %87 : vector<32xf32> to vector<32x1xf32>
    %cst_43 = arith.constant 1.600000e+01 : f32
    %89 = vector.broadcast %cst_43 : f32 to vector<32x1xf32>
    %90 = arith.divf %88, %89 : vector<32x1xf32>
    %cst_44 = arith.constant 9.99999974E-6 : f32
    %91 = vector.broadcast %cst_44 : f32 to vector<32x1xf32>
    %92 = arith.addf %90, %91 : vector<32x1xf32>
    %93 = math.rsqrt %92 : vector<32x1xf32>
    %94 = vector.broadcast %93 : vector<32x1xf32> to vector<32x16xf32>
    %95 = arith.mulf %85, %94 : vector<32x16xf32>
    %96 = vector.broadcast %7 : vector<1x16xf32> to vector<32x16xf32>
    %97 = arith.mulf %95, %96 : vector<32x16xf32>
    %98 = vector.broadcast %8 : vector<1x16xf32> to vector<32x16xf32>
    %99 = arith.addf %97, %98 : vector<32x16xf32>
    %cst_45 = arith.constant dense<0.000000e+00> : vector<32x64xf32>
    %100 = tpu.matmul %99, %9, %cst_45 {dimension_numbers = #tpu.dot_dimension_numbers<[1], [1], [0], [0], [0, 0, 1, 0], [], []>} : vector<32x16xf32>, vector<64x16xf32>, vector<32x64xf32> -> vector<32x64xf32>
    %101 = vector.broadcast %10 : vector<1x64xf32> to vector<32x64xf32>
    %102 = arith.addf %100, %101 : vector<32x64xf32>
    %cst_46 = arith.constant 5.000000e-01 : f32
    %103 = vector.broadcast %cst_46 : f32 to vector<32x64xf32>
    %104 = arith.mulf %103, %102 : vector<32x64xf32>
    %cst_47 = arith.constant 0.707106769 : f32
    %105 = vector.broadcast %cst_47 : f32 to vector<32x64xf32>
    %106 = arith.mulf %102, %105 : vector<32x64xf32>
    %cst_48 = arith.constant 0.000000e+00 : f32
    %107 = vector.broadcast %cst_48 : f32 to vector<32x64xf32>
    %108 = arith.cmpf oge, %106, %107 : vector<32x64xf32>
    %cst_49 = arith.constant 1.000000e+00 : f32
    %cst_50 = arith.constant -1.000000e+00 : f32
    %109 = vector.broadcast %cst_49 : f32 to vector<32x64xf32>
    %110 = vector.broadcast %cst_50 : f32 to vector<32x64xf32>
    %111 = arith.select %108, %109, %110 : vector<32x64xi1>, vector<32x64xf32>
    %112 = math.absf %106 : vector<32x64xf32>
    %cst_51 = arith.constant 0.327591091 : f32
    %113 = vector.broadcast %cst_51 : f32 to vector<32x64xf32>
    %114 = arith.mulf %113, %112 : vector<32x64xf32>
    %cst_52 = arith.constant 1.000000e+00 : f32
    %115 = vector.broadcast %cst_52 : f32 to vector<32x64xf32>
    %116 = arith.addf %115, %114 : vector<32x64xf32>
    %117 = tpu.reciprocal %116 {approx = true} : vector<32x64xf32> -> vector<32x64xf32>
    %cst_53 = arith.constant 1.06140542 : f32
    %118 = vector.broadcast %cst_53 : f32 to vector<32x64xf32>
    %119 = arith.mulf %118, %117 : vector<32x64xf32>
    %cst_54 = arith.constant -1.45315206 : f32
    %120 = vector.broadcast %cst_54 : f32 to vector<32x64xf32>
    %121 = arith.addf %119, %120 : vector<32x64xf32>
    %122 = arith.mulf %121, %117 : vector<32x64xf32>
    %cst_55 = arith.constant 1.42141378 : f32
    %123 = vector.broadcast %cst_55 : f32 to vector<32x64xf32>
    %124 = arith.addf %122, %123 : vector<32x64xf32>
    %125 = arith.mulf %124, %117 : vector<32x64xf32>
    %cst_56 = arith.constant -0.284496725 : f32
    %126 = vector.broadcast %cst_56 : f32 to vector<32x64xf32>
    %127 = arith.addf %125, %126 : vector<32x64xf32>
    %128 = arith.mulf %127, %117 : vector<32x64xf32>
    %cst_57 = arith.constant 0.254829586 : f32
    %129 = vector.broadcast %cst_57 : f32 to vector<32x64xf32>
    %130 = arith.addf %128, %129 : vector<32x64xf32>
    %131 = arith.mulf %130, %117 : vector<32x64xf32>
    %cst_58 = arith.constant 0.000000e+00 : f32
    %132 = vector.broadcast %cst_58 : f32 to vector<32x64xf32>
    %133 = arith.subf %132, %112 : vector<32x64xf32>
    %134 = arith.mulf %133, %112 : vector<32x64xf32>
    %135 = math.exp %134 : vector<32x64xf32>
    %136 = arith.mulf %131, %135 : vector<32x64xf32>
    %cst_59 = arith.constant 1.000000e+00 : f32
    %137 = vector.broadcast %cst_59 : f32 to vector<32x64xf32>
    %138 = arith.subf %137, %136 : vector<32x64xf32>
    %139 = arith.mulf %111, %138 : vector<32x64xf32>
    %cst_60 = arith.constant 1.000000e+00 : f32
    %140 = vector.broadcast %cst_60 : f32 to vector<32x64xf32>
    %141 = arith.addf %140, %139 : vector<32x64xf32>
    %142 = arith.mulf %104, %141 : vector<32x64xf32>
    %cst_61 = arith.constant dense<0.000000e+00> : vector<32x16xf32>
    %143 = tpu.matmul %142, %11, %cst_61 {dimension_numbers = #tpu.dot_dimension_numbers<[1], [1], [0], [0], [0, 0, 1, 0], [], []>} : vector<32x64xf32>, vector<16x64xf32>, vector<32x16xf32> -> vector<32x16xf32>
    %144 = arith.addf %79, %143 : vector<32x16xf32>
    %145 = vector.broadcast %12 : vector<1x16xf32> to vector<32x16xf32>
    %146 = arith.addf %144, %145 : vector<32x16xf32>
    %c0_62 = arith.constant 0 : index
    %c0_63 = arith.constant 0 : index
    %147 = vector.load %arg13[%c0_62, %c0_63] : memref<1x16xf32, #tpu.memory_space<vmem>>, vector<1x16xf32>
    %c0_64 = arith.constant 0 : index
    %c0_65 = arith.constant 0 : index
    %148 = vector.load %arg14[%c0_64, %c0_65] : memref<1x16xf32, #tpu.memory_space<vmem>>, vector<1x16xf32>
    %cst_66 = arith.constant dense<0.000000e+00> : vector<32xf32>
    %149 = vector.multi_reduction <add>, %146, %cst_66 [1] : vector<32x16xf32> to vector<32xf32>
    %150 = vector.shape_cast %149 : vector<32xf32> to vector<32x1xf32>
    %cst_67 = arith.constant 1.600000e+01 : f32
    %151 = vector.broadcast %cst_67 : f32 to vector<32x1xf32>
    %152 = arith.divf %150, %151 : vector<32x1xf32>
    %153 = vector.broadcast %152 : vector<32x1xf32> to vector<32x16xf32>
    %154 = arith.subf %146, %153 : vector<32x16xf32>
    %155 = arith.mulf %154, %154 : vector<32x16xf32>
    %cst_68 = arith.constant dense<0.000000e+00> : vector<32xf32>
    %156 = vector.multi_reduction <add>, %155, %cst_68 [1] : vector<32x16xf32> to vector<32xf32>
    %157 = vector.shape_cast %156 : vector<32xf32> to vector<32x1xf32>
    %cst_69 = arith.constant 1.600000e+01 : f32
    %158 = vector.broadcast %cst_69 : f32 to vector<32x1xf32>
    %159 = arith.divf %157, %158 : vector<32x1xf32>
    %cst_70 = arith.constant 9.99999974E-6 : f32
    %160 = vector.broadcast %cst_70 : f32 to vector<32x1xf32>
    %161 = arith.addf %159, %160 : vector<32x1xf32>
    %162 = math.rsqrt %161 : vector<32x1xf32>
    %163 = vector.broadcast %162 : vector<32x1xf32> to vector<32x16xf32>
    %164 = arith.mulf %154, %163 : vector<32x16xf32>
    %165 = vector.broadcast %147 : vector<1x16xf32> to vector<32x16xf32>
    %166 = arith.mulf %164, %165 : vector<32x16xf32>
    %167 = vector.broadcast %148 : vector<1x16xf32> to vector<32x16xf32>
    %168 = arith.addf %166, %167 : vector<32x16xf32>
    %169 = vector.shape_cast %168 : vector<32x16xf32> to vector<2x16x16xf32>
    %170 = vector.extract_strided_slice %169 {offsets = [0, 0, 0], sizes = [2, 12, 16], strides = [1, 1, 1]} : vector<2x16x16xf32> to vector<2x12x16xf32>
    %171 = vector.shape_cast %170 : vector<2x12x16xf32> to vector<24x16xf32>
    %c0_71 = arith.constant 0 : index
    %c0_72 = arith.constant 0 : index
    %172 = vector.load %arg15[%c0_71, %c0_72] : memref<48x16xf32, #tpu.memory_space<vmem>>, vector<48x16xf32>
    %cst_73 = arith.constant dense<0.000000e+00> : vector<24x48xf32>
    %173 = tpu.matmul %171, %172, %cst_73 {dimension_numbers = #tpu.dot_dimension_numbers<[1], [1], [0], [0], [0, 0, 1, 0], [], []>} : vector<24x16xf32>, vector<48x16xf32>, vector<24x48xf32> -> vector<24x48xf32>
    %c0_74 = arith.constant 0 : index
    %c0_75 = arith.constant 0 : index
    %174 = vector.load %arg16[%c0_74, %c0_75] : memref<1x48xf32, #tpu.memory_space<vmem>>, vector<1x48xf32>
    %175 = vector.broadcast %174 : vector<1x48xf32> to vector<24x48xf32>
    %176 = arith.addf %173, %175 : vector<24x48xf32>
    %c0_76 = arith.constant 0 : index
    %c0_77 = arith.constant 0 : index
    %c0_78 = arith.constant 0 : index
    %177 = vector.load %arg1[%c0_76, %c0_77, %c0_78] : memref<2x12x48xf32, #tpu.memory_space<vmem>>, vector<2x12x48xf32>
    %178 = vector.shape_cast %177 : vector<2x12x48xf32> to vector<24x48xf32>
    %179 = arith.subf %176, %178 : vector<24x48xf32>
    %180 = arith.mulf %179, %179 : vector<24x48xf32>
    %cst_79 = arith.constant dense<0.000000e+00> : vector<24xf32>
    %181 = vector.multi_reduction <add>, %180, %cst_79 [1] : vector<24x48xf32> to vector<24xf32>
    %182 = vector.shape_cast %181 : vector<24xf32> to vector<24x1xf32>
    %cst_80 = arith.constant dense<0.000000e+00> : vector<1xf32>
    %183 = vector.multi_reduction <add>, %182, %cst_80 [0] : vector<24x1xf32> to vector<1xf32>
    %184 = vector.shape_cast %183 : vector<1xf32> to vector<1x1xf32>
    %cst_81 = arith.constant 8.68055562E-4 : f32
    %185 = vector.broadcast %cst_81 : f32 to vector<1x1xf32>
    %186 = arith.mulf %184, %185 : vector<1x1xf32>
    %c0_82 = arith.constant 0 : index
    %c0_83 = arith.constant 0 : index
    %187 = vector.load %arg17[%c0_82, %c0_83] : memref<1x1xf32, #tpu.memory_space<vmem>>, vector<1x1xf32>
    tpu.vector_store %arg17[%c0_82, %c0_83], %186 {strides = array<i32>} : memref<1x1xf32, #tpu.memory_space<vmem>>, vector<1x1xf32>,
    return
  }
}

</mosaic_0001>

<bundles_post_ra>
// kernel: mae_forward.2
= control target key start
LH: loop header
LB: loop body
LE: loop exit
PB: predicated region body
PF: predicated region fallthrough
CT: control target
= control target key end

     0   :  { %vm80_vm0 = vcmask 392192   ;;  %vm158_vm1 = vcmask 261120   ;;  %v1281_v15 = vmov 32.0   ;;  %vm261_vm6 = vcmask 64512   ;;  %s1288_s24 = smov 56   ;;  %s1289_s25 = smov 48   ;;  %s1725_s2 = inlined_call_operand.vmem [shape: f32[32,48], index: 2, kind: input, shape index: {}]   ;;  %s1726_s0 = inlined_call_operand.vmem [shape: f32[2,4,48], index: 0, kind: input, shape index: {}]   ;;  %s1727_s3 = inlined_call_operand.vmem [shape: f32[1,32], index: 3, kind: input, shape index: {}]   ;;  %s1728_s1 = inlined_call_operand.vmem [shape: f32[2,4,32], index: 1, kind: input, shape index: {}]   ;;  %s1729_s6 = inlined_call_operand.vmem [shape: f32[96,32], index: 6, kind: input, shape index: {}]   ;;  %s1730_s4 = inlined_call_operand.vmem [shape: f32[1,32], index: 4, kind: input, shape index: {}]   ;;  %s1731_s5 = inlined_call_operand.vmem [shape: f32[1,32], index: 5, kind: input, shape index: {}]   ;;  %s1732_s8 = inlined_call_operand.vmem [shape: f32[1,32], index: 8, kind: input, shape index: {}]   ;;  %s1733_s7 = inlined_call_operand.vmem [shape: f32[32,32], index: 7, kind: input, shape index: {}]   ;;  %s1734_s9 = inlined_call_operand.vmem [shape: f32[1,32], index: 9, kind: input, shape index: {}]   ;;  %s1735_s11 = inlined_call_operand.vmem [shape: f32[64,32], index: 11, kind: input, shape index: {}]   ;;  %s1736_s10 = inlined_call_operand.vmem [shape: f32[1,32], index: 10, kind: input, shape index: {}]   ;;  %s1737_s12 = inlined_call_operand.vmem [shape: f32[1,64], index: 12, kind: input, shape index: {}]   ;;  %s1738_s13 = inlined_call_operand.vmem [shape: f32[32,64], index: 13, kind: input, shape index: {}]   ;;  %s1739_s14 = inlined_call_operand.vmem [shape: f32[1,32], index: 14, kind: input, shape index: {}]   ;;  %s1740_s15 = inlined_call_operand.vmem [shape: f32[1,32], index: 15, kind: input, shape index: {}]   ;;  %s1741_s16 = inlined_call_operand.vmem [shape: f32[1,32], index: 16, kind: input, shape index: {}]   ;;  %s1742_s18 = inlined_call_operand.vmem [shape: f32[1,16], index: 18, kind: input, shape index: {}]   ;;  %s1743_s17 = inlined_call_operand.vmem [shape: f32[16,32], index: 17, kind: input, shape index: {}]   ;;  %s1744_s19 = inlined_call_operand.vmem [shape: f32[2,4,16], index: 19, kind: output, shape index: {}]  }
   0x1   :  { %1748 = sst [smem:[#allocation2_spill]] %s1725_s2  ;;  %1237 = vrcp.f32 %v1281_v15  ;;  %v136_v16 = vld [vmem:[%s1729_s6 + $0x58] sm:$0xff]  ;;  %v135_v17 = vld [vmem:[%s1729_s6 + $0x50] sm:$0xff]  ;;  %v134_v20 = vld [vmem:[%s1729_s6 + $0x48] sm:$0xff]  ;;  %vm347_vm7 = vcmask 1043456   ;;  %vm316_vm8 = vcmask 27648  }
   0x2   :  { %1749 = sst [smem:[#allocation3_spill]] %s1726_s0  ;;  %1143 = vmatpush.xpose.msk.msra.mxu1 %vm158_vm1, %v136_v16  ;;  %v133_v22 = vld [vmem:[%s1729_s6 + $0x40] sm:$0xff]  ;;  %v132_v24 = vld [vmem:[%s1729_s6 + $0x38] sm:$0xff]  ;;  %v131_v32 = vld [vmem:[%s1729_s6 + $0x30] sm:$0xff]  ;;  %vm343_vm9 = vcmask 31744   ;;  %s1291_s26 = smov 104  }
   0x3   :  { %1750 = sst [smem:[#allocation4_spill]] %s1727_s3  ;;  %v130_v33 = vld [vmem:[%s1729_s6 + $0x28] sm:$0xff]  ;;  %v129_v34 = vld [vmem:[%s1729_s6 + $0x20] sm:$0xff]  ;;  %v128_v35 = vld [vmem:[%s1729_s6 + $0x18] sm:$0xff]  ;;  %s1285_s3 = smov 120   ;;  %vm863_vm10 = vcmask 130048  }
   0x4   :  { %1751 = sst [smem:[#allocation5_spill]] %s1728_s1  ;;  %v127_v36 = vld [vmem:[%s1729_s6 + $0x10] sm:$0xff]  ;;  %v126_v37 = vld [vmem:[%s1729_s6 + $0x8] sm:$0xff]  ;;  %v125_v38 = vld [vmem:[%s1729_s6] sm:$0xff]  ;;  %s1290_s1 = smov 72   ;;  %vm866_vm11 = vcmask 195584  }
   0x5   :  { %s1752_s20 = sld [smem:[#allocation2_spill]]  ;;  %v1227_v48 = vld [vmem:[%s1730_s4] ss:$0 sm:$0xff]  ;;  %s1283_s4 = smov 64   ;;  %vm1020_vm15 = vcmask 523264  }
   0x6   :  { %s1753_s22 = sld [smem:[#allocation3_spill]]  ;;  %1144 = vmatpush.xpose.msk.msra.mxu1 %vm158_vm1, %v135_v17  ;;  %v1228_v51 = vld [vmem:[%s1731_s5] ss:$0 sm:$0xff]  ;;  %s1284_s5 = smov 88  }
   0x7   :  { %s1754_s29 = sld [smem:[#allocation5_spill]]  ;;  %v1238_v18 = vpop.eup %1237  ;;  %s1292_s27 = smov 8  }
   0x8   :  { %s1755_s23 = sld [smem:[#allocation4_spill]]  ;;  %v163_v19 = vmul.f32 32.0, %v1238_v18  ;;  %vm167_vm2 = vweird.f32 %v1238_v18  ;;  %s1293_s28 = smov 40  }
   0x9   :  { %s1295_s2 = smov 24  }
   0xa   :  { %1145 = vmatpush.xpose.msk.msra.mxu1 %vm158_vm1, %v134_v20  ;;  %v164_v21 = vsub.f32 1.0, %v163_v19 }
   0xb   :  { %v69_v0 = vld [vmem:[%s1752_s20 + $0x18] sm:$0xff]  ;;  %v68_v3 = vld [vmem:[%s1752_s20 + $0x10] sm:$0xff]  ;;  %v67_v4 = vld [vmem:[%s1752_s20 + $0x8] sm:$0xff] }
   0xc   :  { %1138 = vmatpush.xpose.msk.msra.mxu0 %vm80_vm0, %v69_v0  ;;  %v62_v1 = vld [vmem:[%s1753_s22] sm:$0xf]  ;;  %v63_v2 = vld [vmem:[%s1753_s22 + $0x4] sm:$0xf]  ;;  %v165_v23 = vmul.f32 %v1238_v18, %v164_v21  ;;  %s1282_s22 = smov 96  }
   0xd   :  { %76 = vst [vmem:[#allocation1] ss:$2 sm:$0xff] %v62_v1  ;;  %v64_v5 = vld [vmem:[%s1754_s29] sm:$0xf]  ;;  %v65_v6 = vld [vmem:[%s1754_s29 + $0x4] sm:$0xf] }
   0xe   :  { %78 = vst [vmem:[#allocation1 + $0x1] ss:$2 sm:$0xff] %v63_v2  ;;  %v66_v7 = vld [vmem:[%s1752_s20] sm:$0xff]  ;;  %1146 = vmatpush.xpose.msk.msra.mxu1 %vm158_vm1, %v133_v22  ;;  %v166_v25 = vadd.f32 %v1238_v18, %v165_v23  ;;  %s1287_s20 = smov 112   ;;  %s1294_s29 = smov 16  }
   0xf   :  { %v1226_v9 = vld [vmem:[%s1755_s23] ss:$0 sm:$0xff]  ;;  %s1286_s23 = smov 80  }
  0x10   :  { %1139 = vmatpush.xpose.msk.msra.mxu0 %vm80_vm0, %v68_v3  ;;  %v1453_v26 = vsel %vm167_vm2, %v1238_v18, %v166_v25 }
  0x12   :  { %1147 = vmatpush.xpose.msk.msra.mxu1 %vm158_vm1, %v132_v24 }
  0x14   :  { %1140 = vmatpush.xpose.msk.msra.mxu0 %vm80_vm0, %v67_v4 }
  0x15   :  { %v79_v8 = vld.sshfl [vmem:[#allocation1] sm:$0xff pattern:$0x75316420] }
  0x16   :  { %117 = vst [vmem:[#allocation1] ss:$2 sm:$0xff] %v64_v5  ;;  %1148 = vmatpush.xpose.msk.msra.mxu1 %vm158_vm1, %v131_v32 }
  0x17   :  { %119 = vst [vmem:[#allocation1 + $0x1] ss:$2 sm:$0xff] %v65_v6 }
  0x18   :  { %1141 = vmatpush.xpose.msk.msra.mxu0 %vm80_vm0, %v66_v7 }
  0x1a   :  { %1149 = vmatpush.xpose.msk.msra.mxu1 %vm158_vm1, %v130_v33 }
  0x1b   :  { %1142 = vmatmul.msk.f32.vlgmr.msra.gmra.mxu0 %vm80_vm0, %v79_v8 }
  0x1e   :  { %v120_v11 = vld.sshfl [vmem:[#allocation1] sm:$0xff pattern:$0x75316420]  ;;  %1150 = vmatpush.xpose.msk.msra.mxu1 %vm158_vm1, %v129_v34 }
  0x22   :  { %1151 = vmatpush.xpose.msk.msra.mxu1 %vm158_vm1, %v128_v35 }
  0x26   :  { %1152 = vmatpush.xpose.msk.msra.mxu1 %vm158_vm1, %v127_v36 }
  0x2a   :  { %1153 = vmatpush.xpose.msk.msra.mxu1 %vm158_vm1, %v126_v37 }
  0x2e   :  { %1154 = vmatpush.xpose.msk.msra.mxu1 %vm158_vm1, %v125_v38 }
  0x98   :  { %v112_v10 = vpop.f32.mrf.mxu0 }
  0x99   :  { %v113_v12 = vadd.f32 %v1226_v9, %v112_v10 }
  0x9b   :  { %v1429_v13 = vadd.f32 %v120_v11, %v113_v12 }
  0x9d   :  { %v159_v14 = vsel %vm158_vm1, %v1429_v13, 0.0 }
  0x9e   :  { %160 = vadd.xlane.f32.xlu0 %v159_v14 }
 0x111   :  { %v161_v27 = vpop.xlane.xlu0 %160 }
 0x112   :  { %v169_v28 = vmul.f32 %v1453_v26, %v161_v27 }
 0x114   :  { %v170_v29 = vsub.f32 %v1429_v13, %v169_v28 }
 0x116   :  { %v171_v30 = vmul.f32 %v170_v29, %v170_v29 }
 0x118   :  { %v172_v31 = vsel %vm158_vm1, %v171_v30, 0.0 }
 0x119   :  { %173 = vadd.xlane.f32.xlu0 %v172_v31 }
 0x18c   :  { %v174_v39 = vpop.xlane.xlu0 %173 }
 0x18d   :  { %v175_v40 = vmul.f32 %v174_v39, %v1453_v26 }
 0x18f   :  { %v176_v41 = vadd.f32 1e-05, %v175_v40 }
 0x191   :  { %1239 = vrsqrt.f32 %v176_v41  ;;  %vm183_vm4 = vweird.f32 %v176_v41 }
 0x197   :  { %v1240_v42 = vpop.eup %1239 }
 0x198   :  { %v178_v43 = vmul.f32 %v1240_v42, %v176_v41  ;;  %vm184_vm3 = vweird.f32 %v1240_v42 }
 0x199   :  { %vm185_vm5 = vmor %vm183_vm4, %vm184_vm3 }
 0x19a   :  { %v179_v44 = vmul.f32 %v1240_v42, %v178_v43 }
 0x19c   :  { %v180_v45 = vmul.f32 0.5, %v179_v44 }
 0x19e   :  { %v181_v46 = vsub.f32 1.5, %v180_v45 }
 0x1a0   :  { %v182_v47 = vmul.f32 %v1240_v42, %v181_v46 }
 0x1a2   :  { %v186_v49 = vsel %vm185_vm5, %v1240_v42, %v182_v47  ;;  %vm1131_vm5 = vcmask 125952  }
 0x1a3   :  { %v187_v50 = vmul.f32 %v186_v49, %v170_v29 }
 0x1a5   :  { %v191_v52 = vmul.f32 %v1227_v48, %v187_v50 }
 0x1a7   :  { %v195_v53 = vadd.f32 %v1228_v51, %v191_v52 }
 0x1a9   :  { %1155 = vmatmul.msk.f32.vlgmr.msra.gmra.mxu1 %vm158_vm1, %v195_v53 }
 0x226   :  { %v252_v54 = vpop.f32.mrf.mxu1 }
 0x227   :  { %257 = vst [vmem:[#allocation1] ss:$2 sm:$0xff] %v252_v54  ;;  %v256_v55 = vrot.slane %v252_v54, 4 }
 0x22e   :  { %v258_v56 = vld.sshfl [vmem:[#allocation1] sm:$0xff pattern:$0x75316420] }
 0x22f   :  { %286 = vst [vmem:[#allocation1] ss:$2 sm:$0xff] %v256_v55  ;;  %259 = vrot.lane.b32.xlu1 %v258_v56, %s1282_s22 }
 0x236   :  { %v287_v57 = vld.sshfl [vmem:[#allocation1] sm:$0xff pattern:$0x75316420] }
 0x237   :  { %339 = vst [vmem:[#allocation1] ss:$2 sm:$0xff] %v252_v54  ;;  %288 = vrot.lane.b32.xlu1 %v287_v57, %s1282_s22 }
 0x23e   :  { %v340_v58 = vld.sshfl [vmem:[#allocation1] sm:$0xff pattern:$0x75316420] }
 0x23f   :  { %370 = vst [vmem:[#allocation1] ss:$2 sm:$0xff] %v256_v55 }
 0x246   :  { %v371_v59 = vld.sshfl [vmem:[#allocation1] sm:$0xff pattern:$0x75316420] }
 0x247   :  { %399 = vst [vmem:[#allocation1] ss:$2 sm:$0xff] %v252_v54  ;;  %372 = vrot.lane.b32.xlu0 %v371_v59, %s1283_s4 }
 0x24e   :  { %v400_v60 = vld.sshfl [vmem:[#allocation1] sm:$0xff pattern:$0x75316420] }
 0x24f   :  { %403 = vst [vmem:[#allocation1] ss:$2 sm:$0xff] %v252_v54 }
 0x256   :  { %v404_v61 = vld.sshfl [vmem:[#allocation1] sm:$0xff pattern:$0x75316420] }
 0x257   :  { %431 = vst [vmem:[#allocation1] ss:$2 sm:$0xff] %v256_v55 }
 0x25e   :  { %v1495_v62 = vld.sshfl [vmem:[#allocation1] sm:$0xff pattern:$0x75316420] }
 0x25f   :  { %435 = vst [vmem:[#allocation1] ss:$2 sm:$0xff] %v256_v55 }
 0x266   :  { %v436_v63 = vld.sshfl [vmem:[#allocation1] sm:$0xff pattern:$0x75316420] }
 0x267   :  { %487 = vst [vmem:[#allocation1] ss:$2 sm:$0xff] %v252_v54  ;;  %437 = vrot.lane.b32.xlu0 %v436_v63, %s1284_s5 }
 0x26e   :  { %v1498_v0 = vld.sshfl [vmem:[#allocation1] sm:$0xff pattern:$0x75316420] }
 0x26f   :  { %516 = vst [vmem:[#allocation1] ss:$2 sm:$0xff] %v256_v55 }
 0x276   :  { %v1500_v1 = vld.sshfl [vmem:[#allocation1] sm:$0xff pattern:$0x75316420] }
 0x277   :  { %545 = vst [vmem:[#allocation1] ss:$2 sm:$0xff] %v252_v54 }
 0x27e   :  { %v1502_v2 = vld.sshfl [vmem:[#allocation1] sm:$0xff pattern:$0x75316420] }
 0x27f   :  { %549 = vst [vmem:[#allocation1] ss:$2 sm:$0xff] %v252_v54 }
 0x286   :  { %v550_v3 = vld.sshfl [vmem:[#allocation1] sm:$0xff pattern:$0x75316420] }
 0x287   :  { %577 = vst [vmem:[#allocation1] ss:$2 sm:$0xff] %v256_v55 }
 0x28e   :  { %v1504_v4 = vld.sshfl [vmem:[#allocation1] sm:$0xff pattern:$0x75316420] }
 0x28f   :  { %581 = vst [vmem:[#allocation1] ss:$2 sm:$0xff] %v256_v55 }
 0x296   :  { %v1506_v5 = vld.sshfl [vmem:[#allocation1] sm:$0xff pattern:$0x75316420] }
 0x297   :  { %633 = vst [vmem:[#allocation1] ss:$2 sm:$0xff] %v252_v54 }
 0x29e   :  { %v1508_v6 = vld.sshfl [vmem:[#allocation1] sm:$0xff pattern:$0x75316420] }
 0x29f   :  { %662 = vst [vmem:[#allocation1] ss:$2 sm:$0xff] %v256_v55 }
 0x2a1   :  { %v260_v7 = vpop.permute.xlu1 %259 }
 0x2a2   :  { %1156 = vmatpush.xpose.msk.msra.mxu2 %vm261_vm6, %v260_v7 }
 0x2a5   :  { %1157 = vmatmul.msk.f32.vlgmr.msra.gmra.mxu2 %vm261_vm6, %v252_v54 }
 0x2a6   :  { %v1512_v8 = vld.sshfl [vmem:[#allocation1] sm:$0xff pattern:$0x75316420] }
 0x2a7   :  { %691 = vst [vmem:[#allocation1] ss:$2 sm:$0xff] %v252_v54 }
 0x2a9   :  { %v289_v9 = vpop.permute.xlu1 %288 }
 0x2aa   :  { %1158 = vmatpush.xpose.msk.msrb.mxu1 %vm261_vm6, %v289_v9 }
 0x2ad   :  { %1159 = vmatmul.msk.f32.vlgmr.msrb.gmra.mxu1 %vm261_vm6, %v256_v55 }
 0x2ae   :  { %v1516_v10 = vld.sshfl [vmem:[#allocation1] sm:$0xff pattern:$0x75316420] }
 0x2af   :  { %695 = vst [vmem:[#allocation1] ss:$2 sm:$0xff] %v252_v54 }
 0x2b6   :  { %v1518_v11 = vld.sshfl [vmem:[#allocation1] sm:$0xff pattern:$0x75316420] }
 0x2b7   :  { %723 = vst [vmem:[#allocation1] ss:$2 sm:$0xff] %v256_v55 }
 0x2b9   :  { %v373_v12 = vpop.permute.xlu0 %372 }
 0x2ba   :  { %1162 = vmatpush.msk.msra.mxu3 %vm347_vm7, %v373_v12 }
 0x2be   :  { %v1521_v14 = vld.sshfl [vmem:[#allocation1] sm:$0xff pattern:$0x75316420] }
 0x2bf   :  { %727 = vst [vmem:[#allocation1] ss:$2 sm:$0xff] %v256_v55 }
 0x2c6   :  { %v1523_v15 = vld.sshfl [vmem:[#allocation1] sm:$0xff pattern:$0x75316420] }
 0x2c7   :  { %779 = vst [vmem:[#allocation1] ss:$2 sm:$0xff] %v252_v54 }
 0x2ce   :  { %v1525_v16 = vld.sshfl [vmem:[#allocation1] sm:$0xff pattern:$0x75316420] }
 0x2cf   :  { %808 = vst [vmem:[#allocation1] ss:$2 sm:$0xff] %v256_v55 }
 0x2d9   :  { %v438_v17 = vpop.permute.xlu0 %437 }
 0x2da   :  { %1166 = vmatpush.xpose.msk.msrb.mxu3 %vm261_vm6, %v438_v17 }
 0x328   :  { %v283_v18 = vpop.f32.mrf.mxu2 }
 0x329   :  { %v314_v19 = vmul.f32 0.35355338, %v283_v18 }
 0x32a   :  { %v311_v21 = vpop.f32.mrf.mxu1 }
 0x32b   :  { %v317_v20 = vsel %vm316_vm8, %v314_v19, -inf  ;;  %v315_v22 = vmul.f32 0.35355338, %v311_v21 }
 0x32c   :  { %318 = vmax.xlane.f32.xlu2 %v317_v20 }
 0x32d   :  { %v320_v23 = vsel %vm316_vm8, %v315_v22, -inf }
 0x334   :  { %321 = vmax.xlane.f32.xlu2 %v320_v23 }
 0x34c   :  { %341 = vrot.lane.b32.xlu2 %v340_v58, %s1283_s4 }
 0x354   :  { %405 = vrot.lane.b32.xlu2 %v404_v61, %s1284_s5 }
 0x35c   :  { %401 = vrot.lane.b32.xlu2 %v400_v60, %s1285_s3 }
 0x364   :  { %551 = vrot.lane.b32.xlu2 %v550_v3, %s1286_s23 }
 0x39f   :  { %v319_v24 = vpop.xlane.xlu2 %318 }
 0x3a0   :  { %v323_v25 = vsub.f32 %v314_v19, %v319_v24 }
 0x3a2   :  { %v325_v27 = vmul.f32 1.442695, %v323_v25 }
 0x3a4   :  { %1241 = vpow2.f32 %v325_v27 }
 0x3a7   :  { %v322_v28 = vpop.xlane.xlu2 %321 }
 0x3a8   :  { %v324_v29 = vsub.f32 %v315_v22, %v322_v28 }
 0x3aa   :  { %v1242_v30 = vpop.eup %1241  ;;  %v327_v31 = vmul.f32 1.442695, %v324_v29 }
 0x3ab   :  { %v329_v32 = vsel %vm316_vm8, %v1242_v30, 0.0 }
 0x3ac   :  { %1243 = vpow2.f32 %v327_v31  ;;  %330 = vadd.xlane.f32.xlu0 %v329_v32 }
 0x3af   :  { %v342_v33 = vpop.permute.xlu2 %341 }
 0x3b0   :  { %1160 = vmatpush.msk.msrb.mxu2 %vm347_vm7, %v342_v33 }
 0x3b2   :  { %v1244_v34 = vpop.eup %1243 }
 0x3b3   :  { %v332_v35 = vsel %vm316_vm8, %v1244_v34, 0.0 }
 0x3b4   :  { %333 = vadd.xlane.f32.xlu1 %v332_v35 }
 0x3b7   :  { %v406_v36 = vpop.permute.xlu2 %405 }
 0x3b8   :  { %1164 = vmatpush.xpose.msk.msra.mxu2 %vm261_vm6, %v406_v36 }
 0x3bf   :  { %v402_v39 = vpop.permute.xlu2 %401 }
 0x3c0   :  { %433 = vrot.lane.b32.xlu0 %v1495_v62, %s1285_s3 }
 0x3c7   :  { %v552_v44 = vpop.permute.xlu2 %551 }
 0x3cd   :  { %547 = vrot.lane.b32.xlu1 %v1502_v2, %s1287_s20 }
 0x41f   :  { %v331_v37 = vpop.xlane.xlu0 %330 }
 0x420   :  { %1245 = vrcp.f32 %v331_v37 }
 0x426   :  { %v1246_v38 = vpop.eup %1245 }
 0x427   :  { %v334_v40 = vpop.xlane.xlu1 %333  ;;  %v337_v41 = vmul.f32 %v1246_v38, %v1242_v30 }
 0x428   :  { %1247 = vrcp.f32 %v334_v40 }
 0x429   :  { %1161 = vmatmul.msk.f32.vlgmr.msrb.gmra.mxu2 %vm343_vm9, %v337_v41 }
 0x42e   :  { %v1248_v42 = vpop.eup %1247 }
 0x42f   :  { %v338_v43 = vmul.f32 %v1248_v42, %v1244_v34 }
 0x431   :  { %1163 = vmatmul.msk.f32.vlgmr.msra.gmra.mxu3 %vm343_vm9, %v338_v43  ;;  %1165 = vmatmul.msk.f32.vlgmr.msra.gmra.mxu2 %vm261_vm6, %v402_v39 }
 0x432   :  { %1172 = vmatpush.xpose.msk.msra.mxu3 %vm261_vm6, %v552_v44  ;;  %v434_v45 = vpop.permute.xlu0 %433 }
 0x439   :  { %1167 = vmatmul.msk.f32.vlgmr.msrb.gmra.mxu3 %vm261_vm6, %v434_v45 }
 0x43f   :  { %v548_v46 = vpop.permute.xlu1 %547 }
 0x441   :  { %1173 = vmatmul.msk.f32.vlgmr.msra.gmra.mxu3 %vm261_vm6, %v548_v46 }
 0x4ac   :  { %v1546_v47 = vpop.f32.mrf.mxu2 }
 0x4b4   :  { %v1548_v48 = vpop.f32.mrf.mxu3  ;;  %v428_v49 = vpop.f32.mrf.mxu2 }
 0x4b5   :  { %v463_v50 = vmul.f32 0.35355338, %v428_v49 }
 0x4b7   :  { %v465_v51 = vsel %vm316_vm8, %v463_v50, -inf }
 0x4b8   :  { %466 = vmax.xlane.f32.xlu0 %v465_v51 }
 0x4bc   :  { %v460_v52 = vpop.f32.mrf.mxu3 }
 0x4bd   :  { %v464_v53 = vmul.f32 0.35355338, %v460_v52 }
 0x4bf   :  { %v468_v54 = vsel %vm316_vm8, %v464_v53, -inf }
 0x4c0   :  { %469 = vmax.xlane.f32.xlu2 %v468_v54 }
 0x4c4   :  { %v574_v55 = vpop.f32.mrf.mxu3 }
 0x4c5   :  { %v609_v56 = vmul.f32 0.35355338, %v574_v55 }
 0x4c7   :  { %v611_v57 = vsel %vm316_vm8, %v609_v56, -inf }
 0x4c8   :  { %612 = vmax.xlane.f32.xlu1 %v611_v57 }
 0x4cc   :  { %518 = vrot.lane.b32.xlu0 %v1500_v1, %s1288_s24 }
 0x4d4   :  { %579 = vrot.lane.b32.xlu0 %v1504_v4, %s1287_s20 }
 0x4d8   :  { %489 = vrot.lane.b32.xlu2 %v1498_v0, %s1288_s24 }
 0x4e0   :  { %635 = vrot.lane.b32.xlu2 %v1508_v6, %s1289_s25 }
 0x4e1   :  { %583 = vrot.lane.b32.xlu1 %v1506_v5, %s1286_s23 }
 0x4e8   :  { %697 = vrot.lane.b32.xlu2 %v1518_v11, %s1290_s1 }
 0x4e9   :  { %693 = vrot.lane.b32.xlu1 %v1516_v10, %s1291_s26 }
 0x52b   :  { %v467_v58 = vpop.xlane.xlu0 %466 }
 0x52c   :  { %v471_v59 = vsub.f32 %v463_v50, %v467_v58 }
 0x52e   :  { %v473_v60 = vmul.f32 1.442695, %v471_v59 }
 0x530   :  { %1249 = vpow2.f32 %v473_v60  ;;  %v809_v60 = vld.sshfl [vmem:[#allocation1] sm:$0xff pattern:$0x75316420] }
 0x533   :  { %v470_v61 = vpop.xlane.xlu2 %469 }
 0x534   :  { %v472_v62 = vsub.f32 %v464_v53, %v470_v61 }
 0x536   :  { %v1250_v63 = vpop.eup %1249  ;;  %v475_v0 = vmul.f32 1.442695, %v472_v62 }
 0x537   :  { %v477_v1 = vsel %vm316_vm8, %v1250_v63, 0.0 }
 0x538   :  { %1251 = vpow2.f32 %v475_v0  ;;  %478 = vadd.xlane.f32.xlu0 %v477_v1 }
 0x53b   :  { %v613_v2 = vpop.xlane.xlu1 %612  ;;  %v490_v3 = vpop.permute.xlu2 %489 }
 0x53c   :  { %v617_v4 = vsub.f32 %v609_v56, %v613_v2  ;;  %1168 = vmatpush.msk.msrb.mxu0 %vm347_vm7, %v490_v3 }
 0x53e   :  { %v1252_v5 = vpop.eup %1251  ;;  %v619_v6 = vmul.f32 1.442695, %v617_v4  ;;  %v519_v7 = vpop.permute.xlu0 %518 }
 0x53f   :  { %1170 = vmatpush.msk.msrb.mxu2 %vm347_vm7, %v519_v7  ;;  %v480_v9 = vsel %vm316_vm8, %v1252_v5, 0.0 }
 0x540   :  { %1253 = vpow2.f32 %v619_v6  ;;  %481 = vadd.xlane.f32.xlu2 %v480_v9 }
 0x543   :  { %v636_v10 = vpop.permute.xlu2 %635 }
 0x544   :  { %1176 = vmatpush.msk.msra.mxu2 %vm347_vm7, %v636_v10 }
 0x546   :  { %v1254_v11 = vpop.eup %1253  ;;  %v580_v18 = vpop.permute.xlu0 %579 }
 0x547   :  { %v623_v12 = vsel %vm316_vm8, %v1254_v11, 0.0 }
 0x548   :  { %624 = vadd.xlane.f32.xlu0 %v623_v12  ;;  %v139_v12 = vld [vmem:[%s1733_s7 + $0x10] sm:$0xff] }
 0x54b   :  { %v698_v19 = vpop.permute.xlu2 %697 }
 0x553   :  { %v584_v17 = vpop.permute.xlu1 %583 }
 0x554   :  { %1174 = vmatpush.xpose.msk.msra.mxu0 %vm261_vm6, %v584_v17  ;;  %v138_v17 = vld [vmem:[%s1733_s7 + $0x8] sm:$0xff] }
 0x558   :  { %725 = vrot.lane.b32.xlu2 %v1521_v14, %s1291_s26 }
 0x55b   :  { %v694_v28 = vpop.permute.xlu1 %693 }
 0x55c   :  { %729 = vrot.lane.b32.xlu0 %v1523_v15, %s1290_s1 }
 0x5ab   :  { %v479_v20 = vpop.xlane.xlu0 %478 }
 0x5ac   :  { %1255 = vrcp.f32 %v479_v20 }
 0x5b2   :  { %v1256_v21 = vpop.eup %1255 }
 0x5b3   :  { %v482_v22 = vpop.xlane.xlu2 %481  ;;  %v485_v23 = vmul.f32 %v1256_v21, %v1250_v63 }
 0x5b4   :  { %1257 = vrcp.f32 %v482_v22 }
 0x5b5   :  { %1169 = vmatmul.msk.f32.vlgmr.msrb.gmra.mxu0 %vm343_vm9, %v485_v23 }
 0x5b6   :  { %1180 = vmatpush.xpose.msk.msrb.mxu0 %vm261_vm6, %v698_v19 }
 0x5ba   :  { %v1258_v24 = vpop.eup %1257 }
 0x5bb   :  { %v486_v25 = vmul.f32 %v1258_v24, %v1252_v5  ;;  %v625_v27 = vpop.xlane.xlu0 %624  ;;  %v726_v30 = vpop.permute.xlu2 %725 }
 0x5bc   :  { %1259 = vrcp.f32 %v625_v27 }
 0x5bd   :  { %1171 = vmatmul.msk.f32.vlgmr.msrb.gmra.mxu2 %vm343_vm9, %v486_v25  ;;  %1175 = vmatmul.msk.f32.vlgmr.msra.gmra.mxu0 %vm261_vm6, %v580_v18  ;;  %v137_v18 = vld [vmem:[%s1733_s7] sm:$0xff] }
 0x5c2   :  { %v1260_v14 = vpop.eup %1259 }
 0x5c3   :  { %v631_v15 = vmul.f32 %v1260_v14, %v1254_v11  ;;  %v140_v11 = vld [vmem:[%s1733_s7 + $0x18] sm:$0xff] }
 0x5c5   :  { %1177 = vmatmul.msk.f32.vlgmr.msra.gmra.mxu2 %vm343_vm9, %v631_v15  ;;  %1181 = vmatmul.msk.f32.vlgmr.msrb.gmra.mxu0 %vm261_vm6, %v694_v28 }
 0x5ce   :  { %v730_v29 = vpop.permute.xlu0 %729 }
 0x5cf   :  { %1182 = vmatpush.xpose.msk.msrb.mxu2 %vm261_vm6, %v730_v29 }
 0x5d2   :  { %1183 = vmatmul.msk.f32.vlgmr.msrb.gmra.mxu2 %vm261_vm6, %v726_v30 }
 0x5d3   :  { %1188 = vmatpush.xpose.msk.msra.mxu2 %vm158_vm1, %v140_v11 }
 0x5d7   :  { %1189 = vmatpush.xpose.msk.msra.mxu2 %vm158_vm1, %v139_v12 }
 0x5db   :  { %1190 = vmatpush.xpose.msk.msra.mxu2 %vm158_vm1, %v138_v17 }
 0x5df   :  { %1191 = vmatpush.xpose.msk.msra.mxu2 %vm158_vm1, %v137_v18 }
 0x632   :  { %v513_v31 = vpop.f32.mrf.mxu0 }
 0x63a   :  { %v606_v32 = vpop.f32.mrf.mxu0 }
 0x63b   :  { %v610_v33 = vmul.f32 0.35355338, %v606_v32 }
 0x63d   :  { %v614_v34 = vsel %vm316_vm8, %v610_v33, -inf }
 0x63e   :  { %615 = vmax.xlane.f32.xlu0 %v614_v34 }
 0x640   :  { %v542_v36 = vpop.f32.mrf.mxu2 }
 0x642   :  { %v720_v35 = vpop.f32.mrf.mxu0 }
 0x643   :  { %v755_v37 = vmul.f32 0.35355338, %v720_v35 }
 0x645   :  { %v757_v38 = vsel %vm316_vm8, %v755_v37, -inf }
 0x646   :  { %758 = vmax.xlane.f32.xlu1 %v757_v38 }
 0x648   :  { %v659_v39 = vpop.f32.mrf.mxu2 }
 0x655   :  { %v752_v40 = vpop.f32.mrf.mxu2 }
 0x656   :  { %v756_v41 = vmul.f32 0.35355338, %v752_v40  ;;  %v149_v40 = vld [vmem:[%s1735_s11 + $0x28] sm:$0xff] }
 0x658   :  { %v760_v42 = vsel %vm316_vm8, %v756_v41, -inf }
 0x659   :  { %761 = vmax.xlane.f32.xlu2 %v760_v42  ;;  %v147_v42 = vld [vmem:[%s1735_s11 + $0x18] sm:$0xff] }
 0x671   :  { %664 = vrot.lane.b32.xlu2 %v1512_v8, %s1289_s25 }
 0x679   :  { %839 = vrot.lane.b32.xlu2 %v513_v31, %s1292_s27  ;;  %v1229_v31 = vld [vmem:[%s1732_s8] ss:$0 sm:$0xff] }
 0x6b1   :  { %v616_v43 = vpop.xlane.xlu0 %615 }
 0x6b2   :  { %v618_v44 = vsub.f32 %v610_v33, %v616_v43  ;;  %v146_v43 = vld [vmem:[%s1735_s11 + $0x10] sm:$0xff] }
 0x6b4   :  { %v621_v45 = vmul.f32 1.442695, %v618_v44  ;;  %v145_v44 = vld [vmem:[%s1735_s11 + $0x8] sm:$0xff] }
 0x6b6   :  { %1261 = vpow2.f32 %v621_v45  ;;  %v144_v45 = vld [vmem:[%s1735_s11] sm:$0xff] }
 0x6b9   :  { %v759_v46 = vpop.xlane.xlu1 %758 }
 0x6ba   :  { %v763_v49 = vsub.f32 %v755_v37, %v759_v46 }
 0x6bc   :  { %v1262_v50 = vpop.eup %1261  ;;  %v765_v51 = vmul.f32 1.442695, %v763_v49 }
 0x6bd   :  { %v626_v52 = vsel %vm316_vm8, %v1262_v50, 0.0 }
 0x6be   :  { %1263 = vpow2.f32 %v765_v51  ;;  %627 = vadd.xlane.f32.xlu0 %v626_v52 }
 0x6c4   :  { %v1264_v53 = vpop.eup %1263 }
 0x6c5   :  { %v769_v54 = vsel %vm316_vm8, %v1264_v53, 0.0 }
 0x6c6   :  { %770 = vadd.xlane.f32.xlu1 %v769_v54 }
 0x6cc   :  { %v762_v8 = vpop.xlane.xlu2 %761 }
 0x6cd   :  { %v764_v55 = vsub.f32 %v756_v41, %v762_v8  ;;  %v148_v41 = vld [vmem:[%s1735_s11 + $0x20] sm:$0xff] }
 0x6cf   :  { %v767_v56 = vmul.f32 1.442695, %v764_v55 }
 0x6d1   :  { %1265 = vpow2.f32 %v767_v56  ;;  %v1230_v56 = vld [vmem:[%s1734_s9] ss:$0 sm:$0xff] }
 0x6d4   :  { %v665_v57 = vpop.permute.xlu2 %664 }
 0x6d5   :  { %1178 = vmatpush.msk.msrb.mxu3 %vm347_vm7, %v665_v57 }
 0x6d7   :  { %v1266_v58 = vpop.eup %1265 }
 0x6d8   :  { %v772_v59 = vsel %vm316_vm8, %v1266_v58, 0.0 }
 0x6d9   :  { %773 = vadd.xlane.f32.xlu0 %v772_v59  ;;  %v1231_v59 = vld [vmem:[%s1736_s10] ss:$0 sm:$0xff] }
 0x6dc   :  { %v840_v20 = vpop.permute.xlu2 %839 }
 0x6dd   :  { %v861_v22 = vsel %vm261_vm6, %v1546_v47, %v840_v20 }
 0x6df   :  { %781 = vrot.lane.b32.xlu1 %v1525_v16, %s1293_s28 }
 0x6e7   :  { %847 = vrot.lane.b32.xlu1 %v659_v39, %s1294_s29  ;;  %v150_v39 = vld [vmem:[%s1735_s11 + $0x30] sm:$0xff] }
 0x6ed   :  { %810 = vrot.lane.b32.xlu0 %v809_v60, %s1293_s28 }
 0x6f5   :  { %841 = vrot.lane.b32.xlu0 %v542_v36, %s1292_s27 }
 0x731   :  { %v628_v61 = vpop.xlane.xlu0 %627 }
 0x732   :  { %1267 = vrcp.f32 %v628_v61 }
 0x738   :  { %v1268_v62 = vpop.eup %1267 }
 0x739   :  { %v632_v63 = vmul.f32 %v1268_v62, %v1262_v50  ;;  %v771_v0 = vpop.xlane.xlu1 %770  ;;  %v1232_v62 = vld [vmem:[%s1737_s12] ss:$0 sm:$0xff] }
 0x73a   :  { %1269 = vrcp.f32 %v771_v0 }
 0x73b   :  { %1179 = vmatmul.msk.f32.vlgmr.msrb.gmra.mxu3 %vm343_vm9, %v632_v63  ;;  %v156_v63 = vld [vmem:[%s1738_s13 + $0x18] sm:$0xff] }
 0x740   :  { %v1270_v1 = vpop.eup %1269 }
 0x741   :  { %v777_v2 = vmul.f32 %v1270_v1, %v1264_v53 }
 0x74c   :  { %v774_v16 = vpop.xlane.xlu0 %773 }
 0x74d   :  { %1271 = vrcp.f32 %v774_v16 }
 0x751   :  { %v782_v3 = vpop.permute.xlu1 %781 }
 0x752   :  { %1184 = vmatpush.msk.msra.mxu3 %vm347_vm7, %v782_v3  ;;  %v155_v3 = vld [vmem:[%s1738_s13 + $0x10] sm:$0xff] }
 0x753   :  { %1185 = vmatmul.msk.f32.vlgmr.msra.gmra.mxu3 %vm343_vm9, %v777_v2  ;;  %v1272_v4 = vpop.eup %1271 }
 0x754   :  { %v778_v5 = vmul.f32 %v1272_v4, %v1266_v58 }
 0x759   :  { %v848_v21 = vpop.permute.xlu1 %847 }
 0x75a   :  { %v864_v23 = vsel %vm863_vm10, %v861_v22, %v848_v21 }
 0x75f   :  { %v811_v6 = vpop.permute.xlu0 %810 }
 0x760   :  { %1186 = vmatpush.msk.msra.mxu0 %vm347_vm7, %v811_v6 }
 0x761   :  { %1187 = vmatmul.msk.f32.vlgmr.msra.gmra.mxu0 %vm343_vm9, %v778_v5  ;;  %v154_v5 = vld [vmem:[%s1738_s13 + $0x8] sm:$0xff] }
 0x762   :  { %1202 = vmatpush.xpose.msk.msrb.mxu0 %vm1020_vm15, %v156_v63 }
 0x766   :  { %1203 = vmatpush.xpose.msk.msrb.mxu0 %vm1020_vm15, %v155_v3 }
 0x767   :  { %v842_v19 = vpop.permute.xlu0 %841 }
 0x768   :  { %v862_v14 = vsel %vm261_vm6, %v1548_v48, %v842_v19  ;;  %v151_v48 = vld [vmem:[%s1735_s11 + $0x38] sm:$0xff] }
 0x769   :  { %1193 = vmatpush.xpose.msk.msrb.mxu3 %vm158_vm1, %v151_v48 }
 0x76a   :  { %1204 = vmatpush.xpose.msk.msrb.mxu0 %vm1020_vm15, %v154_v5 }
 0x76d   :  { %1194 = vmatpush.xpose.msk.msrb.mxu3 %vm158_vm1, %v150_v39 }
 0x771   :  { %1195 = vmatpush.xpose.msk.msrb.mxu3 %vm158_vm1, %v149_v40 }
 0x775   :  { %1196 = vmatpush.xpose.msk.msrb.mxu3 %vm158_vm1, %v148_v41 }
 0x779   :  { %1197 = vmatpush.xpose.msk.msrb.mxu3 %vm158_vm1, %v147_v42  ;;  %v1094_v42 = vld [vmem:[%s1743_s17 + $0x8] sm:$0xff] }
 0x77a   :  { %1207 = vmatpush.xpose.msk.msra.mxu1 %vm158_vm1, %v1094_v42 }
 0x77d   :  { %1198 = vmatpush.xpose.msk.msrb.mxu3 %vm158_vm1, %v146_v43 }
 0x781   :  { %1199 = vmatpush.xpose.msk.msrb.mxu3 %vm158_vm1, %v145_v44 }
 0x785   :  { %1200 = vmatpush.xpose.msk.msrb.mxu3 %vm158_vm1, %v144_v45 }
 0x7be   :  { %v688_v7 = vpop.f32.mrf.mxu3 }
 0x7bf   :  { %849 = vrot.lane.b32.xlu2 %v688_v7, %s1294_s29  ;;  %v153_v7 = vld [vmem:[%s1738_s13] sm:$0xff] }
 0x7c0   :  { %1205 = vmatpush.xpose.msk.msrb.mxu0 %vm1020_vm15, %v153_v7 }
 0x7d6   :  { %v805_v9 = vpop.f32.mrf.mxu3 }
 0x7d7   :  { %855 = vrot.lane.b32.xlu0 %v805_v9, %s1295_s2 }
 0x7de   :  { %v834_v10 = vpop.f32.mrf.mxu0 }
 0x7df   :  { %857 = vrot.lane.b32.xlu1 %v834_v10, %s1295_s2 }
 0x819   :  { %v850_v27 = vpop.permute.xlu2 %849 }
 0x81a   :  { %v865_v15 = vsel %vm863_vm10, %v862_v14, %v850_v27 }
 0x849   :  { %v856_v24 = vpop.permute.xlu0 %855 }
 0x84a   :  { %v867_v25 = vsel %vm866_vm11, %v864_v23, %v856_v24 }
 0x84b   :  { %871 = vst [vmem:[#allocation1] ss:$2 sm:$0xff] %v867_v25 }
 0x851   :  { %v858_v28 = vpop.permute.xlu1 %857 }
 0x852   :  { %v868_v29 = vsel %vm866_vm11, %v865_v15, %v858_v28  ;;  %v1296_v28 = vmov -1.0  }
 0x853   :  { %873 = vst [vmem:[#allocation1 + $0x1] ss:$2 sm:$0xff] %v868_v29 }
 0x85a   :  { %v874_v30 = vld.sshfl [vmem:[#allocation1] sm:$0xff pattern:$0x75316420] }
 0x85b   :  { %1192 = vmatmul.msk.f32.vlgmr.msra.gmra.mxu2 %vm158_vm1, %v874_v30 }
 0x8de   :  { %v906_v47 = vpop.f32.mrf.mxu2 }
 0x8df   :  { %v909_v32 = vadd.f32 %v906_v47, %v1429_v13 }
 0x8e1   :  { %v1626_v33 = vadd.f32 %v1229_v31, %v909_v32 }
 0x8e3   :  { %v914_v34 = vsel %vm158_vm1, %v1626_v33, 0.0 }
 0x8e4   :  { %915 = vadd.xlane.f32.xlu2 %v914_v34  ;;  %v1233_v34 = vld [vmem:[%s1739_s14] ss:$0 sm:$0xff] }
 0x957   :  { %v916_v35 = vpop.xlane.xlu2 %915 }
 0x958   :  { %v917_v36 = vmul.f32 %v916_v35, %v1453_v26 }
 0x95a   :  { %v918_v37 = vsub.f32 %v1626_v33, %v917_v36 }
 0x95c   :  { %v919_v38 = vmul.f32 %v918_v37, %v918_v37 }
 0x95e   :  { %v920_v13 = vsel %vm158_vm1, %v919_v38, 0.0 }
 0x95f   :  { %921 = vadd.xlane.f32.xlu0 %v920_v13 }
 0x9d2   :  { %v922_v46 = vpop.xlane.xlu0 %921 }
 0x9d3   :  { %v923_v49 = vmul.f32 %v922_v46, %v1453_v26 }
 0x9d5   :  { %v924_v50 = vadd.f32 1e-05, %v923_v49 }
 0x9d7   :  { %1273 = vrsqrt.f32 %v924_v50  ;;  %vm931_vm13 = vweird.f32 %v924_v50 }
 0x9dd   :  { %v1274_v51 = vpop.eup %1273 }
 0x9de   :  { %v926_v52 = vmul.f32 %v1274_v51, %v924_v50  ;;  %vm932_vm12 = vweird.f32 %v1274_v51 }
 0x9df   :  { %vm933_vm14 = vmor %vm931_vm13, %vm932_vm12 }
 0x9e0   :  { %v927_v53 = vmul.f32 %v1274_v51, %v926_v52 }
 0x9e2   :  { %v928_v54 = vmul.f32 0.5, %v927_v53 }
 0x9e4   :  { %v929_v8 = vsub.f32 1.5, %v928_v54  ;;  %v1234_v54 = vld [vmem:[%s1740_s15] ss:$0 sm:$0xff] }
 0x9e6   :  { %v930_v55 = vmul.f32 %v1274_v51, %v929_v8 }
 0x9e8   :  { %v934_v57 = vsel %vm933_vm14, %v1274_v51, %v930_v55 }
 0x9e9   :  { %v935_v58 = vmul.f32 %v934_v57, %v918_v37 }
 0x9eb   :  { %v939_v60 = vmul.f32 %v1230_v56, %v935_v58  ;;  %v1236_v58 = vld [vmem:[%s1742_s18] ss:$0 sm:$0xff] }
 0x9ed   :  { %v943_v61 = vadd.f32 %v1231_v59, %v939_v60 }
 0x9ef   :  { %1201 = vmatmul.msk.f32.vlgmr.msrb.gmra.mxu3 %vm158_vm1, %v943_v61 }
 0xa72   :  { %v991_v0 = vpop.f32.mrf.mxu3 }
 0xa73   :  { %v992_v1 = vadd.f32 %v1232_v62, %v991_v0 }
 0xa75   :  { %v995_v2 = vmul.f32 0.70710677, %v992_v1  ;;  %v994_v31 = vmul.f32 0.5, %v992_v1 }
 0xa77   :  { %v998_v16 = vand.u32 2147483647, %v995_v2  ;;  %vm996_vm0 = vcmp.ge.f32.partialorder %v995_v2, 0.0 }
 0xa78   :  { %v997_v29 = vsel %vm996_vm0, 1.0, %v1296_v28 }
 0xa79   :  { %v999_v4 = vmul.f32 0.3275911, %v998_v16  ;;  %v1011_v10 = vsub.f32 0.0, %v998_v16 }
 0xa7b   :  { %v1000_v6 = vadd.f32 1.0, %v999_v4  ;;  %v1012_v17 = vmul.f32 %v1011_v10, %v998_v16 }
 0xa7d   :  { %1275 = vrcp.f32 %v1000_v6  ;;  %v1013_v20 = vmul.f32 1.442695, %v1012_v17 }
 0xa7f   :  { %1277 = vpow2.f32 %v1013_v20 }
 0xa83   :  { %v1276_v9 = vpop.eup %1275 }
 0xa84   :  { %v1002_v11 = vmul.f32 1.0614054, %v1276_v9 }
 0xa85   :  { %v1278_v27 = vpop.eup %1277 }
 0xa86   :  { %v1003_v12 = vadd.f32 -1.4531521, %v1002_v11 }
 0xa88   :  { %v1004_v18 = vmul.f32 %v1276_v9, %v1003_v12 }
 0xa8a   :  { %v1005_v19 = vadd.f32 1.4214138, %v1004_v18 }
 0xa8c   :  { %v1006_v21 = vmul.f32 %v1276_v9, %v1005_v19 }
 0xa8e   :  { %v1007_v22 = vadd.f32 -0.28449672, %v1006_v21 }
 0xa90   :  { %v1008_v23 = vmul.f32 %v1276_v9, %v1007_v22 }
 0xa92   :  { %v1009_v24 = vadd.f32 0.2548296, %v1008_v23 }
 0xa94   :  { %v1010_v25 = vmul.f32 %v1276_v9, %v1009_v24 }
 0xa96   :  { %v1015_v14 = vmul.f32 %v1278_v27, %v1010_v25 }
 0xa98   :  { %v1016_v15 = vsub.f32 1.0, %v1015_v14 }
 0xa9a   :  { %v1017_v30 = vmul.f32 %v1016_v15, %v997_v29 }
 0xa9c   :  { %v1018_v47 = vadd.f32 1.0, %v1017_v30 }
 0xa9e   :  { %v1019_v32 = vmul.f32 %v1018_v47, %v994_v31 }
 0xaa0   :  { %1206 = vmatmul.msk.f32.vlgmr.msrb.gmra.mxu0 %vm1020_vm15, %v1019_v32 }
 0xb1d   :  { %v1053_v48 = vpop.f32.mrf.mxu0 }
 0xb1e   :  { %v1056_v35 = vadd.f32 %v1053_v48, %v1626_v33  ;;  %v1093_v33 = vld [vmem:[%s1743_s17] sm:$0xff] }
 0xb1f   :  { %1208 = vmatpush.xpose.msk.msra.mxu1 %vm158_vm1, %v1093_v33 }
 0xb20   :  { %v1060_v36 = vadd.f32 %v1233_v34, %v1056_v35 }
 0xb22   :  { %v1063_v37 = vsel %vm158_vm1, %v1060_v36, 0.0 }
 0xb23   :  { %1064 = vadd.xlane.f32.xlu1 %v1063_v37 }
 0xb96   :  { %v1065_v38 = vpop.xlane.xlu1 %1064 }
 0xb97   :  { %v1066_v13 = vmul.f32 %v1065_v38, %v1453_v26 }
 0xb99   :  { %v1067_v39 = vsub.f32 %v1060_v36, %v1066_v13 }
 0xb9b   :  { %v1068_v40 = vmul.f32 %v1067_v39, %v1067_v39 }
 0xb9d   :  { %v1069_v41 = vsel %vm158_vm1, %v1068_v40, 0.0 }
 0xb9e   :  { %1070 = vadd.xlane.f32.xlu2 %v1069_v41 }
 0xc11   :  { %v1071_v43 = vpop.xlane.xlu2 %1070 }
 0xc12   :  { %v1072_v44 = vmul.f32 %v1071_v43, %v1453_v26  ;;  %v1235_v26 = vld [vmem:[%s1741_s16] ss:$0 sm:$0xff] }
 0xc14   :  { %v1073_v45 = vadd.f32 1e-05, %v1072_v44 }
 0xc16   :  { %1279 = vrsqrt.f32 %v1073_v45  ;;  %vm1080_vm3 = vweird.f32 %v1073_v45 }
 0xc1c   :  { %v1280_v46 = vpop.eup %1279 }
 0xc1d   :  { %v1075_v49 = vmul.f32 %v1280_v46, %v1073_v45  ;;  %vm1081_vm2 = vweird.f32 %v1280_v46 }
 0xc1e   :  { %vm1082_vm4 = vmor %vm1080_vm3, %vm1081_vm2 }
 0xc1f   :  { %v1076_v50 = vmul.f32 %v1280_v46, %v1075_v49 }
 0xc21   :  { %v1077_v51 = vmul.f32 0.5, %v1076_v50 }
 0xc23   :  { %v1078_v52 = vsub.f32 1.5, %v1077_v51 }
 0xc25   :  { %v1079_v53 = vmul.f32 %v1280_v46, %v1078_v52 }
 0xc27   :  { %v1083_v8 = vsel %vm1082_vm4, %v1280_v46, %v1079_v53 }
 0xc28   :  { %v1084_v55 = vmul.f32 %v1083_v8, %v1067_v39 }
 0xc2a   :  { %v1088_v56 = vmul.f32 %v1234_v54, %v1084_v55 }
 0xc2c   :  { %v1092_v57 = vadd.f32 %v1235_v26, %v1088_v56 }
 0xc2e   :  { %1209 = vmatmul.msk.f32.vlgmr.msra.gmra.mxu1 %vm158_vm1, %v1092_v57 }
 0xcab   :  { %v1125_v59 = vpop.f32.mrf.mxu1 }
 0xcac   :  { %v1126_v60 = vadd.f32 %v1236_v58, %v1125_v59 }
 0xcae   :  { %v1129_v61 = vrot.slane %v1126_v60, 4  ;;  %1132 = vst.msk [vmem:[%s1744_s19] sm:$0xf] %vm1131_vm5, %v1126_v60 }
 0xcb0   :  { %1133 = vst.msk [vmem:[%s1744_s19 + $0x4] sm:$0xf] %vm1131_vm5, %v1129_v61 }

// kernel: mae_forward.3
= control target key start
LH: loop header
LB: loop body
LE: loop exit
PB: predicated region body
PF: predicated region fallthrough
CT: control target
= control target key end

     0   :  { %s2045_s0 = inlined_call_operand.vmem [shape: f32[2,16,16], index: 0, kind: input, shape index: {}]   ;;  %s2046_s1 = inlined_call_operand.vmem [shape: f32[2,12,48], index: 1, kind: input, shape index: {}]   ;;  %s2047_s2 = inlined_call_operand.vmem [shape: f32[1,16], index: 2, kind: input, shape index: {}]   ;;  %s2048_s3 = inlined_call_operand.vmem [shape: f32[1,16], index: 3, kind: input, shape index: {}]   ;;  %s2049_s4 = inlined_call_operand.vmem [shape: f32[48,16], index: 4, kind: input, shape index: {}]   ;;  %s2050_s5 = inlined_call_operand.vmem [shape: f32[16,16], index: 5, kind: input, shape index: {}]   ;;  %s2051_s6 = inlined_call_operand.vmem [shape: f32[1,16], index: 6, kind: input, shape index: {}]   ;;  %s2052_s7 = inlined_call_operand.vmem [shape: f32[1,16], index: 7, kind: input, shape index: {}]   ;;  %s2053_s8 = inlined_call_operand.vmem [shape: f32[1,16], index: 8, kind: input, shape index: {}]   ;;  %s2054_s9 = inlined_call_operand.vmem [shape: f32[64,16], index: 9, kind: input, shape index: {}]   ;;  %s2055_s10 = inlined_call_operand.vmem [shape: f32[1,64], index: 10, kind: input, shape index: {}]   ;;  %s2056_s11 = inlined_call_operand.vmem [shape: f32[16,64], index: 11, kind: input, shape index: {}]   ;;  %s2057_s12 = inlined_call_operand.vmem [shape: f32[1,16], index: 12, kind: input, shape index: {}]   ;;  %s2058_s13 = inlined_call_operand.vmem [shape: f32[1,16], index: 13, kind: input, shape index: {}]   ;;  %s2059_s14 = inlined_call_operand.vmem [shape: f32[1,16], index: 14, kind: input, shape index: {}]   ;;  %s2060_s15 = inlined_call_operand.vmem [shape: f32[48,16], index: 15, kind: input, shape index: {}]   ;;  %s2061_s16 = inlined_call_operand.vmem [shape: f32[1,48], index: 16, kind: input, shape index: {}]   ;;  %s2062_s17 = inlined_call_operand.hbm [shape: f32[1,1], index: 17, kind: output, shape index: {}]  }
   0x1   :  { %2065 = sst [smem:[#allocation5_spill]] %s2045_s0 }
   0x2   :  { %2066 = sst [smem:[#allocation6_spill]] %s2046_s1 }
   0x3   :  { %s2067_s26 = sld [smem:[#allocation5_spill]]  ;;  %vm86_vm0 = vcmask 130048  }
   0x9   :  { %v1617_v0 = vld [vmem:[%s2067_s26 + $0x10] sm:$0xff]  ;;  %v1622_v1 = vld [vmem:[%s2067_s26] sm:$0xff]  ;;  %v1631_v4 = vld [vmem:[%s2067_s26 + $0x18] sm:$0xff] }
   0xa   :  { %v93_v2 = vsel %vm86_vm0, %v1617_v0, 0.0  ;;  %v87_v3 = vsel %vm86_vm0, %v1622_v1, 0.0  ;;  %v1636_v5 = vld [vmem:[%s2067_s26 + $0x8] sm:$0xff] }
   0xb   :  { %94 = vadd.xlane.f32.xlu1 %v93_v2  ;;  %88 = vadd.xlane.f32.xlu0 %v87_v3 }
   0xc   :  { %22 = vsyncpa [#allocation3], 0  ;;  %v96_v6 = vsel %vm86_vm0, %v1631_v4, 0.0  ;;  %v90_v7 = vsel %vm86_vm0, %v1636_v5, 0.0  ;;  %v1515_v8 = vmov 16.0   ;;  %v68_v35 = vld [vmem:[%s2049_s4 + $0x28] sm:$0xff] }
   0xd   :  { %1415 = vrcp.f32 %v1515_v8  ;;  %1309 = vmatpush.xpose.msk.msra.mxu0 %vm86_vm0, %v68_v35  ;;  %v67_v36 = vld [vmem:[%s2049_s4 + $0x20] sm:$0xff]  ;;  %v66_v37 = vld [vmem:[%s2049_s4 + $0x18] sm:$0xff]  ;;  %v65_v38 = vld [vmem:[%s2049_s4 + $0x10] sm:$0xff]  ;;  %s1518_s19 = smov 120   ;;  %vm261_vm14 = vcmask 64512   ;;  %s1519_s1 = smov 96  }
   0xe   :  { %v64_v39 = vld [vmem:[%s2049_s4 + $0x8] sm:$0xff]  ;;  %v63_v40 = vld [vmem:[%s2049_s4] sm:$0xff]  ;;  %s1520_s20 = smov 88   ;;  %s1521_s21 = smov 8  }
   0xf   :  { %s2068_s25 = sld [smem:[#allocation6_spill]]  ;;  %s1300_s29 = sshll.u32 %s2062_s17, 4  ;;  %s1301_s29 = int_to_ptr.hbm [resolvable:$true] %s1300_s29 }
  0x11   :  { %1310 = vmatpush.xpose.msk.msra.mxu0 %vm86_vm0, %v67_v36 }
  0x13   :  { %97 = vadd.xlane.f32.xlu1 %v96_v6  ;;  %91 = vadd.xlane.f32.xlu0 %v90_v7  ;;  %v1416_v9 = vpop.eup %1415  ;;  %v1405_v7 = vld [vmem:[%s2047_s2] ss:$0 sm:$0xff]  ;;  %s1516_s2 = smov 112  }
  0x14   :  { %v100_v10 = vmul.f32 16.0, %v1416_v9  ;;  %vm104_vm1 = vweird.f32 %v1416_v9 }
  0x15   :  { %1311 = vmatpush.xpose.msk.msra.mxu0 %vm86_vm0, %v66_v37 }
  0x16   :  { %v101_v11 = vsub.f32 1.0, %v100_v10 }
  0x18   :  { %v102_v12 = vmul.f32 %v1416_v9, %v101_v11  ;;  %v1406_v11 = vld [vmem:[%s2048_s3] ss:$0 sm:$0xff]  ;;  %s1517_s3 = smov 104  }
  0x19   :  { %1312 = vmatpush.xpose.msk.msra.mxu0 %vm86_vm0, %v65_v38 }
  0x1a   :  { %v103_v13 = vadd.f32 %v1416_v9, %v102_v12 }
  0x1c   :  { %v1642_v14 = vsel %vm104_vm1, %v1416_v9, %v103_v13 }
  0x1d   :  { %1313 = vmatpush.xpose.msk.msra.mxu0 %vm86_vm0, %v64_v39 }
  0x21   :  { %1314 = vmatpush.xpose.msk.msra.mxu0 %vm86_vm0, %v63_v40 }
  0x7e   :  { %v95_v15 = vpop.xlane.xlu1 %94  ;;  %v89_v16 = vpop.xlane.xlu0 %88 }
  0x7f   :  { %v108_v17 = vmul.f32 %v1642_v14, %v95_v15  ;;  %v106_v18 = vmul.f32 %v1642_v14, %v89_v16 }
  0x81   :  { %v1647_v19 = vsub.f32 %v1617_v0, %v108_v17  ;;  %v1650_v20 = vsub.f32 %v1622_v1, %v106_v18 }
  0x83   :  { %v116_v21 = vmul.f32 %v1647_v19, %v1647_v19  ;;  %v114_v22 = vmul.f32 %v1650_v20, %v1650_v20 }
  0x85   :  { %v124_v23 = vsel %vm86_vm0, %v116_v21, 0.0  ;;  %v118_v24 = vsel %vm86_vm0, %v114_v22, 0.0 }
  0x86   :  { %v98_v25 = vpop.xlane.xlu1 %97  ;;  %125 = vadd.xlane.f32.xlu0 %v124_v23  ;;  %119 = vadd.xlane.f32.xlu2 %v118_v24  ;;  %v92_v26 = vpop.xlane.xlu0 %91 }
  0x87   :  { %v109_v27 = vmul.f32 %v1642_v14, %v98_v25  ;;  %v107_v28 = vmul.f32 %v1642_v14, %v92_v26 }
  0x89   :  { %v1661_v29 = vsub.f32 %v1631_v4, %v109_v27  ;;  %v1664_v30 = vsub.f32 %v1636_v5, %v107_v28 }
  0x8b   :  { %v117_v31 = vmul.f32 %v1661_v29, %v1661_v29  ;;  %v115_v32 = vmul.f32 %v1664_v30, %v1664_v30 }
  0x8d   :  { %v127_v33 = vsel %vm86_vm0, %v117_v31, 0.0  ;;  %v121_v34 = vsel %vm86_vm0, %v115_v32, 0.0 }
  0x8e   :  { %128 = vadd.xlane.f32.xlu1 %v127_v33  ;;  %122 = vadd.xlane.f32.xlu2 %v121_v34 }
  0xf9   :  { %v120_v41 = vpop.xlane.xlu2 %119  ;;  %v126_v42 = vpop.xlane.xlu0 %125 }
  0xfa   :  { %v130_v43 = vmul.f32 %v120_v41, %v1642_v14  ;;  %v132_v44 = vmul.f32 %v126_v42, %v1642_v14 }
  0xfc   :  { %v134_v45 = vadd.f32 1e-05, %v130_v43  ;;  %v136_v46 = vadd.f32 1e-05, %v132_v44 }
  0xfe   :  { %1417 = vrsqrt.f32 %v134_v45  ;;  %vm144_vm3 = vweird.f32 %v134_v45  ;;  %vm164_vm5 = vweird.f32 %v136_v46 }
  0xff   :  { %1419 = vrsqrt.f32 %v136_v46 }
 0x101   :  { %v129_v47 = vpop.xlane.xlu1 %128  ;;  %v123_v48 = vpop.xlane.xlu2 %122 }
 0x102   :  { %v133_v49 = vmul.f32 %v129_v47, %v1642_v14  ;;  %v131_v50 = vmul.f32 %v123_v48, %v1642_v14 }
 0x104   :  { %v1418_v51 = vpop.eup %1417  ;;  %v137_v52 = vadd.f32 1e-05, %v133_v49  ;;  %v135_v53 = vadd.f32 1e-05, %v131_v50 }
 0x105   :  { %v1420_v54 = vpop.eup %1419  ;;  %v139_v55 = vmul.f32 %v1418_v51, %v134_v45  ;;  %vm145_vm2 = vweird.f32 %v1418_v51 }
 0x106   :  { %v159_v56 = vmul.f32 %v1420_v54, %v136_v46  ;;  %1421 = vrsqrt.f32 %v137_v52  ;;  %vm146_vm4 = vmor %vm144_vm3, %vm145_vm2  ;;  %vm165_vm6 = vweird.f32 %v1420_v54  ;;  %vm154_vm9 = vweird.f32 %v135_v53 }
 0x107   :  { %v140_v57 = vmul.f32 %v1418_v51, %v139_v55  ;;  %1423 = vrsqrt.f32 %v135_v53  ;;  %vm166_vm8 = vmor %vm164_vm5, %vm165_vm6  ;;  %vm174_vm11 = vweird.f32 %v137_v52 }
 0x108   :  { %v160_v59 = vmul.f32 %v1420_v54, %v159_v56 }
 0x109   :  { %v141_v58 = vmul.f32 0.5, %v140_v57 }
 0x10a   :  { %v161_v2 = vmul.f32 0.5, %v160_v59 }
 0x10b   :  { %v142_v60 = vsub.f32 1.5, %v141_v58 }
 0x10c   :  { %v1422_v61 = vpop.eup %1421  ;;  %v162_v12 = vsub.f32 1.5, %v161_v2 }
 0x10d   :  { %v1424_v62 = vpop.eup %1423  ;;  %v143_v63 = vmul.f32 %v1418_v51, %v142_v60  ;;  %v169_v3 = vmul.f32 %v1422_v61, %v137_v52  ;;  %vm175_vm12 = vweird.f32 %v1422_v61 }
 0x10e   :  { %v149_v6 = vmul.f32 %v1424_v62, %v135_v53  ;;  %vm155_vm7 = vweird.f32 %v1424_v62  ;;  %v163_v21 = vmul.f32 %v1420_v54, %v162_v12  ;;  %vm176_vm13 = vmor %vm174_vm11, %vm175_vm12  ;;  %vm996_vm12 = vcmask 523264  }
 0x10f   :  { %v147_v8 = vsel %vm146_vm4, %v1418_v51, %v143_v63  ;;  %v170_v13 = vmul.f32 %v1422_v61, %v169_v3  ;;  %vm156_vm10 = vmor %vm154_vm9, %vm155_vm7 }
 0x110   :  { %v150_v9 = vmul.f32 %v1424_v62, %v149_v6  ;;  %v178_v10 = vmul.f32 %v147_v8, %v1650_v20  ;;  %v167_v25 = vsel %vm166_vm8, %v1420_v54, %v163_v21 }
 0x111   :  { %v171_v22 = vmul.f32 0.5, %v170_v13  ;;  %v180_v31 = vmul.f32 %v167_v25, %v1647_v19 }
 0x112   :  { %v151_v15 = vmul.f32 0.5, %v150_v9  ;;  %v185_v16 = vmul.f32 %v1405_v7, %v178_v10 }
 0x113   :  { %v172_v26 = vsub.f32 1.5, %v171_v22  ;;  %v187_v33 = vmul.f32 %v1405_v7, %v180_v31 }
 0x114   :  { %v152_v17 = vsub.f32 1.5, %v151_v15  ;;  %v192_v18 = vadd.f32 %v1406_v11, %v185_v16 }
 0x115   :  { %v173_v32 = vmul.f32 %v1422_v61, %v172_v26  ;;  %v194_v35 = vadd.f32 %v1406_v11, %v187_v33 }
 0x116   :  { %v153_v23 = vmul.f32 %v1424_v62, %v152_v17  ;;  %1315 = vmatmul.msk.f32.vlgmr.msra.gmra.mxu0 %vm86_vm0, %v192_v18 }
 0x117   :  { %v177_v34 = vsel %vm176_vm13, %v1422_v61, %v173_v32 }
 0x118   :  { %v157_v20 = vsel %vm156_vm10, %v1424_v62, %v153_v23  ;;  %v181_v36 = vmul.f32 %v177_v34, %v1661_v29 }
 0x119   :  { %v179_v24 = vmul.f32 %v157_v20, %v1664_v30 }
 0x11a   :  { %v188_v30 = vmul.f32 %v1405_v7, %v181_v36 }
 0x11b   :  { %v186_v27 = vmul.f32 %v1405_v7, %v179_v24 }
 0x11c   :  { %v195_v37 = vadd.f32 %v1406_v11, %v188_v30 }
 0x11d   :  { %v193_v28 = vadd.f32 %v1406_v11, %v186_v27 }
 0x11f   :  { %1316 = vmatmul.msk.f32.gmra.mxu0 %vm86_vm0, %v193_v28 }
 0x127   :  { %1317 = vmatmul.msk.f32.gmra.mxu0 %vm86_vm0, %v194_v35 }
 0x12f   :  { %1318 = vmatmul.msk.f32.gmra.mxu0 %vm86_vm0, %v195_v37 }
 0x193   :  { %v1714_v38 = vpop.f32.mrf.mxu0 }
 0x194   :  { %257 = vrot.lane.b32.xlu0 %v1714_v38, %s1516_s2 }
 0x19c   :  { %v1717_v19 = vpop.f32.mrf.mxu0 }
 0x19d   :  { %454 = vrot.lane.b32.xlu0 %v1717_v19, %s1517_s3  ;;  %259 = vrot.lane.b32.xlu2 %v1717_v19, %s1516_s2  ;;  %v1767_v17 = vpack.i.bf16 %v1714_v38, %v1717_v19 }
 0x1a4   :  { %v1721_v39 = vpop.f32.mrf.mxu0 }
 0x1a5   :  { %450 = vrot.lane.b32.xlu0 %v1717_v19, %s1518_s19  ;;  %295 = vrot.lane.b32.xlu2 %v1721_v39, %s1516_s2 }
 0x1ac   :  { %v1725_v29 = vpop.f32.mrf.mxu0 }
 0x1ad   :  { %487 = vrot.lane.b32.xlu0 %v1721_v39, %s1518_s19  ;;  %452 = vrot.lane.b32.xlu2 %v1714_v38, %s1517_s3  ;;  %v1390_v18 = vpack.i.bf16 %v1721_v39, %v1725_v29 }
 0x1ae   :  { %297 = vrot.lane.b32.xlu1 %v1725_v29, %s1516_s2 }
 0x1b5   :  { %493 = vrot.lane.b32.xlu2 %v1725_v29, %s1517_s3 }
 0x1b6   :  { %448 = vrot.lane.b32.xlu1 %v1714_v38, %s1518_s19 }
 0x1bd   :  { %489 = vrot.lane.b32.xlu2 %v1725_v29, %s1518_s19 }
 0x1be   :  { %491 = vrot.lane.b32.xlu1 %v1721_v39, %s1517_s3 }
 0x1f7   :  { %v260_v40 = vpop.permute.xlu2 %259 }
 0x1f8   :  { %1319 = vmatpush.xpose.msk.msra.mxu1 %vm261_vm14, %v260_v40 }
 0x1ff   :  { %v296_v42 = vpop.permute.xlu2 %295 }
 0x206   :  { %v258_v41 = vpop.permute.xlu0 %257 }
 0x207   :  { %1320 = vmatpush.xpose.msk.msra.mxu1 %vm261_vm14, %v258_v41  ;;  %v453_v44 = vpop.permute.xlu2 %452 }
 0x20a   :  { %1321 = vmatmul.msk.f32.vlgmr.msra.gmra.mxu1 %vm261_vm14, %v1714_v38 }
 0x20f   :  { %v455_v43 = vpop.permute.xlu0 %454  ;;  %v494_v46 = vpop.permute.xlu2 %493 }
 0x210   :  { %1331 = vmatpush.xpose.msk.msrb.mxu1 %vm261_vm14, %v455_v43 }
 0x212   :  { %1322 = vmatmul.msk.f32.gmra.mxu1 %vm261_vm14, %v1717_v19 }
 0x214   :  { %1332 = vmatpush.xpose.msk.msrb.mxu1 %vm261_vm14, %v453_v44 }
 0x217   :  { %v451_v48 = vpop.permute.xlu0 %450  ;;  %v490_v51 = vpop.permute.xlu2 %489 }
 0x21f   :  { %v488_v50 = vpop.permute.xlu0 %487 }
 0x220   :  { %v298_v45 = vpop.permute.xlu1 %297 }
 0x221   :  { %1323 = vmatpush.xpose.msk.msra.mxu2 %vm261_vm14, %v298_v45 }
 0x225   :  { %1324 = vmatpush.xpose.msk.msra.mxu2 %vm261_vm14, %v296_v42 }
 0x228   :  { %1325 = vmatmul.msk.f32.vlgmr.msra.gmra.mxu2 %vm261_vm14, %v1721_v39  ;;  %v449_v47 = vpop.permute.xlu1 %448 }
 0x229   :  { %1335 = vmatpush.xpose.msk.msrb.mxu2 %vm261_vm14, %v494_v46  ;;  %1333 = vmatmul.msk.f32.vlgmr.msrb.gmra.mxu1 %vm261_vm14, %v449_v47 }
 0x230   :  { %1326 = vmatmul.msk.f32.gmra.mxu2 %vm261_vm14, %v1725_v29  ;;  %v492_v49 = vpop.permute.xlu1 %491 }
 0x231   :  { %1334 = vmatmul.msk.f32.gmra.mxu1 %vm261_vm14, %v451_v48  ;;  %1336 = vmatpush.xpose.msk.msrb.mxu2 %vm261_vm14, %v492_v49 }
 0x238   :  { %1337 = vmatmul.msk.f32.vlgmr.msrb.gmra.mxu2 %vm261_vm14, %v488_v50 }
 0x240   :  { %1338 = vmatmul.msk.f32.gmra.mxu2 %vm261_vm14, %v490_v51 }
 0x287   :  { %v287_v52 = vpop.f32.mrf.mxu1 }
 0x288   :  { %v330_v53 = vmul.f32 0.35355338, %v287_v52 }
 0x28a   :  { %v334_v54 = vsel %vm86_vm0, %v330_v53, -inf }
 0x28b   :  { %335 = vmax.xlane.f32.xlu1 %v334_v54 }
 0x28f   :  { %v290_v55 = vpop.f32.mrf.mxu1 }
 0x290   :  { %v331_v56 = vmul.f32 0.35355338, %v290_v55 }
 0x292   :  { %v337_v57 = vsel %vm86_vm0, %v331_v56, -inf }
 0x293   :  { %338 = vmax.xlane.f32.xlu0 %v337_v57 }
 0x2a6   :  { %v481_v58 = vpop.f32.mrf.mxu1 }
 0x2a7   :  { %v526_v59 = vmul.f32 0.35355338, %v481_v58 }
 0x2a9   :  { %v530_v60 = vsel %vm86_vm0, %v526_v59, -inf }
 0x2aa   :  { %531 = vmax.xlane.f32.xlu0 %v530_v60 }
 0x2ab   :  { %v324_v61 = vpop.f32.mrf.mxu2 }
 0x2ac   :  { %v332_v62 = vmul.f32 0.35355338, %v324_v61 }
 0x2ae   :  { %v340_v63 = vsel %vm86_vm0, %v332_v62, -inf  ;;  %v484_v2 = vpop.f32.mrf.mxu1 }
 0x2af   :  { %341 = vmax.xlane.f32.xlu2 %v340_v63  ;;  %v527_v3 = vmul.f32 0.35355338, %v484_v2 }
 0x2b1   :  { %v533_v9 = vsel %vm86_vm0, %v527_v3, -inf }
 0x2b3   :  { %v327_v6 = vpop.f32.mrf.mxu2 }
 0x2b4   :  { %v333_v7 = vmul.f32 0.35355338, %v327_v6 }
 0x2b6   :  { %v343_v8 = vsel %vm86_vm0, %v333_v7, -inf }
 0x2b7   :  { %344 = vmax.xlane.f32.xlu1 %v343_v8  ;;  %534 = vmax.xlane.f32.xlu2 %v533_v9 }
 0x2bb   :  { %v520_v10 = vpop.f32.mrf.mxu2 }
 0x2bc   :  { %v1760_v11 = vmul.f32 0.35355338, %v520_v10 }
 0x2be   :  { %v536_v12 = vsel %vm86_vm0, %v1760_v11, -inf }
 0x2bf   :  { %537 = vmax.xlane.f32.xlu0 %v536_v12 }
 0x2c3   :  { %v523_v13 = vpop.f32.mrf.mxu2 }
 0x2c4   :  { %v529_v15 = vmul.f32 0.35355338, %v523_v13 }
 0x2c6   :  { %v539_v16 = vsel %vm86_vm0, %v529_v15, -inf }
 0x2c7   :  { %540 = vmax.xlane.f32.xlu0 %v539_v16 }
 0x2cf   :  { %1386 = vrot.lane.b32.xlu2 %v1767_v17, %s1519_s1 }
 0x2db   :  { %1391 = vrot.lane.b32.xlu0 %v1390_v18, %s1519_s1 }
 0x2fe   :  { %v336_v21 = vpop.xlane.xlu1 %335 }
 0x2ff   :  { %v346_v22 = vsub.f32 %v330_v53, %v336_v21 }
 0x301   :  { %v350_v23 = vmul.f32 1.442695, %v346_v22 }
 0x303   :  { %1425 = vpow2.f32 %v350_v23 }
 0x306   :  { %v339_v20 = vpop.xlane.xlu0 %338 }
 0x307   :  { %v347_v24 = vsub.f32 %v331_v56, %v339_v20 }
 0x309   :  { %v1772_v25 = vpop.eup %1425  ;;  %v352_v26 = vmul.f32 1.442695, %v347_v24 }
 0x30a   :  { %v358_v27 = vsel %vm86_vm0, %v1772_v25, 0.0 }
 0x30b   :  { %1427 = vpow2.f32 %v352_v26  ;;  %359 = vadd.xlane.f32.xlu1 %v358_v27 }
 0x311   :  { %v1776_v28 = vpop.eup %1427 }
 0x312   :  { %v361_v31 = vsel %vm86_vm0, %v1776_v28, 0.0 }
 0x313   :  { %362 = vadd.xlane.f32.xlu1 %v361_v31 }
 0x31d   :  { %v532_v32 = vpop.xlane.xlu0 %531 }
 0x31e   :  { %v542_v33 = vsub.f32 %v526_v59, %v532_v32 }
 0x320   :  { %v546_v34 = vmul.f32 1.442695, %v542_v33 }
 0x322   :  { %1429 = vpow2.f32 %v546_v34  ;;  %v342_v35 = vpop.xlane.xlu2 %341 }
 0x323   :  { %v348_v36 = vsub.f32 %v332_v62, %v342_v35 }
 0x325   :  { %v354_v30 = vmul.f32 1.442695, %v348_v36 }
 0x327   :  { %1431 = vpow2.f32 %v354_v30 }
 0x328   :  { %v1780_v37 = vpop.eup %1429 }
 0x329   :  { %v554_v38 = vsel %vm86_vm0, %v1780_v37, 0.0 }
 0x32a   :  { %v345_v19 = vpop.xlane.xlu1 %344  ;;  %v535_v39 = vpop.xlane.xlu2 %534  ;;  %555 = vadd.xlane.f32.xlu2 %v554_v38 }
 0x32b   :  { %v349_v29 = vsub.f32 %v333_v7, %v345_v19  ;;  %v543_v40 = vsub.f32 %v527_v3, %v535_v39 }
 0x32d   :  { %v1432_v41 = vpop.eup %1431  ;;  %v356_v42 = vmul.f32 1.442695, %v349_v29  ;;  %v548_v43 = vmul.f32 1.442695, %v543_v40 }
 0x32e   :  { %v364_v44 = vsel %vm86_vm0, %v1432_v41, 0.0 }
 0x32f   :  { %1433 = vpow2.f32 %v356_v42  ;;  %365 = vadd.xlane.f32.xlu1 %v364_v44  ;;  %v70_v44 = vld [vmem:[%s2050_s5 + $0x8] sm:$0xff] }
 0x330   :  { %1435 = vpow2.f32 %v548_v43  ;;  %1343 = vmatpush.xpose.msk.msra.mxu2 %vm86_vm0, %v70_v44 }
 0x332   :  { %v1387_v45 = vpop.permute.xlu2 %1386  ;;  %v538_v46 = vpop.xlane.xlu0 %537 }
 0x333   :  { %v1388_v47 = vunpack.i.l.bf16 %v1387_v45  ;;  %v1389_v49 = vunpack.i.h.bf16 %v1387_v45  ;;  %v544_v61 = vsub.f32 %v1760_v11, %v538_v46  ;;  %v69_v45 = vld [vmem:[%s2050_s5] sm:$0xff] }
 0x334   :  { %1344 = vmatpush.xpose.msk.msra.mxu2 %vm86_vm0, %v69_v45 }
 0x335   :  { %v1434_v48 = vpop.eup %1433  ;;  %404 = vmatpush.msra.mxu3 %v1388_v47  ;;  %v550_v62 = vmul.f32 1.442695, %v544_v61 }
 0x336   :  { %v1785_v50 = vpop.eup %1435  ;;  %v367_v51 = vsel %vm86_vm0, %v1434_v48, 0.0 }
 0x337   :  { %405 = vmatpush.msra.mxu3 %v1389_v49  ;;  %v557_v52 = vsel %vm86_vm0, %v1785_v50, 0.0  ;;  %368 = vadd.xlane.f32.xlu1 %v367_v51 }
 0x338   :  { %558 = vadd.xlane.f32.xlu0 %v557_v52 }
 0x33a   :  { %v541_v53 = vpop.xlane.xlu0 %540 }
 0x33b   :  { %v545_v54 = vsub.f32 %v529_v15, %v541_v53 }
 0x33d   :  { %v552_v55 = vmul.f32 1.442695, %v545_v54  ;;  %v1407_v54 = vld [vmem:[%s2051_s6] ss:$0 sm:$0xff] }
 0x33f   :  { %1437 = vpow2.f32 %v552_v55 }
 0x340   :  { %1439 = vpow2.f32 %v550_v62 }
 0x342   :  { %1401 = vrot.lane.b32.xlu2 %v1390_v18, %s1520_s20 }
 0x345   :  { %v1790_v56 = vpop.eup %1437 }
 0x346   :  { %v563_v57 = vsel %vm86_vm0, %v1790_v56, 0.0  ;;  %v1440_v63 = vpop.eup %1439 }
 0x347   :  { %564 = vadd.xlane.f32.xlu0 %v563_v57  ;;  %v560_v2 = vsel %vm86_vm0, %v1440_v63, 0.0 }
 0x34d   :  { %v1392_v58 = vpop.permute.xlu0 %1391 }
 0x34e   :  { %v1393_v59 = vunpack.i.l.bf16 %v1392_v58  ;;  %v1394_v60 = vunpack.i.h.bf16 %v1392_v58 }
 0x350   :  { %1396 = vrot.lane.b32.xlu1 %v1767_v17, %s1520_s20  ;;  %439 = vmatpush.msrb.mxu3 %v1393_v59 }
 0x352   :  { %440 = vmatpush.msrb.mxu3 %v1394_v60 }
 0x37a   :  { %561 = vadd.xlane.f32.xlu1 %v560_v2 }
 0x37e   :  { %v360_v3 = vpop.xlane.xlu1 %359 }
 0x37f   :  { %1441 = vrcp.f32 %v360_v3 }
 0x385   :  { %v1442_v6 = vpop.eup %1441 }
 0x386   :  { %v363_v7 = vpop.xlane.xlu1 %362  ;;  %v374_v8 = vmul.f32 %v1442_v6, %v1772_v25 }
 0x387   :  { %1443 = vrcp.f32 %v363_v7 }
 0x388   :  { %1327 = vmatmul.msk.f32.vlgmr.msra.gmra.mxu3 %vm86_vm0, %v374_v8 }
 0x38d   :  { %v1444_v9 = vpop.eup %1443 }
 0x38e   :  { %v375_v10 = vmul.f32 %v1444_v9, %v1776_v28 }
 0x390   :  { %1328 = vmatmul.msk.f32.gmra.mxu3 %vm86_vm0, %v375_v10 }
 0x39d   :  { %v556_v11 = vpop.xlane.xlu2 %555 }
 0x3a2   :  { %v366_v12 = vpop.xlane.xlu1 %365 }
 0x3a3   :  { %1445 = vrcp.f32 %v366_v12 }
 0x3a5   :  { %v1402_v13 = vpop.permute.xlu2 %1401 }
 0x3a6   :  { %v1403_v15 = vunpack.i.l.bf16 %v1402_v13  ;;  %v1404_v16 = vunpack.i.h.bf16 %v1402_v13 }
 0x3a8   :  { %635 = vmatpush.msra.mxu1 %v1403_v15 }
 0x3a9   :  { %v1446_v17 = vpop.eup %1445 }
 0x3aa   :  { %v369_v18 = vpop.xlane.xlu1 %368  ;;  %636 = vmatpush.msra.mxu1 %v1404_v16  ;;  %v376_v21 = vmul.f32 %v1446_v17, %v1432_v41 }
 0x3ab   :  { %1447 = vrcp.f32 %v369_v18  ;;  %v559_v20 = vpop.xlane.xlu0 %558  ;;  %v81_v18 = vld [vmem:[%s2054_s9 + $0x38] sm:$0xff] }
 0x3ac   :  { %1329 = vmatmul.msk.f32.vlgmr.msrb.gmra.mxu3 %vm86_vm0, %v376_v21  ;;  %1449 = vrcp.f32 %v556_v11  ;;  %1349 = vmatpush.xpose.msk.msrb.mxu0 %vm86_vm0, %v81_v18 }
 0x3ad   :  { %1451 = vrcp.f32 %v559_v20 }
 0x3b1   :  { %v1448_v22 = vpop.eup %1447 }
 0x3b2   :  { %v377_v23 = vmul.f32 %v1448_v22, %v1434_v48  ;;  %v1450_v25 = vpop.eup %1449 }
 0x3b3   :  { %v570_v28 = vmul.f32 %v1450_v25, %v1780_v37  ;;  %v1452_v31 = vpop.eup %1451 }
 0x3b4   :  { %1330 = vmatmul.msk.f32.gmra.mxu3 %vm86_vm0, %v377_v23  ;;  %v571_v32 = vmul.f32 %v1452_v31, %v1785_v50 }
 0x3ba   :  { %v565_v34 = vpop.xlane.xlu0 %564 }
 0x3c2   :  { %v1397_v24 = vpop.permute.xlu1 %1396 }
 0x3c3   :  { %v1398_v26 = vunpack.i.l.bf16 %v1397_v24  ;;  %v1399_v27 = vunpack.i.h.bf16 %v1397_v24 }
 0x3c5   :  { %600 = vmatpush.msra.mxu3 %v1398_v26 }
 0x3c7   :  { %601 = vmatpush.msra.mxu3 %v1399_v27 }
 0x3c8   :  { %1339 = vmatmul.msk.f32.vlgmr.msra.gmra.mxu3 %vm86_vm0, %v570_v28 }
 0x3d0   :  { %1340 = vmatmul.msk.f32.gmra.mxu3 %vm86_vm0, %v571_v32  ;;  %v80_v32 = vld [vmem:[%s2054_s9 + $0x30] sm:$0xff] }
 0x3d1   :  { %1350 = vmatpush.xpose.msk.msrb.mxu0 %vm86_vm0, %v80_v32 }
 0x3ed   :  { %v562_v33 = vpop.xlane.xlu1 %561 }
 0x3ee   :  { %1453 = vrcp.f32 %v562_v33  ;;  %v79_v33 = vld [vmem:[%s2054_s9 + $0x28] sm:$0xff] }
 0x3ef   :  { %1455 = vrcp.f32 %v565_v34  ;;  %1351 = vmatpush.xpose.msk.msrb.mxu0 %vm86_vm0, %v79_v33  ;;  %v78_v34 = vld [vmem:[%s2054_s9 + $0x20] sm:$0xff] }
 0x3f3   :  { %1352 = vmatpush.xpose.msk.msrb.mxu0 %vm86_vm0, %v78_v34 }
 0x3f4   :  { %v1454_v35 = vpop.eup %1453 }
 0x3f5   :  { %v572_v36 = vmul.f32 %v1454_v35, %v1440_v63  ;;  %v1456_v30 = vpop.eup %1455  ;;  %v77_v35 = vld [vmem:[%s2054_s9 + $0x18] sm:$0xff] }
 0x3f6   :  { %v573_v38 = vmul.f32 %v1456_v30, %v1790_v56  ;;  %v75_v30 = vld [vmem:[%s2054_s9 + $0x8] sm:$0xff] }
 0x3f7   :  { %1341 = vmatmul.msk.f32.vlgmr.msra.gmra.mxu1 %vm86_vm0, %v572_v36  ;;  %1353 = vmatpush.xpose.msk.msrb.mxu0 %vm86_vm0, %v77_v35  ;;  %v76_v36 = vld [vmem:[%s2054_s9 + $0x10] sm:$0xff] }
 0x3fb   :  { %1354 = vmatpush.xpose.msk.msrb.mxu0 %vm86_vm0, %v76_v36 }
 0x3ff   :  { %1342 = vmatmul.msk.f32.gmra.mxu1 %vm86_vm0, %v573_v38  ;;  %1355 = vmatpush.xpose.msk.msrb.mxu0 %vm86_vm0, %v75_v30  ;;  %v74_v38 = vld [vmem:[%s2054_s9] sm:$0xff] }
 0x403   :  { %1356 = vmatpush.xpose.msk.msrb.mxu0 %vm86_vm0, %v74_v38 }
 0x40b   :  { %v407_v37 = vpop.f32.mrf.mxu3 }
 0x413   :  { %v410_v19 = vpop.f32.mrf.mxu3 }
 0x42f   :  { %v442_v39 = vpop.f32.mrf.mxu3 }
 0x437   :  { %v445_v29 = vpop.f32.mrf.mxu3 }
 0x44b   :  { %v603_v40 = vpop.f32.mrf.mxu3 }
 0x44c   :  { %648 = vrot.lane.b32.xlu0 %v603_v40, %s1521_s21 }
 0x453   :  { %v606_v41 = vpop.f32.mrf.mxu3 }
 0x454   :  { %650 = vrot.lane.b32.xlu2 %v606_v41, %s1521_s21 }
 0x474   :  { %v638_v42 = vpop.f32.mrf.mxu1 }
 0x475   :  { %652 = vrot.lane.b32.xlu1 %v638_v42, %s1521_s21 }
 0x47c   :  { %v641_v43 = vpop.f32.mrf.mxu1 }
 0x47d   :  { %654 = vrot.lane.b32.xlu2 %v641_v43, %s1521_s21 }
 0x4ae   :  { %v651_v48 = vpop.permute.xlu2 %650 }
 0x4af   :  { %v661_v49 = vsel %vm261_vm14, %v410_v19, %v651_v48 }
 0x4be   :  { %v649_v46 = vpop.permute.xlu0 %648 }
 0x4bf   :  { %v660_v47 = vsel %vm261_vm14, %v407_v37, %v649_v46 }
 0x4c0   :  { %1345 = vmatmul.msk.f32.vlgmr.msra.gmra.mxu2 %vm86_vm0, %v660_v47 }
 0x4c8   :  { %1346 = vmatmul.msk.f32.gmra.mxu2 %vm86_vm0, %v661_v49 }
 0x4d7   :  { %v655_v52 = vpop.permute.xlu2 %654 }
 0x4d8   :  { %v663_v53 = vsel %vm261_vm14, %v445_v29, %v655_v52 }
 0x4e7   :  { %v653_v50 = vpop.permute.xlu1 %652 }
 0x4e8   :  { %v662_v51 = vsel %vm261_vm14, %v442_v39, %v653_v50  ;;  %v1408_v50 = vld [vmem:[%s2052_s7] ss:$0 sm:$0xff] }
 0x4e9   :  { %1347 = vmatmul.msk.f32.gmra.mxu2 %vm86_vm0, %v662_v51 }
 0x4f1   :  { %1348 = vmatmul.msk.f32.gmra.mxu2 %vm86_vm0, %v663_v53 }
 0x543   :  { %v699_v55 = vpop.f32.mrf.mxu2 }
 0x544   :  { %v711_v56 = vadd.f32 %v699_v55, %v1622_v1 }
 0x546   :  { %v1830_v57 = vadd.f32 %v1407_v54, %v711_v56 }
 0x548   :  { %v722_v58 = vsel %vm86_vm0, %v1830_v57, 0.0 }
 0x549   :  { %723 = vadd.xlane.f32.xlu0 %v722_v58 }
 0x54b   :  { %v702_v59 = vpop.f32.mrf.mxu2 }
 0x54c   :  { %v712_v60 = vadd.f32 %v702_v59, %v1636_v5 }
 0x54e   :  { %v1835_v61 = vadd.f32 %v1407_v54, %v712_v60 }
 0x550   :  { %v725_v62 = vsel %vm86_vm0, %v1835_v61, 0.0 }
 0x551   :  { %726 = vadd.xlane.f32.xlu2 %v725_v62 }
 0x56c   :  { %v705_v63 = vpop.f32.mrf.mxu2 }
 0x56d   :  { %v713_v2 = vadd.f32 %v705_v63, %v1617_v0 }
 0x56f   :  { %v1840_v3 = vadd.f32 %v1407_v54, %v713_v2 }
 0x571   :  { %v728_v1 = vsel %vm86_vm0, %v1840_v3, 0.0 }
 0x572   :  { %729 = vadd.xlane.f32.xlu1 %v728_v1 }
 0x574   :  { %v708_v6 = vpop.f32.mrf.mxu2 }
 0x575   :  { %v714_v7 = vadd.f32 %v708_v6, %v1631_v4 }
 0x577   :  { %v1845_v8 = vadd.f32 %v1407_v54, %v714_v7  ;;  %v1409_v54 = vld [vmem:[%s2053_s8] ss:$0 sm:$0xff] }
 0x579   :  { %v731_v5 = vsel %vm86_vm0, %v1845_v8, 0.0 }
 0x57a   :  { %732 = vadd.xlane.f32.xlu0 %v731_v5 }
 0x5bc   :  { %v724_v9 = vpop.xlane.xlu0 %723 }
 0x5bd   :  { %v734_v10 = vmul.f32 %v724_v9, %v1642_v14 }
 0x5bf   :  { %v738_v0 = vsub.f32 %v1830_v57, %v734_v10 }
 0x5c1   :  { %v742_v11 = vmul.f32 %v738_v0, %v738_v0 }
 0x5c3   :  { %v746_v12 = vsel %vm86_vm0, %v742_v11, 0.0 }
 0x5c4   :  { %747 = vadd.xlane.f32.xlu2 %v746_v12  ;;  %v727_v13 = vpop.xlane.xlu2 %726 }
 0x5c5   :  { %v735_v15 = vmul.f32 %v727_v13, %v1642_v14 }
 0x5c7   :  { %v1854_v4 = vsub.f32 %v1835_v61, %v735_v15 }
 0x5c9   :  { %v743_v16 = vmul.f32 %v1854_v4, %v1854_v4 }
 0x5cb   :  { %v749_v17 = vsel %vm86_vm0, %v743_v16, 0.0 }
 0x5cc   :  { %750 = vadd.xlane.f32.xlu0 %v749_v17 }
 0x5e5   :  { %v730_v21 = vpop.xlane.xlu1 %729 }
 0x5e6   :  { %v736_v22 = vmul.f32 %v730_v21, %v1642_v14 }
 0x5e8   :  { %v1865_v23 = vsub.f32 %v1840_v3, %v736_v22 }
 0x5ea   :  { %v744_v20 = vmul.f32 %v1865_v23, %v1865_v23 }
 0x5ec   :  { %v752_v24 = vsel %vm86_vm0, %v744_v20, 0.0 }
 0x5ed   :  { %753 = vadd.xlane.f32.xlu2 %v752_v24  ;;  %v733_v25 = vpop.xlane.xlu0 %732 }
 0x5ee   :  { %v737_v26 = vmul.f32 %v733_v25, %v1642_v14 }
 0x5f0   :  { %v1872_v27 = vsub.f32 %v1845_v8, %v737_v26 }
 0x5f2   :  { %v745_v28 = vmul.f32 %v1872_v27, %v1872_v27 }
 0x5f4   :  { %v755_v31 = vsel %vm86_vm0, %v745_v28, 0.0 }
 0x5f5   :  { %756 = vadd.xlane.f32.xlu1 %v755_v31 }
 0x637   :  { %v748_v37 = vpop.xlane.xlu2 %747 }
 0x638   :  { %v758_v19 = vmul.f32 %v748_v37, %v1642_v14 }
 0x63a   :  { %v762_v39 = vadd.f32 1e-05, %v758_v19 }
 0x63c   :  { %1457 = vrsqrt.f32 %v762_v39  ;;  %vm772_vm1 = vweird.f32 %v762_v39 }
 0x63f   :  { %v751_v29 = vpop.xlane.xlu0 %750 }
 0x640   :  { %v759_v40 = vmul.f32 %v751_v29, %v1642_v14 }
 0x642   :  { %v1458_v41 = vpop.eup %1457  ;;  %v763_v42 = vadd.f32 1e-05, %v759_v40 }
 0x643   :  { %v767_v43 = vmul.f32 %v1458_v41, %v762_v39  ;;  %vm773_vm15 = vweird.f32 %v1458_v41  ;;  %v84_v39 = vld [vmem:[%s2056_s11 + $0x8] sm:$0xff] }
 0x644   :  { %1459 = vrsqrt.f32 %v763_v42  ;;  %vm774_vm2 = vmor %vm772_vm1, %vm773_vm15  ;;  %vm782_vm4 = vweird.f32 %v763_v42  ;;  %1361 = vmatpush.xpose.msk.msrb.mxu3 %vm996_vm12, %v84_v39 }
 0x645   :  { %v768_v44 = vmul.f32 %v1458_v41, %v767_v43 }
 0x647   :  { %v769_v45 = vmul.f32 0.5, %v768_v44 }
 0x649   :  { %v770_v46 = vsub.f32 1.5, %v769_v45 }
 0x64a   :  { %v1460_v47 = vpop.eup %1459 }
 0x64b   :  { %v771_v48 = vmul.f32 %v1458_v41, %v770_v46  ;;  %v777_v49 = vmul.f32 %v1460_v47, %v763_v42  ;;  %vm783_vm3 = vweird.f32 %v1460_v47  ;;  %v83_v42 = vld [vmem:[%s2056_s11] sm:$0xff] }
 0x64c   :  { %vm784_vm5 = vmor %vm782_vm4, %vm783_vm3  ;;  %1362 = vmatpush.xpose.msk.msrb.mxu3 %vm996_vm12, %v83_v42 }
 0x64d   :  { %v775_v51 = vsel %vm774_vm2, %v1458_v41, %v771_v48  ;;  %v778_v52 = vmul.f32 %v1460_v47, %v777_v49 }
 0x64e   :  { %v806_v53 = vmul.f32 %v775_v51, %v738_v0 }
 0x64f   :  { %v779_v55 = vmul.f32 0.5, %v778_v52 }
 0x650   :  { %v813_v56 = vmul.f32 %v1408_v50, %v806_v53 }
 0x651   :  { %v780_v58 = vsub.f32 1.5, %v779_v55 }
 0x652   :  { %v820_v59 = vadd.f32 %v1409_v54, %v813_v56 }
 0x653   :  { %v781_v60 = vmul.f32 %v1460_v47, %v780_v58 }
 0x654   :  { %1357 = vmatmul.msk.f32.vlgmr.msrb.gmra.mxu0 %vm86_vm0, %v820_v59 }
 0x655   :  { %v785_v62 = vsel %vm784_vm5, %v1460_v47, %v781_v60 }
 0x656   :  { %v807_v63 = vmul.f32 %v785_v62, %v1854_v4 }
 0x658   :  { %v814_v2 = vmul.f32 %v1408_v50, %v807_v63 }
 0x65a   :  { %v821_v1 = vadd.f32 %v1409_v54, %v814_v2 }
 0x65c   :  { %1358 = vmatmul.msk.f32.gmra.mxu0 %vm86_vm0, %v821_v1 }
 0x660   :  { %v754_v6 = vpop.xlane.xlu2 %753 }
 0x661   :  { %v760_v7 = vmul.f32 %v754_v6, %v1642_v14 }
 0x663   :  { %v764_v5 = vadd.f32 1e-05, %v760_v7 }
 0x665   :  { %1461 = vrsqrt.f32 %v764_v5  ;;  %vm792_vm7 = vweird.f32 %v764_v5 }
 0x668   :  { %v757_v9 = vpop.xlane.xlu1 %756 }
 0x669   :  { %v761_v10 = vmul.f32 %v757_v9, %v1642_v14 }
 0x66b   :  { %v1462_v0 = vpop.eup %1461  ;;  %v765_v11 = vadd.f32 1e-05, %v761_v10 }
 0x66c   :  { %v787_v12 = vmul.f32 %v1462_v0, %v764_v5  ;;  %vm793_vm6 = vweird.f32 %v1462_v0 }
 0x66d   :  { %1463 = vrsqrt.f32 %v765_v11  ;;  %vm794_vm8 = vmor %vm792_vm7, %vm793_vm6  ;;  %vm802_vm10 = vweird.f32 %v765_v11 }
 0x66e   :  { %v788_v13 = vmul.f32 %v1462_v0, %v787_v12 }
 0x670   :  { %v789_v15 = vmul.f32 0.5, %v788_v13 }
 0x672   :  { %v790_v16 = vsub.f32 1.5, %v789_v15  ;;  %v1522_v15 = vmov -1.0  }
 0x673   :  { %v1464_v4 = vpop.eup %1463 }
 0x674   :  { %v791_v17 = vmul.f32 %v1462_v0, %v790_v16  ;;  %v797_v18 = vmul.f32 %v1464_v4, %v765_v11  ;;  %vm803_vm9 = vweird.f32 %v1464_v4 }
 0x675   :  { %vm804_vm11 = vmor %vm802_vm10, %vm803_vm9 }
 0x676   :  { %v795_v21 = vsel %vm794_vm8, %v1462_v0, %v791_v17  ;;  %v798_v22 = vmul.f32 %v1464_v4, %v797_v18 }
 0x677   :  { %v808_v20 = vmul.f32 %v795_v21, %v1865_v23  ;;  %v1925_v23 = vld [vmem:[%s2055_s10] ss:$0 sm:$0xff] }
 0x678   :  { %v799_v24 = vmul.f32 0.5, %v798_v22 }
 0x679   :  { %v815_v25 = vmul.f32 %v1408_v50, %v808_v20 }
 0x67a   :  { %v800_v26 = vsub.f32 1.5, %v799_v24 }
 0x67b   :  { %v822_v28 = vadd.f32 %v1409_v54, %v815_v25 }
 0x67c   :  { %v801_v31 = vmul.f32 %v1464_v4, %v800_v26 }
 0x67d   :  { %1359 = vmatmul.msk.f32.gmra.mxu0 %vm86_vm0, %v822_v28 }
 0x67e   :  { %v805_v32 = vsel %vm804_vm11, %v1464_v4, %v801_v31 }
 0x67f   :  { %v809_v33 = vmul.f32 %v805_v32, %v1872_v27 }
 0x681   :  { %v816_v34 = vmul.f32 %v1408_v50, %v809_v33 }
 0x683   :  { %v823_v35 = vadd.f32 %v1409_v54, %v816_v34 }
 0x685   :  { %1360 = vmatmul.msk.f32.gmra.mxu0 %vm86_vm0, %v823_v35 }
 0x6d1   :  { %v880_v36 = vpop.f32.mrf.mxu0 }
 0x6d2   :  { %v881_v30 = vadd.f32 %v1925_v23, %v880_v36 }
 0x6d4   :  { %v896_v38 = vmul.f32 0.70710677, %v881_v30  ;;  %v892_v21 = vmul.f32 0.5, %v881_v30 }
 0x6d6   :  { %v908_v37 = vand.u32 2147483647, %v896_v38  ;;  %vm900_vm13 = vcmp.ge.f32.partialorder %v896_v38, 0.0 }
 0x6d7   :  { %v904_v16 = vsel %vm900_vm13, 1.0, %v1522_v15 }
 0x6d8   :  { %v912_v19 = vmul.f32 0.3275911, %v908_v37  ;;  %v960_v46 = vsub.f32 0.0, %v908_v37 }
 0x6d9   :  { %v883_v27 = vpop.f32.mrf.mxu0 }
 0x6da   :  { %v916_v29 = vadd.f32 1.0, %v912_v19  ;;  %v884_v40 = vadd.f32 %v1925_v23, %v883_v27  ;;  %v964_v50 = vmul.f32 %v960_v46, %v908_v37 }
 0x6dc   :  { %1465 = vrcp.f32 %v916_v29  ;;  %v897_v41 = vmul.f32 0.70710677, %v884_v40  ;;  %v968_v54 = vmul.f32 1.442695, %v964_v50  ;;  %v893_v39 = vmul.f32 0.5, %v884_v40 }
 0x6de   :  { %v909_v43 = vand.u32 2147483647, %v897_v41  ;;  %vm901_vm14 = vcmp.ge.f32.partialorder %v897_v41, 0.0 }
 0x6df   :  { %v905_v34 = vsel %vm901_vm14, 1.0, %v1522_v15  ;;  %vm1272_vm14 = vcmask 392192  }
 0x6e0   :  { %v913_v44 = vmul.f32 0.3275911, %v909_v43  ;;  %v961_v55 = vsub.f32 0.0, %v909_v43 }
 0x6e2   :  { %v1466_v45 = vpop.eup %1465  ;;  %v917_v47 = vadd.f32 1.0, %v913_v44  ;;  %v965_v62 = vmul.f32 %v961_v55, %v909_v43 }
 0x6e3   :  { %v924_v48 = vmul.f32 1.0614054, %v1466_v45 }
 0x6e4   :  { %1467 = vrcp.f32 %v917_v47  ;;  %v970_v7 = vmul.f32 1.442695, %v965_v62 }
 0x6e5   :  { %v928_v49 = vadd.f32 -1.4531521, %v924_v48  ;;  %1469 = vpow2.f32 %v968_v54 }
 0x6e6   :  { %1471 = vpow2.f32 %v970_v7 }
 0x6e7   :  { %v932_v51 = vmul.f32 %v1466_v45, %v928_v49 }
 0x6e9   :  { %v936_v52 = vadd.f32 1.4214138, %v932_v51 }
 0x6ea   :  { %v1468_v53 = vpop.eup %1467 }
 0x6eb   :  { %v940_v56 = vmul.f32 %v1466_v45, %v936_v52  ;;  %v925_v58 = vmul.f32 1.0614054, %v1468_v53  ;;  %v1470_v10 = vpop.eup %1469 }
 0x6ec   :  { %v1472_v25 = vpop.eup %1471 }
 0x6ed   :  { %v944_v59 = vadd.f32 -0.28449672, %v940_v56  ;;  %v929_v60 = vadd.f32 -1.4531521, %v925_v58 }
 0x6ef   :  { %v948_v63 = vmul.f32 %v1466_v45, %v944_v59  ;;  %v933_v2 = vmul.f32 %v1468_v53, %v929_v60 }
 0x6f1   :  { %v952_v1 = vadd.f32 0.2548296, %v948_v63  ;;  %v937_v6 = vadd.f32 1.4214138, %v933_v2 }
 0x6f3   :  { %v956_v5 = vmul.f32 %v1466_v45, %v952_v1  ;;  %v941_v9 = vmul.f32 %v1468_v53, %v937_v6 }
 0x6f5   :  { %v976_v0 = vmul.f32 %v1470_v10, %v956_v5  ;;  %v945_v11 = vadd.f32 -0.28449672, %v941_v9 }
 0x6f7   :  { %v980_v12 = vsub.f32 1.0, %v976_v0  ;;  %v949_v13 = vmul.f32 %v1468_v53, %v945_v11 }
 0x6f9   :  { %v984_v4 = vmul.f32 %v980_v12, %v904_v16  ;;  %v953_v17 = vadd.f32 0.2548296, %v949_v13 }
 0x6fa   :  { %v886_v18 = vpop.f32.mrf.mxu0 }
 0x6fb   :  { %v988_v22 = vadd.f32 1.0, %v984_v4  ;;  %v887_v20 = vadd.f32 %v1925_v23, %v886_v18  ;;  %v957_v24 = vmul.f32 %v1468_v53, %v953_v17 }
 0x6fd   :  { %v992_v26 = vmul.f32 %v988_v22, %v892_v21  ;;  %v898_v28 = vmul.f32 0.70710677, %v887_v20  ;;  %v977_v31 = vmul.f32 %v1472_v25, %v957_v24  ;;  %v894_v13 = vmul.f32 0.5, %v887_v20  ;;  %v1411_v20 = vld [vmem:[%s2057_s12] ss:$0 sm:$0xff] }
 0x6ff   :  { %v910_v32 = vand.u32 2147483647, %v898_v28  ;;  %1363 = vmatmul.msk.f32.vlgmr.msrb.gmra.mxu3 %vm996_vm12, %v992_v26  ;;  %v981_v33 = vsub.f32 1.0, %v977_v31  ;;  %vm902_vm15 = vcmp.ge.f32.partialorder %v898_v28, 0.0 }
 0x700   :  { %v906_v0 = vsel %vm902_vm15, 1.0, %v1522_v15 }
 0x701   :  { %v914_v35 = vmul.f32 0.3275911, %v910_v32  ;;  %v985_v36 = vmul.f32 %v981_v33, %v905_v34  ;;  %v962_v44 = vsub.f32 0.0, %v910_v32 }
 0x702   :  { %v889_v38 = vpop.f32.mrf.mxu0 }
 0x703   :  { %v918_v37 = vadd.f32 1.0, %v914_v35  ;;  %v890_v30 = vadd.f32 %v1925_v23, %v889_v38  ;;  %v989_v19 = vadd.f32 1.0, %v985_v36  ;;  %v966_v48 = vmul.f32 %v962_v44, %v910_v32 }
 0x705   :  { %1473 = vrcp.f32 %v918_v37  ;;  %v899_v27 = vmul.f32 0.70710677, %v890_v30  ;;  %v993_v29 = vmul.f32 %v989_v19, %v893_v39  ;;  %v972_v23 = vmul.f32 1.442695, %v966_v48 }
 0x706   :  { %v895_v26 = vmul.f32 0.5, %v890_v30 }
 0x707   :  { %v911_v41 = vand.u32 2147483647, %v899_v27  ;;  %1364 = vmatmul.msk.f32.gmra.mxu3 %vm996_vm12, %v993_v29  ;;  %vm903_vm1 = vcmp.ge.f32.partialorder %v899_v27, 0.0 }
 0x708   :  { %v907_v24 = vsel %vm903_vm1, 1.0, %v1522_v15 }
 0x709   :  { %v915_v42 = vmul.f32 0.3275911, %v911_v41  ;;  %v963_v52 = vsub.f32 0.0, %v911_v41 }
 0x70b   :  { %v1474_v43 = vpop.eup %1473  ;;  %v919_v45 = vadd.f32 1.0, %v915_v42  ;;  %v967_v56 = vmul.f32 %v963_v52, %v911_v41 }
 0x70c   :  { %v926_v46 = vmul.f32 1.0614054, %v1474_v43 }
 0x70d   :  { %1475 = vrcp.f32 %v919_v45  ;;  %v974_v63 = vmul.f32 1.442695, %v967_v56 }
 0x70e   :  { %v930_v47 = vadd.f32 -1.4531521, %v926_v46  ;;  %1477 = vpow2.f32 %v972_v23 }
 0x70f   :  { %1479 = vpow2.f32 %v974_v63  ;;  %v1167_v63 = vld [vmem:[%s2060_s15 + $0x10] sm:$0xff] }
 0x710   :  { %v934_v49 = vmul.f32 %v1474_v43, %v930_v47 }
 0x712   :  { %v938_v50 = vadd.f32 1.4214138, %v934_v49 }
 0x713   :  { %v1476_v51 = vpop.eup %1475 }
 0x714   :  { %v942_v40 = vmul.f32 %v1474_v43, %v938_v50  ;;  %v927_v53 = vmul.f32 1.0614054, %v1476_v51  ;;  %v1478_v6 = vpop.eup %1477 }
 0x715   :  { %v1480_v17 = vpop.eup %1479 }
 0x716   :  { %v946_v54 = vadd.f32 -0.28449672, %v942_v40  ;;  %v931_v55 = vadd.f32 -1.4531521, %v927_v53 }
 0x718   :  { %v950_v58 = vmul.f32 %v1474_v43, %v946_v54  ;;  %v935_v59 = vmul.f32 %v1476_v51, %v931_v55 }
 0x71a   :  { %v954_v60 = vadd.f32 0.2548296, %v950_v58  ;;  %v939_v62 = vadd.f32 1.4214138, %v935_v59  ;;  %v1170_v59 = vld [vmem:[%s2060_s15 + $0x28] sm:$0xff] }
 0x71b   :  { %1367 = vmatpush.xpose.msk.msrb.mxu1 %vm86_vm0, %v1170_v59 }
 0x71c   :  { %v958_v2 = vmul.f32 %v1474_v43, %v954_v60  ;;  %v943_v1 = vmul.f32 %v1476_v51, %v939_v62  ;;  %v1169_v60 = vld [vmem:[%s2060_s15 + $0x20] sm:$0xff]  ;;  %v1168_v62 = vld [vmem:[%s2060_s15 + $0x18] sm:$0xff] }
 0x71e   :  { %v978_v7 = vmul.f32 %v1478_v6, %v958_v2  ;;  %v947_v5 = vadd.f32 -0.28449672, %v943_v1  ;;  %v1166_v1 = vld [vmem:[%s2060_s15 + $0x8] sm:$0xff] }
 0x71f   :  { %1368 = vmatpush.xpose.msk.msrb.mxu1 %vm86_vm0, %v1169_v60 }
 0x720   :  { %v982_v9 = vsub.f32 1.0, %v978_v7  ;;  %v951_v10 = vmul.f32 %v1476_v51, %v947_v5  ;;  %v1165_v7 = vld [vmem:[%s2060_s15] sm:$0xff] }
 0x722   :  { %v986_v11 = vmul.f32 %v982_v9, %v906_v0  ;;  %v955_v12 = vadd.f32 0.2548296, %v951_v10 }
 0x723   :  { %1369 = vmatpush.xpose.msk.msrb.mxu1 %vm86_vm0, %v1168_v62  ;;  %v1241_v62 = vld [vmem:[%s2068_s25 + $0x10] sm:$0xff] }
 0x724   :  { %v990_v16 = vadd.f32 1.0, %v986_v11  ;;  %v959_v4 = vmul.f32 %v1476_v51, %v955_v12 }
 0x726   :  { %v994_v18 = vmul.f32 %v990_v16, %v894_v13  ;;  %v979_v21 = vmul.f32 %v1480_v17, %v959_v4 }
 0x727   :  { %1370 = vmatpush.xpose.msk.msrb.mxu1 %vm86_vm0, %v1167_v63 }
 0x728   :  { %1365 = vmatmul.msk.f32.gmra.mxu3 %vm996_vm12, %v994_v18  ;;  %v983_v22 = vsub.f32 1.0, %v979_v21  ;;  %v2007_v21 = vld [vmem:[%s2058_s13] ss:$0 sm:$0xff] }
 0x72a   :  { %v987_v25 = vmul.f32 %v983_v22, %v907_v24 }
 0x72b   :  { %1371 = vmatpush.xpose.msk.msrb.mxu1 %vm86_vm0, %v1166_v1  ;;  %v1248_v1 = vrot.slane %v1241_v62, 4 }
 0x72c   :  { %v991_v28 = vadd.f32 1.0, %v987_v25 }
 0x72e   :  { %v995_v31 = vmul.f32 %v991_v28, %v895_v26  ;;  %v1413_v28 = vld [vmem:[%s2059_s14] ss:$0 sm:$0xff] }
 0x72f   :  { %1372 = vmatpush.xpose.msk.msrb.mxu1 %vm86_vm0, %v1165_v7  ;;  %v1414_v7 = vld [vmem:[%s2061_s16] ss:$0 sm:$0xff]  ;;  %s1523_s16 = smov [#allocation2]  }
 0x730   :  { %1366 = vmatmul.msk.f32.gmra.mxu3 %vm996_vm12, %v995_v31  ;;  %s1298_s11 = sshll.u32 %s1523_s16, 4  ;;  %s1299_s11 = int_to_ptr.vmem [resolvable:$true] %s1298_s11 }
 0x782   :  { %v1032_v32 = vpop.f32.mrf.mxu3 }
 0x783   :  { %v1044_v33 = vadd.f32 %v1032_v32, %v1830_v57 }
 0x785   :  { %v1051_v34 = vadd.f32 %v1411_v20, %v1044_v33 }
 0x787   :  { %v1057_v35 = vsel %vm86_vm0, %v1051_v34, 0.0 }
 0x788   :  { %1058 = vadd.xlane.f32.xlu0 %v1057_v35 }
 0x78a   :  { %v1035_v36 = vpop.f32.mrf.mxu3 }
 0x78b   :  { %v1045_v15 = vadd.f32 %v1035_v36, %v1835_v61 }
 0x78d   :  { %v1052_v38 = vadd.f32 %v1411_v20, %v1045_v15 }
 0x78f   :  { %v1060_v37 = vsel %vm86_vm0, %v1052_v38, 0.0 }
 0x790   :  { %1061 = vadd.xlane.f32.xlu2 %v1060_v37 }
 0x7ab   :  { %v1038_v30 = vpop.f32.mrf.mxu3 }
 0x7ac   :  { %v1046_v19 = vadd.f32 %v1038_v30, %v1840_v3 }
 0x7ae   :  { %v1053_v39 = vadd.f32 %v1411_v20, %v1046_v19 }
 0x7b0   :  { %v1063_v27 = vsel %vm86_vm0, %v1053_v39, 0.0 }
 0x7b1   :  { %1064 = vadd.xlane.f32.xlu1 %v1063_v27 }
 0x7b3   :  { %v1041_v29 = vpop.f32.mrf.mxu3 }
 0x7b4   :  { %v1047_v57 = vadd.f32 %v1041_v29, %v1845_v8 }
 0x7b6   :  { %v1054_v41 = vadd.f32 %v1411_v20, %v1047_v57 }
 0x7b8   :  { %v1066_v42 = vsel %vm86_vm0, %v1054_v41, 0.0 }
 0x7b9   :  { %1067 = vadd.xlane.f32.xlu0 %v1066_v42 }
 0x7fb   :  { %v1059_v43 = vpop.xlane.xlu0 %1058 }
 0x7fc   :  { %v1069_v61 = vmul.f32 %v1059_v43, %v1642_v14 }
 0x7fe   :  { %v1073_v44 = vsub.f32 %v1051_v34, %v1069_v61 }
 0x800   :  { %v1077_v45 = vmul.f32 %v1073_v44, %v1073_v44 }
 0x802   :  { %v1081_v46 = vsel %vm86_vm0, %v1077_v45, 0.0 }
 0x803   :  { %1082 = vadd.xlane.f32.xlu2 %v1081_v46  ;;  %v1062_v3 = vpop.xlane.xlu2 %1061 }
 0x804   :  { %v1070_v47 = vmul.f32 %v1062_v3, %v1642_v14 }
 0x806   :  { %v1961_v48 = vsub.f32 %v1052_v38, %v1070_v47  ;;  %v1239_v38 = vld [vmem:[%s2068_s25] sm:$0xff] }
 0x807   :  { %v1247_v30 = vrot.slane %v1239_v38, 4 }
 0x808   :  { %v1078_v8 = vmul.f32 %v1961_v48, %v1961_v48 }
 0x80a   :  { %v1084_v49 = vsel %vm86_vm0, %v1078_v8, 0.0 }
 0x80b   :  { %1085 = vadd.xlane.f32.xlu1 %v1084_v49 }
 0x824   :  { %v1065_v50 = vpop.xlane.xlu1 %1064 }
 0x825   :  { %v1071_v51 = vmul.f32 %v1065_v50, %v1642_v14 }
 0x827   :  { %v1967_v23 = vsub.f32 %v1053_v39, %v1071_v51 }
 0x829   :  { %v1079_v52 = vmul.f32 %v1967_v23, %v1967_v23 }
 0x82b   :  { %v1087_v40 = vsel %vm86_vm0, %v1079_v52, 0.0 }
 0x82c   :  { %1088 = vadd.xlane.f32.xlu0 %v1087_v40  ;;  %v1068_v53 = vpop.xlane.xlu0 %1067 }
 0x82d   :  { %v1072_v54 = vmul.f32 %v1068_v53, %v1642_v14 }
 0x82f   :  { %v1973_v55 = vsub.f32 %v1054_v41, %v1072_v54 }
 0x831   :  { %v1080_v56 = vmul.f32 %v1973_v55, %v1973_v55 }
 0x833   :  { %v1090_v58 = vsel %vm86_vm0, %v1080_v56, 0.0 }
 0x834   :  { %1091 = vadd.xlane.f32.xlu2 %v1090_v58 }
 0x876   :  { %v1083_v2 = vpop.xlane.xlu2 %1082 }
 0x877   :  { %v1093_v6 = vmul.f32 %v1083_v2, %v1642_v14 }
 0x879   :  { %v1097_v5 = vadd.f32 1e-05, %v1093_v6 }
 0x87b   :  { %1481 = vrsqrt.f32 %v1097_v5  ;;  %vm1107_vm3 = vweird.f32 %v1097_v5 }
 0x87e   :  { %v1086_v9 = vpop.xlane.xlu1 %1085 }
 0x87f   :  { %v1094_v10 = vmul.f32 %v1086_v9, %v1642_v14 }
 0x881   :  { %v1482_v0 = vpop.eup %1481  ;;  %v1098_v12 = vadd.f32 1e-05, %v1094_v10 }
 0x882   :  { %v1102_v11 = vmul.f32 %v1482_v0, %v1097_v5  ;;  %vm1108_vm2 = vweird.f32 %v1482_v0 }
 0x883   :  { %1483 = vrsqrt.f32 %v1098_v12  ;;  %vm1109_vm4 = vmor %vm1107_vm3, %vm1108_vm2  ;;  %vm1117_vm6 = vweird.f32 %v1098_v12 }
 0x884   :  { %v1103_v13 = vmul.f32 %v1482_v0, %v1102_v11 }
 0x886   :  { %v1104_v16 = vmul.f32 0.5, %v1103_v13 }
 0x888   :  { %v1105_v4 = vsub.f32 1.5, %v1104_v16 }
 0x889   :  { %v1484_v17 = vpop.eup %1483 }
 0x88a   :  { %v1106_v18 = vmul.f32 %v1482_v0, %v1105_v4  ;;  %v1112_v22 = vmul.f32 %v1484_v17, %v1098_v12  ;;  %vm1118_vm5 = vweird.f32 %v1484_v17 }
 0x88b   :  { %vm1119_vm7 = vmor %vm1117_vm6, %vm1118_vm5 }
 0x88c   :  { %v1110_v24 = vsel %vm1109_vm4, %v1482_v0, %v1106_v18  ;;  %v1113_v26 = vmul.f32 %v1484_v17, %v1112_v22 }
 0x88d   :  { %v1141_v25 = vmul.f32 %v1110_v24, %v1073_v44 }
 0x88e   :  { %v1114_v20 = vmul.f32 0.5, %v1113_v26 }
 0x88f   :  { %v1148_v31 = vmul.f32 %v2007_v21, %v1141_v25 }
 0x890   :  { %v1115_v32 = vsub.f32 1.5, %v1114_v20 }
 0x891   :  { %v1155_v33 = vadd.f32 %v1413_v28, %v1148_v31 }
 0x892   :  { %v1116_v34 = vmul.f32 %v1484_v17, %v1115_v32 }
 0x893   :  { %v1163_v35 = vrot.slane %v1155_v33, 4  ;;  %1175 = vst [vmem:[#allocation1] ss:$2 sm:$0xff] %v1155_v33 }
 0x894   :  { %v1120_v36 = vsel %vm1119_vm7, %v1484_v17, %v1116_v34 }
 0x895   :  { %1177 = vst [vmem:[#allocation1 + $0x1] ss:$2 sm:$0xff] %v1163_v35  ;;  %v1142_v15 = vmul.f32 %v1120_v36, %v1961_v48 }
 0x897   :  { %v1149_v37 = vmul.f32 %v2007_v21, %v1142_v15 }
 0x899   :  { %v1156_v19 = vadd.f32 %v1413_v28, %v1149_v37 }
 0x89b   :  { %1179 = vst [vmem:[#allocation1 + $0x10] ss:$2 sm:$0xff] %v1156_v19 }
 0x89c   :  { %v1186_v39 = vld.sshfl [vmem:[#allocation1] sm:$0xff pattern:$0x75316420] }
 0x89d   :  { %1373 = vmatmul.msk.f32.vlgmr.msrb.gmra.mxu1 %vm86_vm0, %v1186_v39  ;;  %1249 = vst [vmem:[#allocation1] ss:$2 sm:$0xff] %v1239_v38 }
 0x89e   :  { %1251 = vst [vmem:[#allocation1 + $0x1] ss:$2 sm:$0xff] %v1247_v30 }
 0x89f   :  { %v1089_v27 = vpop.xlane.xlu0 %1088 }
 0x8a0   :  { %v1095_v29 = vmul.f32 %v1089_v27, %v1642_v14 }
 0x8a2   :  { %v1099_v57 = vadd.f32 1e-05, %v1095_v29 }
 0x8a4   :  { %1485 = vrsqrt.f32 %v1099_v57  ;;  %vm1127_vm9 = vweird.f32 %v1099_v57 }
 0x8a5   :  { %v1260_v9 = vld.sshfl [vmem:[#allocation1] sm:$0xff pattern:$0x75316420] }
 0x8a7   :  { %v1092_v41 = vpop.xlane.xlu2 %1091 }
 0x8a8   :  { %v1096_v42 = vmul.f32 %v1092_v41, %v1642_v14 }
 0x8aa   :  { %v1486_v43 = vpop.eup %1485  ;;  %v1100_v61 = vadd.f32 1e-05, %v1096_v42 }
 0x8ab   :  { %v1122_v44 = vmul.f32 %v1486_v43, %v1099_v57  ;;  %vm1128_vm8 = vweird.f32 %v1486_v43 }
 0x8ac   :  { %1487 = vrsqrt.f32 %v1100_v61  ;;  %vm1129_vm10 = vmor %vm1127_vm9, %vm1128_vm8  ;;  %vm1137_vm12 = vweird.f32 %v1100_v61 }
 0x8ad   :  { %v1123_v45 = vmul.f32 %v1486_v43, %v1122_v44 }
 0x8af   :  { %v1124_v46 = vmul.f32 0.5, %v1123_v45 }
 0x8b1   :  { %v1125_v3 = vsub.f32 1.5, %v1124_v46 }
 0x8b2   :  { %v1488_v47 = vpop.eup %1487 }
 0x8b3   :  { %v1126_v48 = vmul.f32 %v1486_v43, %v1125_v3  ;;  %v1132_v8 = vmul.f32 %v1488_v47, %v1100_v61  ;;  %vm1138_vm11 = vweird.f32 %v1488_v47 }
 0x8b4   :  { %vm1139_vm13 = vmor %vm1137_vm12, %vm1138_vm11 }
 0x8b5   :  { %v1130_v49 = vsel %vm1129_vm10, %v1486_v43, %v1126_v48  ;;  %v1133_v50 = vmul.f32 %v1488_v47, %v1132_v8 }
 0x8b6   :  { %v1143_v51 = vmul.f32 %v1130_v49, %v1967_v23  ;;  %v1240_v23 = vld [vmem:[%s2068_s25 + $0x8] sm:$0xf] }
 0x8b7   :  { %v1134_v52 = vmul.f32 0.5, %v1133_v50 }
 0x8b8   :  { %v1150_v14 = vmul.f32 %v2007_v21, %v1143_v51 }
 0x8b9   :  { %v1135_v40 = vsub.f32 1.5, %v1134_v52 }
 0x8ba   :  { %v1157_v53 = vadd.f32 %v1413_v28, %v1150_v14 }
 0x8bb   :  { %v1136_v54 = vmul.f32 %v1488_v47, %v1135_v40 }
 0x8bc   :  { %1181 = vst [vmem:[#allocation1 + $0x11] ss:$2 sm:$0xff] %v1157_v53  ;;  %v1164_v56 = vrot.slane %v1157_v53, 4 }
 0x8bd   :  { %v1140_v58 = vsel %vm1139_vm13, %v1488_v47, %v1136_v54 }
 0x8be   :  { %v1144_v59 = vmul.f32 %v1140_v58, %v1973_v55  ;;  %1183 = vst [vmem:[#allocation1 + $0x20] ss:$2 sm:$0xff] %v1164_v56  ;;  %v1242_v55 = vld [vmem:[%s2068_s25 + $0x18] sm:$0xf] }
 0x8c0   :  { %v1151_v60 = vmul.f32 %v2007_v21, %v1144_v59 }
 0x8c2   :  { %v1158_v63 = vadd.f32 %v1413_v28, %v1151_v60 }
 0x8c3   :  { %v1187_v2 = vld.sshfl [vmem:[#allocation1 + $0x10] sm:$0xff pattern:$0x75316420] }
 0x8c4   :  { %1374 = vmatmul.msk.f32.gmra.mxu1 %vm86_vm0, %v1187_v2  ;;  %1253 = vst [vmem:[#allocation1 + $0x10] ss:$2 sm:$0xff] %v1240_v23 }
 0x8c5   :  { %1255 = vst [vmem:[#allocation1 + $0x11] ss:$2 sm:$0xff] %v1241_v62 }
 0x8c6   :  { %1185 = vst [vmem:[#allocation1 + $0x21] ss:$2 sm:$0xff] %v1158_v63 }
 0x8cc   :  { %v1261_v16 = vld.sshfl [vmem:[#allocation1 + $0x10] sm:$0xff pattern:$0x75316420] }
 0x8cd   :  { %v1188_v6 = vld.sshfl [vmem:[#allocation1 + $0x20] sm:$0xff pattern:$0x75316420] }
 0x8ce   :  { %1375 = vmatmul.msk.f32.gmra.mxu1 %vm86_vm0, %v1188_v6  ;;  %1257 = vst [vmem:[#allocation1 + $0x20] ss:$2 sm:$0xff] %v1248_v1  ;;  %vm1291_vm0 = vcmask 0  }
 0x8cf   :  { %1259 = vst [vmem:[#allocation1 + $0x21] ss:$2 sm:$0xff] %v1242_v55 }
 0x8d6   :  { %v1262_v24 = vld.sshfl [vmem:[#allocation1 + $0x20] sm:$0xff pattern:$0x75316420] }
 0x91a   :  { %v1230_v5 = vpop.f32.mrf.mxu1 }
 0x91b   :  { %v1231_v10 = vadd.f32 %v1414_v7, %v1230_v5 }
 0x91d   :  { %v1266_v0 = vsub.f32 %v1231_v10, %v1260_v9 }
 0x91f   :  { %v1269_v11 = vmul.f32 %v1266_v0, %v1266_v0 }
 0x921   :  { %v1273_v12 = vsel %vm1272_vm14, %v1269_v11, 0.0 }
 0x922   :  { %1274 = vadd.xlane.f32.xlu1 %v1273_v12 }
 0x941   :  { %v1233_v13 = vpop.f32.mrf.mxu1 }
 0x942   :  { %v1234_v4 = vadd.f32 %v1414_v7, %v1233_v13 }
 0x944   :  { %v1267_v17 = vsub.f32 %v1234_v4, %v1261_v16 }
 0x946   :  { %v1270_v18 = vmul.f32 %v1267_v17, %v1267_v17 }
 0x948   :  { %v1276_v21 = vsel %vm1272_vm14, %v1270_v18, 0.0 }
 0x949   :  { %1277 = vadd.xlane.f32.xlu0 %v1276_v21 }
 0x94b   :  { %v1236_v22 = vpop.f32.mrf.mxu1 }
 0x94c   :  { %v1237_v25 = vadd.f32 %v1414_v7, %v1236_v22 }
 0x94e   :  { %v1268_v26 = vsub.f32 %v1237_v25, %v1262_v24 }
 0x950   :  { %v1271_v28 = vmul.f32 %v1268_v26, %v1268_v26 }
 0x952   :  { %v1279_v31 = vsel %vm1272_vm14, %v1271_v28, 0.0 }
 0x953   :  { %1280 = vadd.xlane.f32.xlu2 %v1279_v31 }
 0x995   :  { %v1275_v32 = vpop.xlane.xlu1 %1274 }
 0x9bc   :  { %v1278_v20 = vpop.xlane.xlu0 %1277 }
 0x9bd   :  { %v1282_v33 = vadd.f32 %v1278_v20, %v1275_v32 }
 0x9c6   :  { %v1281_v34 = vpop.xlane.xlu2 %1280 }
 0x9c7   :  { %v1283_v35 = vadd.f32 %v1282_v33, %v1281_v34 }
 0x9c9   :  { %v1284_v36 = vrot.slane %v1283_v35, 4 }
 0x9cb   :  { %v1285_v15 = vadd.f32 %v1284_v36, %v1283_v35 }
 0x9cd   :  { %v1286_v38 = vrot.slane %v1285_v15, 2 }
 0x9cf   :  { %v1287_v37 = vadd.f32 %v1286_v38, %v1285_v15 }
 0x9d1   :  { %v1288_v30 = vrot.slane %v1287_v37, 1 }
 0x9d3   :  { %v1289_v19 = vadd.f32 %v1288_v30, %v1287_v37 }
 0x9d5   :  { %v1290_v39 = vmul.f32 0.00086805556, %v1289_v19 }
 0x9d7   :  { %1292 = vst.msk [vmem:[#allocation2] sm:$0x1] %vm1291_vm0, %v1290_v39 }
 0x9d8   :  { %1303 = dma.vmem_to_hbm [thread:$0]  %s1299_s11, 16, %s1301_s29, [#allocation3]  }
 0x9d9   :  { %1513 = dma.done.wait [#allocation3], 16  }
 0x9da   :  { %1514 = vsyncadd [#allocation3], 4294967280 }
 0x9db   :  { %1308 = vsyncpa [#allocation3], 1 }

</bundles_post_ra>
